<compile_context>
chip_gen: v5e
topology: v5e:2x2
jax: 0.10.0
libtpu: 0.0.40
codegen_flags: <defaults>
</compile_context>

<pallas_src>
import functools

import jax
import jax.numpy as jnp
import numpy as np
from jax.experimental import pallas as pl
from jax.experimental.pallas import tpu as pltpu

NUM_KERNELS = 6
KMAX = 2 * (NUM_KERNELS - 1) + 1   # 11
PAD = NUM_KERNELS - 1              # 5
LANE = 128


def _wavelet_kernel(x_ref, w_ref, b_ref, o_ref):
    # x_ref: [Hp, Wp, Cin]            padded activations of one batch element
    # w_ref: [KMAX, KMAX*Cin, Coutp]  averaged conv kernel, (kw, cin) flattened row-major
    # b_ref: [1, Coutp]               averaged bias (f32)
    # o_ref: [TILE_H, W, Coutp]       output tile (f32)
    Hp, Wp, Cin = x_ref.shape
    TH, W, Coutp = o_ref.shape

    ht = pl.program_id(1)
    row0 = ht * TH
    if TH % 8 == 0:
        row0 = pl.multiple_of(row0, 8)

    # Rows [row0, row0 + TH + 2*PAD) of the padded input cover this tile + halo.
    x_win = x_ref[pl.ds(row0, TH + 2 * PAD), :, :]            # [TH+2*PAD, Wp, Cin]
    w_all = w_ref[...]                                        # [KMAX, KMAX*Cin, Coutp]
    bias = b_ref[...]                                         # [1, Coutp] f32

    acc = jnp.zeros((TH * W, Coutp), jnp.float32)
    for kh in range(KMAX):                                    # 11 unrolled matmuls
        slab = x_win[kh:kh + TH]                              # [TH, Wp, Cin]
        # im2col over (kw, cin): cols[h, w, kw*Cin + c] = slab[h, w + kw, c]
        cols = jnp.concatenate(
            [slab[:, kw:kw + W, :] for kw in range(KMAX)], axis=-1)   # [TH, W, KMAX*Cin]
        patch = cols.reshape(TH * W, KMAX * Cin)
        acc = acc + jnp.dot(patch, w_all[kh],
                            preferred_element_type=jnp.float32)

    out = acc + bias                                          # broadcast [1, Coutp]
    o_ref[...] = out.reshape(TH, W, Coutp).astype(o_ref.dtype)


def _pick_tile_h(H, max_rows=64):
    """Largest divisor of H <= max_rows, preferring multiples of 8 (v7x-safe tiles)."""
    if H <= max_rows:
        return H
    mult8 = [t for t in range(8, max_rows + 1, 8) if H % t == 0]
    if mult8:
        return max(mult8)
    divs = [t for t in range(1, max_rows + 1) if H % t == 0]
    return max(divs)


@functools.partial(jax.jit, static_argnames=("compute_dtype", "tile_h"))
def wavelet_inception_block(x_nchw, w_stacked, b_stacked, *,
                            compute_dtype=jnp.bfloat16, tile_h=None):
    """Forward pass. x_nchw: [B, Cin, H, W] (PyTorch layout). Returns [B, Cout, H, W] f32."""
    B, Cin, H, W = x_nchw.shape
    Cout = w_stacked.shape[-1]

    # Hoisted branch average (linearity of convolution).
    w_mean = jnp.mean(w_stacked.astype(jnp.float32), axis=0)      # [KMAX,KMAX,Cin,Cout]
    b_mean = jnp.mean(b_stacked.astype(jnp.float32), axis=0)      # [Cout]

    # Lane-dense output channels (pad Cout up to a multiple of 128).
    coutp = max(LANE, ((Cout + LANE - 1) // LANE) * LANE)
    w_rows = w_mean.reshape(KMAX, KMAX * Cin, Cout)               # (kw, cin) row-major
    w_rows = jnp.pad(w_rows, ((0, 0), (0, 0), (0, coutp - Cout))).astype(compute_dtype)
    b_pad = jnp.pad(b_mean, (0, coutp - Cout)).reshape(1, coutp)  # stays f32

    # NCHW -> NHWC, "same" padding for the (virtual) 11x11 averaged kernel.
    x = jnp.transpose(x_nchw, (0, 2, 3, 1))
    xp = jnp.pad(x, ((0, 0), (PAD, PAD), (PAD, PAD), (0, 0))).astype(compute_dtype)
    Hp, Wp = H + 2 * PAD, W + 2 * PAD

    th = tile_h if tile_h is not None else _pick_tile_h(H)
    if H % th != 0:
        raise ValueError(f"tile_h={th} must divide H={H}")
    n_ht = H // th

    out_p = pl.pallas_call(
        _wavelet_kernel,
        out_shape=jax.ShapeDtypeStruct((B, H, W, coutp), jnp.float32),
        grid_spec=pltpu.PrefetchScalarGridSpec(
            num_scalar_prefetch=0,
            grid=(B, n_ht),
            in_specs=[
                # Activations: block index depends only on b -> DMA'd once per batch
                # element and revisited across the inner H-tile axis.
                pl.BlockSpec((None, Hp, Wp, Cin), lambda b, ht: (b, 0, 0, 0)),
                # Averaged weights / bias: constant block index -> stay resident.
                pl.BlockSpec((KMAX, KMAX * Cin, coutp), lambda b, ht: (0, 0, 0)),
                pl.BlockSpec((1, coutp), lambda b, ht: (0, 0)),
            ],
            out_specs=pl.BlockSpec((None, th, W, coutp), lambda b, ht: (b, ht, 0, 0)),
        ),
        compiler_params=pltpu.CompilerParams(
            dimension_semantics=("parallel", "parallel"),   # lets v7x's 2 TCs split the grid
            vmem_limit_bytes=48 * 1024 * 1024,              # safe on v7x (64 MiB physical)
        ),
    )(xp, w_rows, b_pad)

    out = out_p[..., :Cout]                                  # drop channel padding
    return jnp.transpose(out, (0, 3, 1, 2))                  # NHWC -> NCHW


def init_params(key, in_channels, out_channels, num_kernels=NUM_KERNELS):
    """Deterministic Kaiming-normal (fan_out, relu) init; biases = 0 (as in the module)."""
    weights, biases = [], []
    w_stacked = jnp.zeros((num_kernels, KMAX, KMAX, in_channels, out_channels),
                          jnp.float32)
    for i in range(num_kernels):
        k = 2 * i + 1
        key, sub = jax.random.split(key)
        fan_out = out_channels * k * k
        std = (2.0 / fan_out) ** 0.5
        w = std * jax.random.normal(sub, (k, k, in_channels, out_channels), jnp.float32)
        b = jnp.zeros((out_channels,), jnp.float32)
        weights.append(w)
        biases.append(b)
        off = (KMAX - k) // 2
        w_stacked = w_stacked.at[i, off:off + k, off:off + k].set(w)
    b_stacked = jnp.stack(biases, axis=0)
    return weights, biases, w_stacked, b_stacked


def ref_forward(x_nchw, weights, biases):
    """Pure-JAX reference matching the PyTorch forward (stack of 6 convs, mean)."""
    x = jnp.transpose(x_nchw, (0, 2, 3, 1))
    outs = []
    for i, (w, b) in enumerate(zip(weights, biases)):
        y = jax.lax.conv_general_dilated(
            x, w, window_strides=(1, 1), padding=[(i, i), (i, i)],
            dimension_numbers=('NHWC', 'HWIO', 'NHWC'))
        outs.append(y + b)
    res = jnp.mean(jnp.stack(outs, axis=-1), axis=-1)
    return jnp.transpose(res, (0, 3, 1, 2))


if __name__ == "__main__":
    key = jax.random.PRNGKey(0)
    B, Cin, Cout, H, W = 2, 4, 8, 16, 16
    key, kx, kp = jax.random.split(key, 3)
    x = jax.random.normal(kx, (B, Cin, H, W), jnp.float32)
    weights, biases, w_stacked, b_stacked = init_params(kp, Cin, Cout)

    ref = jax.block_until_ready(ref_forward(x, weights, biases))

    # f32 MXU path, multi-tile H grid (exercises the halo slicing): tight tolerance.
    out_f32 = jax.block_until_ready(
        wavelet_inception_block(x, w_stacked, b_stacked,
                                compute_dtype=jnp.float32, tile_h=8))
    assert out_f32.shape == (B, Cout, H, W)
    np.testing.assert_allclose(np.asarray(out_f32), np.asarray(ref),
                               rtol=2e-3, atol=2e-3)

    # Default path: bf16 MXU inputs, f32 accumulation (bf16-appropriate tolerance).
    out_bf16 = jax.block_until_ready(
        wavelet_inception_block(x, w_stacked, b_stacked))
    assert out_bf16.shape == (B, Cout, H, W)
    np.testing.assert_allclose(np.asarray(out_bf16), np.asarray(ref),
                               rtol=2e-2, atol=2e-2)

    print("KERNEL_OK")
</pallas_src>

<mosaic_0001>
module attributes {stable_mosaic.version = 11 : i64} {
  func.func @_wavelet_kernel(%arg0: i32, %arg1: i32, %arg2: memref<1x26x26x4xf32, #tpu.memory_space<vmem>>, %arg3: memref<11x44x128xf32, #tpu.memory_space<vmem>>, %arg4: memref<1x128xf32, #tpu.memory_space<vmem>>, %arg5: memref<1x8x16x128xf32, #tpu.memory_space<vmem>>) attributes {dimension_semantics = [#tpu.dimension_semantics<parallel>, #tpu.dimension_semantics<parallel>], iteration_bounds = array<i64: 2, 2>, scalar_prefetch = 0 : i64, scratch_operands = 0 : i64, tpu.core_type = #tpu.core_type<tc>, window_params = [{transform_indices = @transform_0, window_bounds = array<i64: 1, 26, 26, 4>}, {pipeline_mode = #tpu.pipeline_mode<synchronous>, transform_indices = @transform_1, window_bounds = array<i64: 11, 44, 128>}, {pipeline_mode = #tpu.pipeline_mode<synchronous>, transform_indices = @transform_2, window_bounds = array<i64: 1, 128>}, {transform_indices = @transform_3, window_bounds = array<i64: 1, 8, 16, 128>}]} {
    %c8_i32 = arith.constant 8 : i32
    %0 = arith.muli %arg1, %c8_i32 : i32
    %1 = tpu.assume_multiple %0, 8 : i32
    %c0 = arith.constant 0 : index
    %2 = arith.index_cast %1 : i32 to index
    %c0_0 = arith.constant 0 : index
    %c0_1 = arith.constant 0 : index
    %3 = vector.load %arg2[%c0, %2, %c0_0, %c0_1] : memref<1x26x26x4xf32, #tpu.memory_space<vmem>>, vector<1x18x26x4xf32>
    %4 = vector.shape_cast %3 : vector<1x18x26x4xf32> to vector<18x26x4xf32>
    %c0_2 = arith.constant 0 : index
    %c0_3 = arith.constant 0 : index
    %c0_4 = arith.constant 0 : index
    %5 = vector.load %arg3[%c0_2, %c0_3, %c0_4] : memref<11x44x128xf32, #tpu.memory_space<vmem>>, vector<11x44x128xf32>
    %c0_5 = arith.constant 0 : index
    %c0_6 = arith.constant 0 : index
    %6 = vector.load %arg4[%c0_5, %c0_6] : memref<1x128xf32, #tpu.memory_space<vmem>>, vector<1x128xf32>
    %cst = arith.constant 0.000000e+00 : f32
    %7 = vector.broadcast %cst : f32 to vector<128x128xf32>
    %8 = vector.extract_strided_slice %4 {offsets = [0, 0, 0], sizes = [8, 26, 4], strides = [1, 1, 1]} : vector<18x26x4xf32> to vector<8x26x4xf32>
    %9 = vector.extract_strided_slice %8 {offsets = [0, 0, 0], sizes = [8, 16, 4], strides = [1, 1, 1]} : vector<8x26x4xf32> to vector<8x16x4xf32>
    %10 = vector.extract_strided_slice %8 {offsets = [0, 1, 0], sizes = [8, 16, 4], strides = [1, 1, 1]} : vector<8x26x4xf32> to vector<8x16x4xf32>
    %11 = vector.extract_strided_slice %8 {offsets = [0, 2, 0], sizes = [8, 16, 4], strides = [1, 1, 1]} : vector<8x26x4xf32> to vector<8x16x4xf32>
    %12 = vector.extract_strided_slice %8 {offsets = [0, 3, 0], sizes = [8, 16, 4], strides = [1, 1, 1]} : vector<8x26x4xf32> to vector<8x16x4xf32>
    %13 = vector.extract_strided_slice %8 {offsets = [0, 4, 0], sizes = [8, 16, 4], strides = [1, 1, 1]} : vector<8x26x4xf32> to vector<8x16x4xf32>
    %14 = vector.extract_strided_slice %8 {offsets = [0, 5, 0], sizes = [8, 16, 4], strides = [1, 1, 1]} : vector<8x26x4xf32> to vector<8x16x4xf32>
    %15 = vector.extract_strided_slice %8 {offsets = [0, 6, 0], sizes = [8, 16, 4], strides = [1, 1, 1]} : vector<8x26x4xf32> to vector<8x16x4xf32>
    %16 = vector.extract_strided_slice %8 {offsets = [0, 7, 0], sizes = [8, 16, 4], strides = [1, 1, 1]} : vector<8x26x4xf32> to vector<8x16x4xf32>
    %17 = vector.extract_strided_slice %8 {offsets = [0, 8, 0], sizes = [8, 16, 4], strides = [1, 1, 1]} : vector<8x26x4xf32> to vector<8x16x4xf32>
    %18 = vector.extract_strided_slice %8 {offsets = [0, 9, 0], sizes = [8, 16, 4], strides = [1, 1, 1]} : vector<8x26x4xf32> to vector<8x16x4xf32>
    %19 = vector.extract_strided_slice %8 {offsets = [0, 10, 0], sizes = [8, 16, 4], strides = [1, 1, 1]} : vector<8x26x4xf32> to vector<8x16x4xf32>
    %20 = tpu.concatenate %9, %10, %11, %12, %13, %14, %15, %16, %17, %18, %19 in 2 : vector<8x16x4xf32>, vector<8x16x4xf32>, vector<8x16x4xf32>, vector<8x16x4xf32>, vector<8x16x4xf32>, vector<8x16x4xf32>, vector<8x16x4xf32>, vector<8x16x4xf32>, vector<8x16x4xf32>, vector<8x16x4xf32>, vector<8x16x4xf32> -> vector<8x16x44xf32>
    %21 = vector.shape_cast %20 : vector<8x16x44xf32> to vector<128x44xf32>
    %22 = vector.extract_strided_slice %5 {offsets = [0, 0, 0], sizes = [1, 44, 128], strides = [1, 1, 1]} : vector<11x44x128xf32> to vector<1x44x128xf32>
    %23 = vector.shape_cast %22 : vector<1x44x128xf32> to vector<44x128xf32>
    %cst_7 = arith.constant dense<0.000000e+00> : vector<128x128xf32>
    %24 = tpu.matmul %21, %23, %cst_7 {dimension_numbers = #tpu.dot_dimension_numbers<[1], [0], [0], [1], [0, 0, 1, 1], [], []>} : vector<128x44xf32>, vector<44x128xf32>, vector<128x128xf32> -> vector<128x128xf32>
    %25 = arith.addf %7, %24 : vector<128x128xf32>
    %26 = vector.extract_strided_slice %4 {offsets = [1, 0, 0], sizes = [8, 26, 4], strides = [1, 1, 1]} : vector<18x26x4xf32> to vector<8x26x4xf32>
    %27 = vector.extract_strided_slice %26 {offsets = [0, 0, 0], sizes = [8, 16, 4], strides = [1, 1, 1]} : vector<8x26x4xf32> to vector<8x16x4xf32>
    %28 = vector.extract_strided_slice %26 {offsets = [0, 1, 0], sizes = [8, 16, 4], strides = [1, 1, 1]} : vector<8x26x4xf32> to vector<8x16x4xf32>
    %29 = vector.extract_strided_slice %26 {offsets = [0, 2, 0], sizes = [8, 16, 4], strides = [1, 1, 1]} : vector<8x26x4xf32> to vector<8x16x4xf32>
    %30 = vector.extract_strided_slice %26 {offsets = [0, 3, 0], sizes = [8, 16, 4], strides = [1, 1, 1]} : vector<8x26x4xf32> to vector<8x16x4xf32>
    %31 = vector.extract_strided_slice %26 {offsets = [0, 4, 0], sizes = [8, 16, 4], strides = [1, 1, 1]} : vector<8x26x4xf32> to vector<8x16x4xf32>
    %32 = vector.extract_strided_slice %26 {offsets = [0, 5, 0], sizes = [8, 16, 4], strides = [1, 1, 1]} : vector<8x26x4xf32> to vector<8x16x4xf32>
    %33 = vector.extract_strided_slice %26 {offsets = [0, 6, 0], sizes = [8, 16, 4], strides = [1, 1, 1]} : vector<8x26x4xf32> to vector<8x16x4xf32>
    %34 = vector.extract_strided_slice %26 {offsets = [0, 7, 0], sizes = [8, 16, 4], strides = [1, 1, 1]} : vector<8x26x4xf32> to vector<8x16x4xf32>
    %35 = vector.extract_strided_slice %26 {offsets = [0, 8, 0], sizes = [8, 16, 4], strides = [1, 1, 1]} : vector<8x26x4xf32> to vector<8x16x4xf32>
    %36 = vector.extract_strided_slice %26 {offsets = [0, 9, 0], sizes = [8, 16, 4], strides = [1, 1, 1]} : vector<8x26x4xf32> to vector<8x16x4xf32>
    %37 = vector.extract_strided_slice %26 {offsets = [0, 10, 0], sizes = [8, 16, 4], strides = [1, 1, 1]} : vector<8x26x4xf32> to vector<8x16x4xf32>
    %38 = tpu.concatenate %27, %28, %29, %30, %31, %32, %33, %34, %35, %36, %37 in 2 : vector<8x16x4xf32>, vector<8x16x4xf32>, vector<8x16x4xf32>, vector<8x16x4xf32>, vector<8x16x4xf32>, vector<8x16x4xf32>, vector<8x16x4xf32>, vector<8x16x4xf32>, vector<8x16x4xf32>, vector<8x16x4xf32>, vector<8x16x4xf32> -> vector<8x16x44xf32>
    %39 = vector.shape_cast %38 : vector<8x16x44xf32> to vector<128x44xf32>
    %40 = vector.extract_strided_slice %5 {offsets = [1, 0, 0], sizes = [1, 44, 128], strides = [1, 1, 1]} : vector<11x44x128xf32> to vector<1x44x128xf32>
    %41 = vector.shape_cast %40 : vector<1x44x128xf32> to vector<44x128xf32>
    %cst_8 = arith.constant dense<0.000000e+00> : vector<128x128xf32>
    %42 = tpu.matmul %39, %41, %cst_8 {dimension_numbers = #tpu.dot_dimension_numbers<[1], [0], [0], [1], [0, 0, 1, 1], [], []>} : vector<128x44xf32>, vector<44x128xf32>, vector<128x128xf32> -> vector<128x128xf32>
    %43 = arith.addf %25, %42 : vector<128x128xf32>
    %44 = vector.extract_strided_slice %4 {offsets = [2, 0, 0], sizes = [8, 26, 4], strides = [1, 1, 1]} : vector<18x26x4xf32> to vector<8x26x4xf32>
    %45 = vector.extract_strided_slice %44 {offsets = [0, 0, 0], sizes = [8, 16, 4], strides = [1, 1, 1]} : vector<8x26x4xf32> to vector<8x16x4xf32>
    %46 = vector.extract_strided_slice %44 {offsets = [0, 1, 0], sizes = [8, 16, 4], strides = [1, 1, 1]} : vector<8x26x4xf32> to vector<8x16x4xf32>
    %47 = vector.extract_strided_slice %44 {offsets = [0, 2, 0], sizes = [8, 16, 4], strides = [1, 1, 1]} : vector<8x26x4xf32> to vector<8x16x4xf32>
    %48 = vector.extract_strided_slice %44 {offsets = [0, 3, 0], sizes = [8, 16, 4], strides = [1, 1, 1]} : vector<8x26x4xf32> to vector<8x16x4xf32>
    %49 = vector.extract_strided_slice %44 {offsets = [0, 4, 0], sizes = [8, 16, 4], strides = [1, 1, 1]} : vector<8x26x4xf32> to vector<8x16x4xf32>
    %50 = vector.extract_strided_slice %44 {offsets = [0, 5, 0], sizes = [8, 16, 4], strides = [1, 1, 1]} : vector<8x26x4xf32> to vector<8x16x4xf32>
    %51 = vector.extract_strided_slice %44 {offsets = [0, 6, 0], sizes = [8, 16, 4], strides = [1, 1, 1]} : vector<8x26x4xf32> to vector<8x16x4xf32>
    %52 = vector.extract_strided_slice %44 {offsets = [0, 7, 0], sizes = [8, 16, 4], strides = [1, 1, 1]} : vector<8x26x4xf32> to vector<8x16x4xf32>
    %53 = vector.extract_strided_slice %44 {offsets = [0, 8, 0], sizes = [8, 16, 4], strides = [1, 1, 1]} : vector<8x26x4xf32> to vector<8x16x4xf32>
    %54 = vector.extract_strided_slice %44 {offsets = [0, 9, 0], sizes = [8, 16, 4], strides = [1, 1, 1]} : vector<8x26x4xf32> to vector<8x16x4xf32>
    %55 = vector.extract_strided_slice %44 {offsets = [0, 10, 0], sizes = [8, 16, 4], strides = [1, 1, 1]} : vector<8x26x4xf32> to vector<8x16x4xf32>
    %56 = tpu.concatenate %45, %46, %47, %48, %49, %50, %51, %52, %53, %54, %55 in 2 : vector<8x16x4xf32>, vector<8x16x4xf32>, vector<8x16x4xf32>, vector<8x16x4xf32>, vector<8x16x4xf32>, vector<8x16x4xf32>, vector<8x16x4xf32>, vector<8x16x4xf32>, vector<8x16x4xf32>, vector<8x16x4xf32>, vector<8x16x4xf32> -> vector<8x16x44xf32>
    %57 = vector.shape_cast %56 : vector<8x16x44xf32> to vector<128x44xf32>
    %58 = vector.extract_strided_slice %5 {offsets = [2, 0, 0], sizes = [1, 44, 128], strides = [1, 1, 1]} : vector<11x44x128xf32> to vector<1x44x128xf32>
    %59 = vector.shape_cast %58 : vector<1x44x128xf32> to vector<44x128xf32>
    %cst_9 = arith.constant dense<0.000000e+00> : vector<128x128xf32>
    %60 = tpu.matmul %57, %59, %cst_9 {dimension_numbers = #tpu.dot_dimension_numbers<[1], [0], [0], [1], [0, 0, 1, 1], [], []>} : vector<128x44xf32>, vector<44x128xf32>, vector<128x128xf32> -> vector<128x128xf32>
    %61 = arith.addf %43, %60 : vector<128x128xf32>
    %62 = vector.extract_strided_slice %4 {offsets = [3, 0, 0], sizes = [8, 26, 4], strides = [1, 1, 1]} : vector<18x26x4xf32> to vector<8x26x4xf32>
    %63 = vector.extract_strided_slice %62 {offsets = [0, 0, 0], sizes = [8, 16, 4], strides = [1, 1, 1]} : vector<8x26x4xf32> to vector<8x16x4xf32>
    %64 = vector.extract_strided_slice %62 {offsets = [0, 1, 0], sizes = [8, 16, 4], strides = [1, 1, 1]} : vector<8x26x4xf32> to vector<8x16x4xf32>
    %65 = vector.extract_strided_slice %62 {offsets = [0, 2, 0], sizes = [8, 16, 4], strides = [1, 1, 1]} : vector<8x26x4xf32> to vector<8x16x4xf32>
    %66 = vector.extract_strided_slice %62 {offsets = [0, 3, 0], sizes = [8, 16, 4], strides = [1, 1, 1]} : vector<8x26x4xf32> to vector<8x16x4xf32>
    %67 = vector.extract_strided_slice %62 {offsets = [0, 4, 0], sizes = [8, 16, 4], strides = [1, 1, 1]} : vector<8x26x4xf32> to vector<8x16x4xf32>
    %68 = vector.extract_strided_slice %62 {offsets = [0, 5, 0], sizes = [8, 16, 4], strides = [1, 1, 1]} : vector<8x26x4xf32> to vector<8x16x4xf32>
    %69 = vector.extract_strided_slice %62 {offsets = [0, 6, 0], sizes = [8, 16, 4], strides = [1, 1, 1]} : vector<8x26x4xf32> to vector<8x16x4xf32>
    %70 = vector.extract_strided_slice %62 {offsets = [0, 7, 0], sizes = [8, 16, 4], strides = [1, 1, 1]} : vector<8x26x4xf32> to vector<8x16x4xf32>
    %71 = vector.extract_strided_slice %62 {offsets = [0, 8, 0], sizes = [8, 16, 4], strides = [1, 1, 1]} : vector<8x26x4xf32> to vector<8x16x4xf32>
    %72 = vector.extract_strided_slice %62 {offsets = [0, 9, 0], sizes = [8, 16, 4], strides = [1, 1, 1]} : vector<8x26x4xf32> to vector<8x16x4xf32>
    %73 = vector.extract_strided_slice %62 {offsets = [0, 10, 0], sizes = [8, 16, 4], strides = [1, 1, 1]} : vector<8x26x4xf32> to vector<8x16x4xf32>
    %74 = tpu.concatenate %63, %64, %65, %66, %67, %68, %69, %70, %71, %72, %73 in 2 : vector<8x16x4xf32>, vector<8x16x4xf32>, vector<8x16x4xf32>, vector<8x16x4xf32>, vector<8x16x4xf32>, vector<8x16x4xf32>, vector<8x16x4xf32>, vector<8x16x4xf32>, vector<8x16x4xf32>, vector<8x16x4xf32>, vector<8x16x4xf32> -> vector<8x16x44xf32>
    %75 = vector.shape_cast %74 : vector<8x16x44xf32> to vector<128x44xf32>
    %76 = vector.extract_strided_slice %5 {offsets = [3, 0, 0], sizes = [1, 44, 128], strides = [1, 1, 1]} : vector<11x44x128xf32> to vector<1x44x128xf32>
    %77 = vector.shape_cast %76 : vector<1x44x128xf32> to vector<44x128xf32>
    %cst_10 = arith.constant dense<0.000000e+00> : vector<128x128xf32>
    %78 = tpu.matmul %75, %77, %cst_10 {dimension_numbers = #tpu.dot_dimension_numbers<[1], [0], [0], [1], [0, 0, 1, 1], [], []>} : vector<128x44xf32>, vector<44x128xf32>, vector<128x128xf32> -> vector<128x128xf32>
    %79 = arith.addf %61, %78 : vector<128x128xf32>
    %80 = vector.extract_strided_slice %4 {offsets = [4, 0, 0], sizes = [8, 26, 4], strides = [1, 1, 1]} : vector<18x26x4xf32> to vector<8x26x4xf32>
    %81 = vector.extract_strided_slice %80 {offsets = [0, 0, 0], sizes = [8, 16, 4], strides = [1, 1, 1]} : vector<8x26x4xf32> to vector<8x16x4xf32>
    %82 = vector.extract_strided_slice %80 {offsets = [0, 1, 0], sizes = [8, 16, 4], strides = [1, 1, 1]} : vector<8x26x4xf32> to vector<8x16x4xf32>
    %83 = vector.extract_strided_slice %80 {offsets = [0, 2, 0], sizes = [8, 16, 4], strides = [1, 1, 1]} : vector<8x26x4xf32> to vector<8x16x4xf32>
    %84 = vector.extract_strided_slice %80 {offsets = [0, 3, 0], sizes = [8, 16, 4], strides = [1, 1, 1]} : vector<8x26x4xf32> to vector<8x16x4xf32>
    %85 = vector.extract_strided_slice %80 {offsets = [0, 4, 0], sizes = [8, 16, 4], strides = [1, 1, 1]} : vector<8x26x4xf32> to vector<8x16x4xf32>
    %86 = vector.extract_strided_slice %80 {offsets = [0, 5, 0], sizes = [8, 16, 4], strides = [1, 1, 1]} : vector<8x26x4xf32> to vector<8x16x4xf32>
    %87 = vector.extract_strided_slice %80 {offsets = [0, 6, 0], sizes = [8, 16, 4], strides = [1, 1, 1]} : vector<8x26x4xf32> to vector<8x16x4xf32>
    %88 = vector.extract_strided_slice %80 {offsets = [0, 7, 0], sizes = [8, 16, 4], strides = [1, 1, 1]} : vector<8x26x4xf32> to vector<8x16x4xf32>
    %89 = vector.extract_strided_slice %80 {offsets = [0, 8, 0], sizes = [8, 16, 4], strides = [1, 1, 1]} : vector<8x26x4xf32> to vector<8x16x4xf32>
    %90 = vector.extract_strided_slice %80 {offsets = [0, 9, 0], sizes = [8, 16, 4], strides = [1, 1, 1]} : vector<8x26x4xf32> to vector<8x16x4xf32>
    %91 = vector.extract_strided_slice %80 {offsets = [0, 10, 0], sizes = [8, 16, 4], strides = [1, 1, 1]} : vector<8x26x4xf32> to vector<8x16x4xf32>
    %92 = tpu.concatenate %81, %82, %83, %84, %85, %86, %87, %88, %89, %90, %91 in 2 : vector<8x16x4xf32>, vector<8x16x4xf32>, vector<8x16x4xf32>, vector<8x16x4xf32>, vector<8x16x4xf32>, vector<8x16x4xf32>, vector<8x16x4xf32>, vector<8x16x4xf32>, vector<8x16x4xf32>, vector<8x16x4xf32>, vector<8x16x4xf32> -> vector<8x16x44xf32>
    %93 = vector.shape_cast %92 : vector<8x16x44xf32> to vector<128x44xf32>
    %94 = vector.extract_strided_slice %5 {offsets = [4, 0, 0], sizes = [1, 44, 128], strides = [1, 1, 1]} : vector<11x44x128xf32> to vector<1x44x128xf32>
    %95 = vector.shape_cast %94 : vector<1x44x128xf32> to vector<44x128xf32>
    %cst_11 = arith.constant dense<0.000000e+00> : vector<128x128xf32>
    %96 = tpu.matmul %93, %95, %cst_11 {dimension_numbers = #tpu.dot_dimension_numbers<[1], [0], [0], [1], [0, 0, 1, 1], [], []>} : vector<128x44xf32>, vector<44x128xf32>, vector<128x128xf32> -> vector<128x128xf32>
    %97 = arith.addf %79, %96 : vector<128x128xf32>
    %98 = vector.extract_strided_slice %4 {offsets = [5, 0, 0], sizes = [8, 26, 4], strides = [1, 1, 1]} : vector<18x26x4xf32> to vector<8x26x4xf32>
    %99 = vector.extract_strided_slice %98 {offsets = [0, 0, 0], sizes = [8, 16, 4], strides = [1, 1, 1]} : vector<8x26x4xf32> to vector<8x16x4xf32>
    %100 = vector.extract_strided_slice %98 {offsets = [0, 1, 0], sizes = [8, 16, 4], strides = [1, 1, 1]} : vector<8x26x4xf32> to vector<8x16x4xf32>
    %101 = vector.extract_strided_slice %98 {offsets = [0, 2, 0], sizes = [8, 16, 4], strides = [1, 1, 1]} : vector<8x26x4xf32> to vector<8x16x4xf32>
    %102 = vector.extract_strided_slice %98 {offsets = [0, 3, 0], sizes = [8, 16, 4], strides = [1, 1, 1]} : vector<8x26x4xf32> to vector<8x16x4xf32>
    %103 = vector.extract_strided_slice %98 {offsets = [0, 4, 0], sizes = [8, 16, 4], strides = [1, 1, 1]} : vector<8x26x4xf32> to vector<8x16x4xf32>
    %104 = vector.extract_strided_slice %98 {offsets = [0, 5, 0], sizes = [8, 16, 4], strides = [1, 1, 1]} : vector<8x26x4xf32> to vector<8x16x4xf32>
    %105 = vector.extract_strided_slice %98 {offsets = [0, 6, 0], sizes = [8, 16, 4], strides = [1, 1, 1]} : vector<8x26x4xf32> to vector<8x16x4xf32>
    %106 = vector.extract_strided_slice %98 {offsets = [0, 7, 0], sizes = [8, 16, 4], strides = [1, 1, 1]} : vector<8x26x4xf32> to vector<8x16x4xf32>
    %107 = vector.extract_strided_slice %98 {offsets = [0, 8, 0], sizes = [8, 16, 4], strides = [1, 1, 1]} : vector<8x26x4xf32> to vector<8x16x4xf32>
    %108 = vector.extract_strided_slice %98 {offsets = [0, 9, 0], sizes = [8, 16, 4], strides = [1, 1, 1]} : vector<8x26x4xf32> to vector<8x16x4xf32>
    %109 = vector.extract_strided_slice %98 {offsets = [0, 10, 0], sizes = [8, 16, 4], strides = [1, 1, 1]} : vector<8x26x4xf32> to vector<8x16x4xf32>
    %110 = tpu.concatenate %99, %100, %101, %102, %103, %104, %105, %106, %107, %108, %109 in 2 : vector<8x16x4xf32>, vector<8x16x4xf32>, vector<8x16x4xf32>, vector<8x16x4xf32>, vector<8x16x4xf32>, vector<8x16x4xf32>, vector<8x16x4xf32>, vector<8x16x4xf32>, vector<8x16x4xf32>, vector<8x16x4xf32>, vector<8x16x4xf32> -> vector<8x16x44xf32>
    %111 = vector.shape_cast %110 : vector<8x16x44xf32> to vector<128x44xf32>
    %112 = vector.extract_strided_slice %5 {offsets = [5, 0, 0], sizes = [1, 44, 128], strides = [1, 1, 1]} : vector<11x44x128xf32> to vector<1x44x128xf32>
    %113 = vector.shape_cast %112 : vector<1x44x128xf32> to vector<44x128xf32>
    %cst_12 = arith.constant dense<0.000000e+00> : vector<128x128xf32>
    %114 = tpu.matmul %111, %113, %cst_12 {dimension_numbers = #tpu.dot_dimension_numbers<[1], [0], [0], [1], [0, 0, 1, 1], [], []>} : vector<128x44xf32>, vector<44x128xf32>, vector<128x128xf32> -> vector<128x128xf32>
    %115 = arith.addf %97, %114 : vector<128x128xf32>
    %116 = vector.extract_strided_slice %4 {offsets = [6, 0, 0], sizes = [8, 26, 4], strides = [1, 1, 1]} : vector<18x26x4xf32> to vector<8x26x4xf32>
    %117 = vector.extract_strided_slice %116 {offsets = [0, 0, 0], sizes = [8, 16, 4], strides = [1, 1, 1]} : vector<8x26x4xf32> to vector<8x16x4xf32>
    %118 = vector.extract_strided_slice %116 {offsets = [0, 1, 0], sizes = [8, 16, 4], strides = [1, 1, 1]} : vector<8x26x4xf32> to vector<8x16x4xf32>
    %119 = vector.extract_strided_slice %116 {offsets = [0, 2, 0], sizes = [8, 16, 4], strides = [1, 1, 1]} : vector<8x26x4xf32> to vector<8x16x4xf32>
    %120 = vector.extract_strided_slice %116 {offsets = [0, 3, 0], sizes = [8, 16, 4], strides = [1, 1, 1]} : vector<8x26x4xf32> to vector<8x16x4xf32>
    %121 = vector.extract_strided_slice %116 {offsets = [0, 4, 0], sizes = [8, 16, 4], strides = [1, 1, 1]} : vector<8x26x4xf32> to vector<8x16x4xf32>
    %122 = vector.extract_strided_slice %116 {offsets = [0, 5, 0], sizes = [8, 16, 4], strides = [1, 1, 1]} : vector<8x26x4xf32> to vector<8x16x4xf32>
    %123 = vector.extract_strided_slice %116 {offsets = [0, 6, 0], sizes = [8, 16, 4], strides = [1, 1, 1]} : vector<8x26x4xf32> to vector<8x16x4xf32>
    %124 = vector.extract_strided_slice %116 {offsets = [0, 7, 0], sizes = [8, 16, 4], strides = [1, 1, 1]} : vector<8x26x4xf32> to vector<8x16x4xf32>
    %125 = vector.extract_strided_slice %116 {offsets = [0, 8, 0], sizes = [8, 16, 4], strides = [1, 1, 1]} : vector<8x26x4xf32> to vector<8x16x4xf32>
    %126 = vector.extract_strided_slice %116 {offsets = [0, 9, 0], sizes = [8, 16, 4], strides = [1, 1, 1]} : vector<8x26x4xf32> to vector<8x16x4xf32>
    %127 = vector.extract_strided_slice %116 {offsets = [0, 10, 0], sizes = [8, 16, 4], strides = [1, 1, 1]} : vector<8x26x4xf32> to vector<8x16x4xf32>
    %128 = tpu.concatenate %117, %118, %119, %120, %121, %122, %123, %124, %125, %126, %127 in 2 : vector<8x16x4xf32>, vector<8x16x4xf32>, vector<8x16x4xf32>, vector<8x16x4xf32>, vector<8x16x4xf32>, vector<8x16x4xf32>, vector<8x16x4xf32>, vector<8x16x4xf32>, vector<8x16x4xf32>, vector<8x16x4xf32>, vector<8x16x4xf32> -> vector<8x16x44xf32>
    %129 = vector.shape_cast %128 : vector<8x16x44xf32> to vector<128x44xf32>
    %130 = vector.extract_strided_slice %5 {offsets = [6, 0, 0], sizes = [1, 44, 128], strides = [1, 1, 1]} : vector<11x44x128xf32> to vector<1x44x128xf32>
    %131 = vector.shape_cast %130 : vector<1x44x128xf32> to vector<44x128xf32>
    %cst_13 = arith.constant dense<0.000000e+00> : vector<128x128xf32>
    %132 = tpu.matmul %129, %131, %cst_13 {dimension_numbers = #tpu.dot_dimension_numbers<[1], [0], [0], [1], [0, 0, 1, 1], [], []>} : vector<128x44xf32>, vector<44x128xf32>, vector<128x128xf32> -> vector<128x128xf32>
    %133 = arith.addf %115, %132 : vector<128x128xf32>
    %134 = vector.extract_strided_slice %4 {offsets = [7, 0, 0], sizes = [8, 26, 4], strides = [1, 1, 1]} : vector<18x26x4xf32> to vector<8x26x4xf32>
    %135 = vector.extract_strided_slice %134 {offsets = [0, 0, 0], sizes = [8, 16, 4], strides = [1, 1, 1]} : vector<8x26x4xf32> to vector<8x16x4xf32>
    %136 = vector.extract_strided_slice %134 {offsets = [0, 1, 0], sizes = [8, 16, 4], strides = [1, 1, 1]} : vector<8x26x4xf32> to vector<8x16x4xf32>
    %137 = vector.extract_strided_slice %134 {offsets = [0, 2, 0], sizes = [8, 16, 4], strides = [1, 1, 1]} : vector<8x26x4xf32> to vector<8x16x4xf32>
    %138 = vector.extract_strided_slice %134 {offsets = [0, 3, 0], sizes = [8, 16, 4], strides = [1, 1, 1]} : vector<8x26x4xf32> to vector<8x16x4xf32>
    %139 = vector.extract_strided_slice %134 {offsets = [0, 4, 0], sizes = [8, 16, 4], strides = [1, 1, 1]} : vector<8x26x4xf32> to vector<8x16x4xf32>
    %140 = vector.extract_strided_slice %134 {offsets = [0, 5, 0], sizes = [8, 16, 4], strides = [1, 1, 1]} : vector<8x26x4xf32> to vector<8x16x4xf32>
    %141 = vector.extract_strided_slice %134 {offsets = [0, 6, 0], sizes = [8, 16, 4], strides = [1, 1, 1]} : vector<8x26x4xf32> to vector<8x16x4xf32>
    %142 = vector.extract_strided_slice %134 {offsets = [0, 7, 0], sizes = [8, 16, 4], strides = [1, 1, 1]} : vector<8x26x4xf32> to vector<8x16x4xf32>
    %143 = vector.extract_strided_slice %134 {offsets = [0, 8, 0], sizes = [8, 16, 4], strides = [1, 1, 1]} : vector<8x26x4xf32> to vector<8x16x4xf32>
    %144 = vector.extract_strided_slice %134 {offsets = [0, 9, 0], sizes = [8, 16, 4], strides = [1, 1, 1]} : vector<8x26x4xf32> to vector<8x16x4xf32>
    %145 = vector.extract_strided_slice %134 {offsets = [0, 10, 0], sizes = [8, 16, 4], strides = [1, 1, 1]} : vector<8x26x4xf32> to vector<8x16x4xf32>
    %146 = tpu.concatenate %135, %136, %137, %138, %139, %140, %141, %142, %143, %144, %145 in 2 : vector<8x16x4xf32>, vector<8x16x4xf32>, vector<8x16x4xf32>, vector<8x16x4xf32>, vector<8x16x4xf32>, vector<8x16x4xf32>, vector<8x16x4xf32>, vector<8x16x4xf32>, vector<8x16x4xf32>, vector<8x16x4xf32>, vector<8x16x4xf32> -> vector<8x16x44xf32>
    %147 = vector.shape_cast %146 : vector<8x16x44xf32> to vector<128x44xf32>
    %148 = vector.extract_strided_slice %5 {offsets = [7, 0, 0], sizes = [1, 44, 128], strides = [1, 1, 1]} : vector<11x44x128xf32> to vector<1x44x128xf32>
    %149 = vector.shape_cast %148 : vector<1x44x128xf32> to vector<44x128xf32>
    %cst_14 = arith.constant dense<0.000000e+00> : vector<128x128xf32>
    %150 = tpu.matmul %147, %149, %cst_14 {dimension_numbers = #tpu.dot_dimension_numbers<[1], [0], [0], [1], [0, 0, 1, 1], [], []>} : vector<128x44xf32>, vector<44x128xf32>, vector<128x128xf32> -> vector<128x128xf32>
    %151 = arith.addf %133, %150 : vector<128x128xf32>
    %152 = vector.extract_strided_slice %4 {offsets = [8, 0, 0], sizes = [8, 26, 4], strides = [1, 1, 1]} : vector<18x26x4xf32> to vector<8x26x4xf32>
    %153 = vector.extract_strided_slice %152 {offsets = [0, 0, 0], sizes = [8, 16, 4], strides = [1, 1, 1]} : vector<8x26x4xf32> to vector<8x16x4xf32>
    %154 = vector.extract_strided_slice %152 {offsets = [0, 1, 0], sizes = [8, 16, 4], strides = [1, 1, 1]} : vector<8x26x4xf32> to vector<8x16x4xf32>
    %155 = vector.extract_strided_slice %152 {offsets = [0, 2, 0], sizes = [8, 16, 4], strides = [1, 1, 1]} : vector<8x26x4xf32> to vector<8x16x4xf32>
    %156 = vector.extract_strided_slice %152 {offsets = [0, 3, 0], sizes = [8, 16, 4], strides = [1, 1, 1]} : vector<8x26x4xf32> to vector<8x16x4xf32>
    %157 = vector.extract_strided_slice %152 {offsets = [0, 4, 0], sizes = [8, 16, 4], strides = [1, 1, 1]} : vector<8x26x4xf32> to vector<8x16x4xf32>
    %158 = vector.extract_strided_slice %152 {offsets = [0, 5, 0], sizes = [8, 16, 4], strides = [1, 1, 1]} : vector<8x26x4xf32> to vector<8x16x4xf32>
    %159 = vector.extract_strided_slice %152 {offsets = [0, 6, 0], sizes = [8, 16, 4], strides = [1, 1, 1]} : vector<8x26x4xf32> to vector<8x16x4xf32>
    %160 = vector.extract_strided_slice %152 {offsets = [0, 7, 0], sizes = [8, 16, 4], strides = [1, 1, 1]} : vector<8x26x4xf32> to vector<8x16x4xf32>
    %161 = vector.extract_strided_slice %152 {offsets = [0, 8, 0], sizes = [8, 16, 4], strides = [1, 1, 1]} : vector<8x26x4xf32> to vector<8x16x4xf32>
    %162 = vector.extract_strided_slice %152 {offsets = [0, 9, 0], sizes = [8, 16, 4], strides = [1, 1, 1]} : vector<8x26x4xf32> to vector<8x16x4xf32>
    %163 = vector.extract_strided_slice %152 {offsets = [0, 10, 0], sizes = [8, 16, 4], strides = [1, 1, 1]} : vector<8x26x4xf32> to vector<8x16x4xf32>
    %164 = tpu.concatenate %153, %154, %155, %156, %157, %158, %159, %160, %161, %162, %163 in 2 : vector<8x16x4xf32>, vector<8x16x4xf32>, vector<8x16x4xf32>, vector<8x16x4xf32>, vector<8x16x4xf32>, vector<8x16x4xf32>, vector<8x16x4xf32>, vector<8x16x4xf32>, vector<8x16x4xf32>, vector<8x16x4xf32>, vector<8x16x4xf32> -> vector<8x16x44xf32>
    %165 = vector.shape_cast %164 : vector<8x16x44xf32> to vector<128x44xf32>
    %166 = vector.extract_strided_slice %5 {offsets = [8, 0, 0], sizes = [1, 44, 128], strides = [1, 1, 1]} : vector<11x44x128xf32> to vector<1x44x128xf32>
    %167 = vector.shape_cast %166 : vector<1x44x128xf32> to vector<44x128xf32>
    %cst_15 = arith.constant dense<0.000000e+00> : vector<128x128xf32>
    %168 = tpu.matmul %165, %167, %cst_15 {dimension_numbers = #tpu.dot_dimension_numbers<[1], [0], [0], [1], [0, 0, 1, 1], [], []>} : vector<128x44xf32>, vector<44x128xf32>, vector<128x128xf32> -> vector<128x128xf32>
    %169 = arith.addf %151, %168 : vector<128x128xf32>
    %170 = vector.extract_strided_slice %4 {offsets = [9, 0, 0], sizes = [8, 26, 4], strides = [1, 1, 1]} : vector<18x26x4xf32> to vector<8x26x4xf32>
    %171 = vector.extract_strided_slice %170 {offsets = [0, 0, 0], sizes = [8, 16, 4], strides = [1, 1, 1]} : vector<8x26x4xf32> to vector<8x16x4xf32>
    %172 = vector.extract_strided_slice %170 {offsets = [0, 1, 0], sizes = [8, 16, 4], strides = [1, 1, 1]} : vector<8x26x4xf32> to vector<8x16x4xf32>
    %173 = vector.extract_strided_slice %170 {offsets = [0, 2, 0], sizes = [8, 16, 4], strides = [1, 1, 1]} : vector<8x26x4xf32> to vector<8x16x4xf32>
    %174 = vector.extract_strided_slice %170 {offsets = [0, 3, 0], sizes = [8, 16, 4], strides = [1, 1, 1]} : vector<8x26x4xf32> to vector<8x16x4xf32>
    %175 = vector.extract_strided_slice %170 {offsets = [0, 4, 0], sizes = [8, 16, 4], strides = [1, 1, 1]} : vector<8x26x4xf32> to vector<8x16x4xf32>
    %176 = vector.extract_strided_slice %170 {offsets = [0, 5, 0], sizes = [8, 16, 4], strides = [1, 1, 1]} : vector<8x26x4xf32> to vector<8x16x4xf32>
    %177 = vector.extract_strided_slice %170 {offsets = [0, 6, 0], sizes = [8, 16, 4], strides = [1, 1, 1]} : vector<8x26x4xf32> to vector<8x16x4xf32>
    %178 = vector.extract_strided_slice %170 {offsets = [0, 7, 0], sizes = [8, 16, 4], strides = [1, 1, 1]} : vector<8x26x4xf32> to vector<8x16x4xf32>
    %179 = vector.extract_strided_slice %170 {offsets = [0, 8, 0], sizes = [8, 16, 4], strides = [1, 1, 1]} : vector<8x26x4xf32> to vector<8x16x4xf32>
    %180 = vector.extract_strided_slice %170 {offsets = [0, 9, 0], sizes = [8, 16, 4], strides = [1, 1, 1]} : vector<8x26x4xf32> to vector<8x16x4xf32>
    %181 = vector.extract_strided_slice %170 {offsets = [0, 10, 0], sizes = [8, 16, 4], strides = [1, 1, 1]} : vector<8x26x4xf32> to vector<8x16x4xf32>
    %182 = tpu.concatenate %171, %172, %173, %174, %175, %176, %177, %178, %179, %180, %181 in 2 : vector<8x16x4xf32>, vector<8x16x4xf32>, vector<8x16x4xf32>, vector<8x16x4xf32>, vector<8x16x4xf32>, vector<8x16x4xf32>, vector<8x16x4xf32>, vector<8x16x4xf32>, vector<8x16x4xf32>, vector<8x16x4xf32>, vector<8x16x4xf32> -> vector<8x16x44xf32>
    %183 = vector.shape_cast %182 : vector<8x16x44xf32> to vector<128x44xf32>
    %184 = vector.extract_strided_slice %5 {offsets = [9, 0, 0], sizes = [1, 44, 128], strides = [1, 1, 1]} : vector<11x44x128xf32> to vector<1x44x128xf32>
    %185 = vector.shape_cast %184 : vector<1x44x128xf32> to vector<44x128xf32>
    %cst_16 = arith.constant dense<0.000000e+00> : vector<128x128xf32>
    %186 = tpu.matmul %183, %185, %cst_16 {dimension_numbers = #tpu.dot_dimension_numbers<[1], [0], [0], [1], [0, 0, 1, 1], [], []>} : vector<128x44xf32>, vector<44x128xf32>, vector<128x128xf32> -> vector<128x128xf32>
    %187 = arith.addf %169, %186 : vector<128x128xf32>
    %188 = vector.extract_strided_slice %4 {offsets = [10, 0, 0], sizes = [8, 26, 4], strides = [1, 1, 1]} : vector<18x26x4xf32> to vector<8x26x4xf32>
    %189 = vector.extract_strided_slice %188 {offsets = [0, 0, 0], sizes = [8, 16, 4], strides = [1, 1, 1]} : vector<8x26x4xf32> to vector<8x16x4xf32>
    %190 = vector.extract_strided_slice %188 {offsets = [0, 1, 0], sizes = [8, 16, 4], strides = [1, 1, 1]} : vector<8x26x4xf32> to vector<8x16x4xf32>
    %191 = vector.extract_strided_slice %188 {offsets = [0, 2, 0], sizes = [8, 16, 4], strides = [1, 1, 1]} : vector<8x26x4xf32> to vector<8x16x4xf32>
    %192 = vector.extract_strided_slice %188 {offsets = [0, 3, 0], sizes = [8, 16, 4], strides = [1, 1, 1]} : vector<8x26x4xf32> to vector<8x16x4xf32>
    %193 = vector.extract_strided_slice %188 {offsets = [0, 4, 0], sizes = [8, 16, 4], strides = [1, 1, 1]} : vector<8x26x4xf32> to vector<8x16x4xf32>
    %194 = vector.extract_strided_slice %188 {offsets = [0, 5, 0], sizes = [8, 16, 4], strides = [1, 1, 1]} : vector<8x26x4xf32> to vector<8x16x4xf32>
    %195 = vector.extract_strided_slice %188 {offsets = [0, 6, 0], sizes = [8, 16, 4], strides = [1, 1, 1]} : vector<8x26x4xf32> to vector<8x16x4xf32>
    %196 = vector.extract_strided_slice %188 {offsets = [0, 7, 0], sizes = [8, 16, 4], strides = [1, 1, 1]} : vector<8x26x4xf32> to vector<8x16x4xf32>
    %197 = vector.extract_strided_slice %188 {offsets = [0, 8, 0], sizes = [8, 16, 4], strides = [1, 1, 1]} : vector<8x26x4xf32> to vector<8x16x4xf32>
    %198 = vector.extract_strided_slice %188 {offsets = [0, 9, 0], sizes = [8, 16, 4], strides = [1, 1, 1]} : vector<8x26x4xf32> to vector<8x16x4xf32>
    %199 = vector.extract_strided_slice %188 {offsets = [0, 10, 0], sizes = [8, 16, 4], strides = [1, 1, 1]} : vector<8x26x4xf32> to vector<8x16x4xf32>
    %200 = tpu.concatenate %189, %190, %191, %192, %193, %194, %195, %196, %197, %198, %199 in 2 : vector<8x16x4xf32>, vector<8x16x4xf32>, vector<8x16x4xf32>, vector<8x16x4xf32>, vector<8x16x4xf32>, vector<8x16x4xf32>, vector<8x16x4xf32>, vector<8x16x4xf32>, vector<8x16x4xf32>, vector<8x16x4xf32>, vector<8x16x4xf32> -> vector<8x16x44xf32>
    %201 = vector.shape_cast %200 : vector<8x16x44xf32> to vector<128x44xf32>
    %202 = vector.extract_strided_slice %5 {offsets = [10, 0, 0], sizes = [1, 44, 128], strides = [1, 1, 1]} : vector<11x44x128xf32> to vector<1x44x128xf32>
    %203 = vector.shape_cast %202 : vector<1x44x128xf32> to vector<44x128xf32>
    %cst_17 = arith.constant dense<0.000000e+00> : vector<128x128xf32>
    %204 = tpu.matmul %201, %203, %cst_17 {dimension_numbers = #tpu.dot_dimension_numbers<[1], [0], [0], [1], [0, 0, 1, 1], [], []>} : vector<128x44xf32>, vector<44x128xf32>, vector<128x128xf32> -> vector<128x128xf32>
    %205 = arith.addf %187, %204 : vector<128x128xf32>
    %206 = vector.broadcast %6 : vector<1x128xf32> to vector<128x128xf32>
    %207 = arith.addf %205, %206 : vector<128x128xf32>
    %208 = vector.shape_cast %207 : vector<128x128xf32> to vector<8x16x128xf32>
    %c0_18 = arith.constant 0 : index
    %c0_19 = arith.constant 0 : index
    %c0_20 = arith.constant 0 : index
    %c0_21 = arith.constant 0 : index
    %209 = vector.load %arg5[%c0_18, %c0_19, %c0_20, %c0_21] : memref<1x8x16x128xf32, #tpu.memory_space<vmem>>, vector<1x8x16x128xf32>
    %210 = vector.shape_cast %209 : vector<1x8x16x128xf32> to vector<8x16x128xf32>
    %211 = vector.shape_cast %208 : vector<8x16x128xf32> to vector<1x8x16x128xf32>
    tpu.vector_store %arg5[%c0_18, %c0_19, %c0_20, %c0_21], %211 {strides = array<i32>} : memref<1x8x16x128xf32, #tpu.memory_space<vmem>>, vector<1x8x16x128xf32>,
    return
  }
  func.func @transform_0(%arg0: i32, %arg1: i32) -> (i32, i32, i32, i32) {
    %c0_i32 = arith.constant 0 : i32
    %c0_i32_0 = arith.constant 0 : i32
    %c0_i32_1 = arith.constant 0 : i32
    %c0_i32_2 = arith.constant 0 : i32
    return %arg0, %c0_i32, %c0_i32_0, %c0_i32_1 : i32, i32, i32, i32
  }
  func.func @transform_1(%arg0: i32, %arg1: i32) -> (i32, i32, i32) {
    %c0_i32 = arith.constant 0 : i32
    %c0_i32_0 = arith.constant 0 : i32
    %c0_i32_1 = arith.constant 0 : i32
    %c0_i32_2 = arith.constant 0 : i32
    return %c0_i32, %c0_i32_0, %c0_i32_1 : i32, i32, i32
  }
  func.func @transform_2(%arg0: i32, %arg1: i32) -> (i32, i32) {
    %c0_i32 = arith.constant 0 : i32
    %c0_i32_0 = arith.constant 0 : i32
    %c0_i32_1 = arith.constant 0 : i32
    return %c0_i32, %c0_i32_0 : i32, i32
  }
  func.func @transform_3(%arg0: i32, %arg1: i32) -> (i32, i32, i32, i32) {
    %c0_i32 = arith.constant 0 : i32
    %c0_i32_0 = arith.constant 0 : i32
    %c0_i32_1 = arith.constant 0 : i32
    return %arg0, %arg1, %c0_i32, %c0_i32_0 : i32, i32, i32, i32
  }
}

</mosaic_0001>

<bundles_post_ra>
// kernel: wavelet_inception_block.1
= control target key start
LH: loop header
LB: loop body
LE: loop exit
PB: predicated region body
PF: predicated region fallthrough
CT: control target
= control target key end

     0   :  { %s4061_s12 = smov 0   ;;  %s4063_s13 = smov 0   ;;  %s7810_s0 = inlined_call_operand.vmem [shape: f32[2,26,26,4], index: 0, kind: input, shape index: {}]   ;;  %s7811_s1 = inlined_call_operand.vmem [shape: f32[11,44,128], index: 1, kind: input, shape index: {}]   ;;  %s7812_s2 = inlined_call_operand.vmem [shape: f32[1,128], index: 2, kind: input, shape index: {}]   ;;  %s7813_s3 = inlined_call_operand.vmem [shape: f32[2,16,16,128], index: 3, kind: output, shape index: {}]  }
   0x1   :  { %s4065_s14 = smov 0   ;;  %s4067_s15 = smov 0  }
   0x2   :  { %s4069_s16 = smov 0  }
   0x3 LB: > { %s22_s17 = sadd.s32 1, %s4021_s14  ;;  %s25_s18 = sadd.s32 1, %s4025_s15  ;;  %s4029_s16 = sphi %s4069_s16, %s13_s16   ;;  %s4025_s15 = sphi %s4067_s15, %s8278_s15   ;;  %s4021_s14 = sphi %s4065_s14, %s8277_s14   ;;  %s4017_s13 = sphi %s4063_s13, %s8276_s13   ;;  %s4013_s12 = sphi %s4061_s12, %s8275_s12  }
   0x4   : > { %p23_p0 = scmp.ge.s32.totalorder %s22_s17, 2  ;;  %p3701_p1 = scmp.ge.s32.totalorder %s4029_s16, 1 }
   0x5   : > { %p151_p2 = scmp.lt.s32.totalorder %s4029_s16, 5 }
   0x6   : > { %s8280_s17 = smov (%p23_p0, %s22_s17), 0  ;;  %s8282_s18 = smov (!%p23_p0, %s25_s18), %s4025_s15 }
   0x7   : > { %p152_p3 = pnand %p3701_p1, %p151_p2  ;;  %p27_p4 = scmp.ge.s32.totalorder %s8282_s18, 2 }
   0x9   : > { %s8284_s18 = smov (%p27_p4, %s8282_s18), 0  ;;  %155 = sbr.rel (%p152_p3) target bundleno = 1234 (0x4d2), region = 32 }
   0xe   : > { %p180_p5 = scmp.lt.s32.totalorder %s4017_s13, 1  ;;  %s3898_s20 = sshll.u32 %s4013_s12, 8  ;;  %vm362_vm0 = vcmask 1046528   ;;  %vm7838_vm1 = vcmask 1045504   ;;  %vm7837_vm2 = vcmask 1044480   ;;  %vm629_vm3 = vcmask 1043456  }
   0xf   : > { %s4031_s25 = smov 4   ;;  %s4032_s26 = smov 8   ;;  %vm7839_vm4 = vcmask 1042432   ;;  %vm7833_vm5 = vcmask 1041408   ;;  %vm7832_vm6 = vcmask 1040384   ;;  %vm1169_vm7 = vcmask 31744  }
  0x10   : > { %s8286_s13 = smov (!%p180_p5, %s4017_s13), 1  ;;  %s4033_s27 = smov 12   ;;  %vm1186_vm8 = vcmask 64512   ;;  %vm1220_vm9 = vcmask 130048   ;;  %vm1203_vm10 = vcmask 97280   ;;  %vm1237_vm11 = vcmask 162816  }
  0x11   : > { %s3917_s19 = smul.u32 832, %s8286_s13  ;;  %s4034_s28 = smov 16   ;;  %vm1271_vm12 = vcmask 228352   ;;  %vm1254_vm13 = vcmask 195584   ;;  %vm1288_vm14 = vcmask 261120   ;;  %vm1322_vm15 = vcmask 326656  }
  0x12   : > { %s4035_s29 = smov 20   ;;  %s4036_s30 = smov 24  }
  0x13   : > { %s184_s23 = scalar_lea.vmem %s7810_s0, %s3917_s19  ;;  %s4037_s4 = smov 28  }
  0x14   : > { %s4100_s24 = scalar_lea.vmem %s184_s23, %s3898_s20  ;;  %s4038_s5 = smov 32  }
  0x15   : > { %v4103_v0 = vld [vmem:[%s4100_s24 + $0x40] sm:$0xff]  ;;  %v4106_v1 = vld [vmem:[%s4100_s24 + $0x48] sm:$0xff]  ;;  %v4127_v12 = vld [vmem:[%s4100_s24 + $0x50] sm:$0xff]  ;;  %s4039_s6 = smov 36   ;;  %s4040_s7 = smov 40  }
  0x16   : > { %v4109_v2 = vld [vmem:[%s4100_s24 + $0x20] sm:$0xff]  ;;  %v373_v3 = vrot.slane %v4103_v0, 1  ;;  %v374_v4 = vrot.slane %v4106_v1, 1  ;;  %v4114_v5 = vld [vmem:[%s4100_s24 + $0x28] sm:$0xff]  ;;  %v4131_v14 = vld [vmem:[%s4100_s24 + $0x30] sm:$0xff]  ;;  %v7827_v18 = vrot.slane %v4127_v12, 1 }
  0x17   : > { %v368_v6 = vrot.slane %v4109_v2, 1  ;;  %v4118_v7 = vld [vmem:[%s4100_s24] sm:$0xff]  ;;  %v4121_v8 = vld [vmem:[%s4100_s24 + $0x8] sm:$0xff]  ;;  %v369_v9 = vrot.slane %v4114_v5, 1  ;;  %v4134_v15 = vld [vmem:[%s4100_s24 + $0x10] sm:$0xff]  ;;  %v7829_v19 = vrot.slane %v4131_v14, 1 }
  0x18   : > { %v363_v10 = vrot.slane %v4118_v7, 1  ;;  %v364_v11 = vrot.slane %v4121_v8, 1  ;;  %v375_v13 = vsel %vm362_vm0, %v373_v3, %v374_v4  ;;  %v7828_v20 = vrot.slane %v4134_v15, 1  ;;  %v4160_v24 = vld [vmem:[%s4100_s24 + $0x80] sm:$0xff]  ;;  %v4163_v25 = vld [vmem:[%s4100_s24 + $0x88] sm:$0xff]  ;;  %v4169_v27 = vld [vmem:[%s4100_s24 + $0x70] sm:$0xff] }
  0x19   : > { %411 = vrot.lane.b32.xlu2 %v375_v13, %s4031_s25  ;;  %v370_v16 = vsel %vm362_vm0, %v368_v6, %v369_v9  ;;  %v4147_v21 = vsel %vm362_vm0, %v374_v4, %v7827_v18  ;;  %v4152_v22 = vsel %vm362_vm0, %v369_v9, %v7829_v19  ;;  %v4166_v26 = vld [vmem:[%s4100_s24 + $0x68] sm:$0xff]  ;;  %v4172_v28 = vld [vmem:[%s4100_s24 + $0x60] sm:$0xff]  ;;  %v383_v29 = vrot.slane %v4160_v24, 1  ;;  %v4196_v38 = vld [vmem:[%s4100_s24 + $0xb0] sm:$0xff] }
  0x1a   : > { %v365_v17 = vsel %vm362_vm0, %v363_v10, %v364_v11  ;;  %407 = vrot.lane.b32.xlu1 %v370_v16, %s4031_s25  ;;  %v4157_v23 = vsel %vm362_vm0, %v364_v11, %v7828_v20  ;;  %v384_v30 = vrot.slane %v4163_v25, 1  ;;  %v379_v31 = vrot.slane %v4166_v26, 1  ;;  %v4193_v37 = vld [vmem:[%s4100_s24 + $0xa8] sm:$0xff]  ;;  %v4199_v39 = vld [vmem:[%s4100_s24 + $0xa0] sm:$0xff]  ;;  %v4202_v40 = vld [vmem:[%s4100_s24 + $0x90] sm:$0xff] }
  0x1b   : > { %403 = vrot.lane.b32.xlu0 %v365_v17, %s4031_s25  ;;  %v7825_v32 = vrot.slane %v4169_v27, 1  ;;  %v378_v33 = vrot.slane %v4172_v28, 1  ;;  %v389_v41 = vrot.slane %v4193_v37, 1  ;;  %v7824_v42 = vrot.slane %v4196_v38, 1  ;;  %v4224_v48 = vld [vmem:[%s4100_s24 + $0xe0] sm:$0xff]  ;;  %v4227_v49 = vld [vmem:[%s4100_s24 + $0xe8] sm:$0xff] }
  0x1c   : > { %v385_v34 = vsel %vm362_vm0, %v383_v29, %v384_v30  ;;  %v388_v43 = vrot.slane %v4199_v39, 1  ;;  %v7826_v44 = vrot.slane %v4202_v40, 1  ;;  %v4230_v50 = vld [vmem:[%s4100_s24 + $0xc8] sm:$0xff]  ;;  %v4233_v51 = vld [vmem:[%s4100_s24 + $0xd0] sm:$0xff]  ;;  %v4236_v52 = vld [vmem:[%s4100_s24 + $0xc0] sm:$0xff]  ;;  %v398_v53 = vrot.slane %v4224_v48, 1 }
  0x1d   : > { %v4189_v35 = vsel %vm362_vm0, %v379_v31, %v7825_v32  ;;  %v380_v36 = vsel %vm362_vm0, %v378_v33, %v379_v31  ;;  %v4215_v45 = vsel %vm362_vm0, %v389_v41, %v7824_v42  ;;  %v399_v54 = vrot.slane %v4227_v49, 1  ;;  %v4256_v61 = vld [vmem:[%s4100_s24 + $0xf0] sm:$0xff] }
  0x1e   : > { %v390_v46 = vsel %vm362_vm0, %v388_v43, %v389_v41  ;;  %v4221_v47 = vsel %vm362_vm0, %v384_v30, %v7826_v44  ;;  %v394_v55 = vrot.slane %v4230_v50, 1  ;;  %v7822_v56 = vrot.slane %v4233_v51, 1 }
  0x1f   : > { %v393_v57 = vrot.slane %v4236_v52, 1  ;;  %v400_v58 = vsel %vm362_vm0, %v398_v53, %v399_v54  ;;  %v453_v62 = vrot.slane %v4121_v8, 2  ;;  %v7821_v63 = vrot.slane %v4134_v15, 2 }
  0x20   : > { %v4252_v59 = vsel %vm362_vm0, %v394_v55, %v7822_v56  ;;  %v452_v3 = vrot.slane %v4118_v7, 2  ;;  %v7823_v4 = vrot.slane %v4256_v61, 1  ;;  %v462_v11 = vrot.slane %v4103_v0, 2 }
  0x21   : > { %413 = vrot.lane.b32.xlu2 %v4147_v21, %s4031_s25  ;;  %v395_v60 = vsel %vm362_vm0, %v393_v57, %v394_v55  ;;  %v4269_v6 = vsel %vm7838_vm1, %v453_v62, %v7821_v63  ;;  %v463_v13 = vrot.slane %v4106_v1, 2  ;;  %v458_v16 = vrot.slane %v4114_v5, 2 }
  0x22   : > { %409 = vrot.lane.b32.xlu1 %v4152_v22, %s4031_s25  ;;  %v454_v9 = vsel %vm7838_vm1, %v452_v3, %v453_v62  ;;  %v4275_v10 = vsel %vm362_vm0, %v399_v54, %v7823_v4  ;;  %v7819_v17 = vrot.slane %v4131_v14, 2  ;;  %v457_v29 = vrot.slane %v4109_v2, 2 }
  0x23   : > { %405 = vrot.lane.b32.xlu0 %v4157_v23, %s4031_s25  ;;  %v464_v30 = vsel %vm7838_vm1, %v462_v11, %v463_v13  ;;  %v467_v41 = vrot.slane %v4172_v28, 2  ;;  %v7820_v43 = vrot.slane %v4127_v12, 2  ;;  %v477_v55 = vrot.slane %v4199_v39, 2 }
  0x24   : > { %v4291_v31 = vsel %vm7838_vm1, %v458_v16, %v7819_v17  ;;  %v459_v33 = vsel %vm7838_vm1, %v457_v29, %v458_v16  ;;  %v478_v57 = vrot.slane %v4193_v37, 2  ;;  %v472_v62 = vrot.slane %v4160_v24, 2 }
  0x25   : > { %v4311_v54 = vsel %vm7838_vm1, %v463_v13, %v7820_v43  ;;  %v483_v13 = vrot.slane %v4230_v50, 2  ;;  %v7814_v16 = vrot.slane %v4233_v51, 2  ;;  %v482_v29 = vrot.slane %v4236_v52, 2 }
  0x26   : > { %v479_v3 = vsel %vm7838_vm1, %v477_v55, %v478_v57  ;;  %v542_v55 = vrot.slane %v4121_v8, 3  ;;  %v567_v17 = vrot.slane %v4193_v37, 3  ;;  %v576_v43 = vrot.slane %v4224_v48, 3 }
  0x27   : > { %v631_v4 = vrot.slane %v4121_v8, 4  ;;  %v643_v42 = vrot.slane %v4127_v12, 4  ;;  %v640_v44 = vrot.slane %v4103_v0, 4  ;;  %v651_v18 = vrot.slane %v4163_v25, 4 }
  0x28   : > { %v646_v19 = vrot.slane %v4166_v26, 4 }
  0x29   : > { %419 = vrot.lane.b32.xlu2 %v385_v34, %s4031_s25  ;;  %v468_v34 = vrot.slane %v4166_v26, 2 }
  0x2a   : > { %417 = vrot.lane.b32.xlu1 %v4189_v35, %s4031_s25 }
  0x2b   : > { %415 = vrot.lane.b32.xlu0 %v380_v36, %s4031_s25  ;;  %v7818_v36 = vrot.slane %v4169_v27, 2  ;;  %v469_v53 = vsel %vm7838_vm1, %v467_v41, %v468_v34 }
  0x31   : > { %425 = vrot.lane.b32.xlu2 %v4215_v45, %s4031_s25 }
  0x32   : > { %423 = vrot.lane.b32.xlu1 %v390_v46, %s4031_s25  ;;  %v4305_v46 = vsel %vm7838_vm1, %v468_v34, %v7818_v36  ;;  %v484_v34 = vsel %vm7838_vm1, %v482_v29, %v483_v13  ;;  %v547_v29 = vrot.slane %v4114_v5, 3  ;;  %v561_v36 = vrot.slane %v4160_v24, 3 }
  0x33   : > { %421 = vrot.lane.b32.xlu0 %v4221_v47, %s4031_s25 }
  0x39   : > { %431 = vrot.lane.b32.xlu2 %v400_v58, %s4031_s25  ;;  %v473_v58 = vrot.slane %v4163_v25, 2 }
  0x3a   : > { %429 = vrot.lane.b32.xlu1 %v4252_v59, %s4031_s25 }
  0x3b   : > { %427 = vrot.lane.b32.xlu0 %v395_v60, %s4031_s25  ;;  %v7816_v60 = vrot.slane %v4202_v40, 2  ;;  %v474_v11 = vsel %vm7838_vm1, %v472_v62, %v473_v58  ;;  %v7815_v62 = vrot.slane %v4256_v61, 2 }
  0x41   : > { %494 = vrot.lane.b32.xlu2 %v4269_v6, %s4032_s26 }
  0x42   : > { %492 = vrot.lane.b32.xlu1 %v454_v9, %s4032_s26  ;;  %v4327_v9 = vsel %vm7838_vm1, %v473_v58, %v7816_v60  ;;  %v488_v58 = vrot.slane %v4227_v49, 2 }
  0x43   : > { %433 = vrot.lane.b32.xlu0 %v4275_v10, %s4031_s25 }
  0x49   : > { %500 = vrot.lane.b32.xlu2 %v464_v30, %s4032_s26  ;;  %v7817_v30 = vrot.slane %v4196_v38, 2 }
  0x4a   : > { %498 = vrot.lane.b32.xlu1 %v4291_v31, %s4032_s26 }
  0x4b   : > { %496 = vrot.lane.b32.xlu0 %v459_v33, %s4032_s26  ;;  %v4341_v33 = vsel %vm7838_vm1, %v483_v13, %v7814_v16  ;;  %v4347_v41 = vsel %vm7838_vm1, %v478_v57, %v7817_v30  ;;  %v487_v57 = vrot.slane %v4224_v48, 2  ;;  %v544_v16 = vrot.slane %v4134_v15, 3 }
  0x4c   : > { %v552_v30 = vrot.slane %v4106_v1, 3 }
  0x4d   : > { %v489_v13 = vsel %vm7838_vm1, %v487_v57, %v488_v58  ;;  %v545_v57 = vsel %vm7837_vm2, %v542_v55, %v544_v16 }
  0x51   : > { %506 = vrot.lane.b32.xlu2 %v4305_v46, %s4032_s26 }
  0x52   : > { %504 = vrot.lane.b32.xlu1 %v469_v53, %s4032_s26  ;;  %v541_v53 = vrot.slane %v4118_v7, 3 }
  0x53   : > { %502 = vrot.lane.b32.xlu0 %v4311_v54, %s4032_s26 }
  0x59   : > { %512 = vrot.lane.b32.xlu2 %v479_v3, %s4032_s26  ;;  %v543_v3 = vsel %vm7837_vm2, %v541_v53, %v542_v55  ;;  %v546_v53 = vrot.slane %v4109_v2, 3 }
  0x5a   : > { %510 = vrot.lane.b32.xlu1 %v4327_v9, %s4032_s26 }
  0x5b   : > { %508 = vrot.lane.b32.xlu0 %v474_v11, %s4032_s26  ;;  %v4363_v11 = vsel %vm7838_vm1, %v488_v58, %v7815_v62  ;;  %v548_v58 = vsel %vm7837_vm2, %v546_v53, %v547_v29  ;;  %v562_v53 = vrot.slane %v4163_v25, 3 }
  0x61   : > { %518 = vrot.lane.b32.xlu2 %v4341_v33, %s4032_s26 }
  0x62   : > { %516 = vrot.lane.b32.xlu1 %v484_v34, %s4032_s26  ;;  %v549_v34 = vrot.slane %v4131_v14, 3 }
  0x63   : > { %514 = vrot.lane.b32.xlu0 %v4347_v41, %s4032_s26 }
  0x64   : > { %v550_v62 = vsel %vm7837_vm2, %v547_v29, %v549_v34  ;;  %v554_v34 = vrot.slane %v4127_v12, 3  ;;  %v551_v29 = vrot.slane %v4103_v0, 3 }
  0x66   : > { %v555_v55 = vsel %vm7837_vm2, %v552_v30, %v554_v34 }
  0x69   : > { %581 = vrot.lane.b32.xlu2 %v543_v3, %s4033_s27  ;;  %v556_v3 = vrot.slane %v4172_v28, 3 }
  0x6a   : > { %522 = vrot.lane.b32.xlu1 %v4363_v11, %s4032_s26 }
  0x6b   : > { %520 = vrot.lane.b32.xlu0 %v489_v13, %s4032_s26  ;;  %v557_v13 = vrot.slane %v4166_v26, 3 }
  0x6d   : > { %v558_v16 = vsel %vm7837_vm2, %v556_v3, %v557_v13  ;;  %v559_v3 = vrot.slane %v4169_v27, 3 }
  0x71   : > { %587 = vrot.lane.b32.xlu2 %v550_v62, %s4033_s27  ;;  %v553_v62 = vsel %vm7837_vm2, %v551_v29, %v552_v30  ;;  %v563_v30 = vsel %vm7837_vm2, %v561_v36, %v562_v53  ;;  %v560_v29 = vsel %vm7837_vm2, %v557_v13, %v559_v3  ;;  %v566_v36 = vrot.slane %v4199_v39, 3 }
  0x72   : > { %585 = vrot.lane.b32.xlu1 %v548_v58, %s4033_s27  ;;  %v564_v58 = vrot.slane %v4202_v40, 3 }
  0x73   : > { %583 = vrot.lane.b32.xlu0 %v545_v57, %s4033_s27  ;;  %v4382_v60 = vpop.permute.xlu2 %411  ;;  %v568_v3 = vsel %vm7837_vm2, %v566_v36, %v567_v17 }
  0x74   : > { %v565_v34 = vsel %vm7837_vm2, %v562_v53, %v564_v58  ;;  %v569_v58 = vrot.slane %v4196_v38, 3 }
  0x76   : > { %v570_v53 = vsel %vm7837_vm2, %v567_v17, %v569_v58 }
  0x79   : > { %593 = vrot.lane.b32.xlu2 %v558_v16, %s4033_s27  ;;  %v571_v16 = vrot.slane %v4236_v52, 3 }
  0x7a   : > { %591 = vrot.lane.b32.xlu1 %v555_v55, %s4033_s27  ;;  %v572_v55 = vrot.slane %v4230_v50, 3 }
  0x7b   : > { %589 = vrot.lane.b32.xlu0 %v553_v62, %s4033_s27  ;;  %v4395_v57 = vpop.permute.xlu2 %413 }
  0x7c   : > { %7865 = vst [vmem:[#allocation2_spill] sm:$0xff] %v4395_v57  ;;  %v573_v13 = vsel %vm7837_vm2, %v571_v16, %v572_v55  ;;  %v574_v16 = vrot.slane %v4233_v51, 3  ;;  %v737_v57 = vrot.slane %v4169_v27, 5 }
  0x81   : > { %599 = vrot.lane.b32.xlu2 %v565_v34, %s4033_s27  ;;  %v577_v34 = vrot.slane %v4227_v49, 3 }
  0x82   : > { %597 = vrot.lane.b32.xlu1 %v563_v30, %s4033_s27  ;;  %v579_v30 = vrot.slane %v4256_v61, 3 }
  0x83   : > { %595 = vrot.lane.b32.xlu0 %v560_v29, %s4033_s27  ;;  %v4407_v62 = vpop.permute.xlu2 %419  ;;  %v578_v36 = vsel %vm7837_vm2, %v576_v43, %v577_v34  ;;  %v630_v43 = vrot.slane %v4118_v7, 4 }
  0x84   : > { %7866 = vst [vmem:[#allocation3_spill] sm:$0xff] %v4407_v62  ;;  %v580_v17 = vsel %vm7837_vm2, %v577_v34, %v579_v30  ;;  %v633_v30 = vrot.slane %v4134_v15, 4 }
  0x89   : > { %605 = vrot.lane.b32.xlu2 %v573_v13, %s4033_s27  ;;  %v575_v13 = vsel %vm7837_vm2, %v572_v55, %v574_v16 }
  0x8a   : > { %603 = vrot.lane.b32.xlu1 %v570_v53, %s4033_s27  ;;  %v635_v53 = vrot.slane %v4109_v2, 4 }
  0x8b   : > { %601 = vrot.lane.b32.xlu0 %v568_v3, %s4033_s27  ;;  %v4420_v29 = vpop.permute.xlu2 %425  ;;  %v636_v3 = vrot.slane %v4114_v5, 4 }
  0x8c   : > { %7867 = vst [vmem:[#allocation4_spill] sm:$0xff] %v4420_v29  ;;  %v4424_v63 = vpop.permute.xlu1 %407  ;;  %v658_v29 = vrot.slane %v4196_v38, 4 }
  0x8d   : > { %v4426_v58 = vpop.permute.xlu0 %403  ;;  %v637_v16 = vsel %vm629_vm3, %v635_v53, %v636_v3  ;;  %v638_v53 = vrot.slane %v4131_v14, 4 }
  0x91   : > { %611 = vrot.lane.b32.xlu2 %v580_v17, %s4033_s27  ;;  %v634_v17 = vsel %vm629_vm3, %v631_v4, %v633_v30 }
  0x92   : > { %609 = vrot.lane.b32.xlu1 %v578_v36, %s4033_s27  ;;  %v632_v36 = vsel %vm629_vm3, %v630_v43, %v631_v4 }
  0x93   : > { %607 = vrot.lane.b32.xlu0 %v575_v13, %s4033_s27  ;;  %v4436_v56 = vpop.permute.xlu2 %431  ;;  %v641_v13 = vrot.slane %v4106_v1, 4 }
  0x94   : > { %v4441_v55 = vpop.permute.xlu1 %409 }
  0x95   : > { %v4443_v34 = vpop.permute.xlu0 %405  ;;  %v644_v43 = vsel %vm629_vm3, %v641_v13, %v643_v42  ;;  %v648_v42 = vrot.slane %v4169_v27, 4 }
  0x99   : > { %674 = vrot.lane.b32.xlu2 %v637_v16, %s4034_s28  ;;  %v642_v16 = vsel %vm629_vm3, %v640_v44, %v641_v13  ;;  %v645_v44 = vrot.slane %v4172_v28, 4 }
  0x9a   : > { %672 = vrot.lane.b32.xlu1 %v634_v17, %s4034_s28  ;;  %v639_v17 = vsel %vm629_vm3, %v636_v3, %v638_v53 }
  0x9b   : > { %670 = vrot.lane.b32.xlu0 %v632_v36, %s4034_s28  ;;  %v4453_v32 = vpop.permute.xlu2 %494  ;;  %v650_v36 = vrot.slane %v4160_v24, 4 }
  0x9c   : > { %7868 = vst [vmem:[#allocation5_spill] sm:$0xff] %v4453_v32  ;;  %v4457_v30 = vpop.permute.xlu1 %417 }
  0x9d   : > { %7869 = vst [vmem:[#allocation6_spill] sm:$0xff] %v4457_v30  ;;  %v4459_v4 = vpop.permute.xlu0 %415  ;;  %v652_v53 = vsel %vm629_vm3, %v650_v36, %v651_v18  ;;  %v653_v36 = vrot.slane %v4202_v40, 4 }
  0x9e   : > { %7870 = vst [vmem:[#allocation7_spill] sm:$0xff] %v4459_v4  ;;  %v725_v4 = vrot.slane %v4114_v5, 5 }
  0xa1   : > { %680 = vrot.lane.b32.xlu2 %v644_v43, %s4034_s28  ;;  %v649_v43 = vsel %vm629_vm3, %v646_v19, %v648_v42 }
  0xa2   : > { %678 = vrot.lane.b32.xlu1 %v642_v16, %s4034_s28  ;;  %v647_v16 = vsel %vm629_vm3, %v645_v44, %v646_v19 }
  0xa3   : > { %676 = vrot.lane.b32.xlu0 %v639_v17, %s4034_s28  ;;  %v4469_v20 = vpop.permute.xlu2 %500  ;;  %v656_v17 = vrot.slane %v4193_v37, 4 }
  0xa4   : > { %7871 = vst [vmem:[#allocation8_spill] sm:$0xff] %v4469_v20  ;;  %v4474_v13 = vpop.permute.xlu1 %423 }
  0xa5   : > { %7872 = vst [vmem:[#allocation9_spill] sm:$0xff] %v4474_v13  ;;  %v4476_v3 = vpop.permute.xlu0 %421  ;;  %v655_v13 = vrot.slane %v4199_v39, 4  ;;  %v659_v19 = vsel %vm629_vm3, %v656_v17, %v658_v29  ;;  %v663_v29 = vrot.slane %v4233_v51, 4 }
  0xa6   : > { %7873 = vst [vmem:[#allocation10_spill] sm:$0xff] %v4476_v3 }
  0xa7   : > { %v657_v44 = vsel %vm629_vm3, %v655_v13, %v656_v17  ;;  %v660_v13 = vrot.slane %v4236_v52, 4 }
  0xa9   : > { %686 = vrot.lane.b32.xlu2 %v652_v53, %s4034_s28  ;;  %v654_v53 = vsel %vm629_vm3, %v651_v18, %v653_v36 }
  0xaa   : > { %684 = vrot.lane.b32.xlu1 %v649_v43, %s4034_s28  ;;  %v665_v43 = vrot.slane %v4224_v48, 4 }
  0xab   : > { %682 = vrot.lane.b32.xlu0 %v647_v16, %s4034_s28  ;;  %v4486_v62 = vpop.permute.xlu2 %506  ;;  %v666_v16 = vrot.slane %v4227_v49, 4 }
  0xac   : > { %7874 = vst [vmem:[#allocation11_spill] sm:$0xff] %v4486_v62  ;;  %v4490_v3 = vpop.permute.xlu1 %429 }
  0xad   : > { %7875 = vst [vmem:[#allocation12_spill] sm:$0xff] %v4490_v3  ;;  %v4492_v42 = vpop.permute.xlu0 %427  ;;  %v661_v3 = vrot.slane %v4230_v50, 4  ;;  %v667_v36 = vsel %vm629_vm3, %v665_v43, %v666_v16  ;;  %v668_v43 = vrot.slane %v4256_v61, 4 }
  0xae   : > { %7876 = vst [vmem:[#allocation13_spill] sm:$0xff] %v4492_v42  ;;  %v722_v42 = vrot.slane %v4134_v15, 5 }
  0xb1   : > { %692 = vrot.lane.b32.xlu2 %v659_v19, %s4034_s28  ;;  %v664_v19 = vsel %vm629_vm3, %v661_v3, %v663_v29 }
  0xb2   : > { %690 = vrot.lane.b32.xlu1 %v657_v44, %s4034_s28  ;;  %v662_v44 = vsel %vm629_vm3, %v660_v13, %v661_v3 }
  0xb3   : > { %688 = vrot.lane.b32.xlu0 %v654_v53, %s4034_s28  ;;  %v4502_v62 = vpop.permute.xlu2 %512  ;;  %v720_v53 = vrot.slane %v4121_v8, 5 }
  0xb4   : > { %7877 = vst [vmem:[#allocation14_spill] sm:$0xff] %v4502_v62  ;;  %v4507_v17 = vpop.permute.xlu1 %492 }
  0xb5   : > { %v4509_v18 = vpop.permute.xlu0 %433  ;;  %v723_v13 = vsel %vm7839_vm4, %v720_v53, %v722_v42  ;;  %v727_v42 = vrot.slane %v4131_v14, 5 }
  0xb6   : > { %7878 = vst [vmem:[#allocation15_spill] sm:$0xff] %v4509_v18  ;;  %v719_v18 = vrot.slane %v4118_v7, 5 }
  0xb9   : > { %698 = vrot.lane.b32.xlu2 %v667_v36, %s4034_s28  ;;  %v721_v36 = vsel %vm7839_vm4, %v719_v18, %v720_v53  ;;  %v724_v18 = vrot.slane %v4109_v2, 5 }
  0xba   : > { %696 = vrot.lane.b32.xlu1 %v664_v19, %s4034_s28  ;;  %v669_v19 = vsel %vm629_vm3, %v666_v16, %v668_v43 }
  0xbb   : > { %694 = vrot.lane.b32.xlu0 %v662_v44, %s4034_s28  ;;  %v4519_v62 = vpop.permute.xlu2 %518  ;;  %v729_v44 = vrot.slane %v4103_v0, 5 }
  0xbc   : > { %7879 = vst [vmem:[#allocation16_spill] sm:$0xff] %v4519_v62  ;;  %v4523_v29 = vpop.permute.xlu1 %498  ;;  %v730_v62 = vrot.slane %v4106_v1, 5 }
  0xbd   : > { %7880 = vst [vmem:[#allocation17_spill] sm:$0xff] %v4523_v29  ;;  %v4525_v3 = vpop.permute.xlu0 %496 }
  0xbe   : > { %v731_v43 = vsel %vm7839_vm4, %v729_v44, %v730_v62  ;;  %v732_v44 = vrot.slane %v4127_v12, 5 }
  0xc1   : > { %761 = vrot.lane.b32.xlu2 %v723_v13, %s4035_s29  ;;  %v728_v13 = vsel %vm7839_vm4, %v725_v4, %v727_v42 }
  0xc2   : > { %759 = vrot.lane.b32.xlu1 %v721_v36, %s4035_s29  ;;  %v726_v36 = vsel %vm7839_vm4, %v724_v18, %v725_v4 }
  0xc3   : > { %700 = vrot.lane.b32.xlu0 %v669_v19, %s4034_s28  ;;  %v4535_v30 = vpop.permute.xlu2 %581  ;;  %v735_v19 = vrot.slane %v4166_v26, 5 }
  0xc4   : > { %v4540_v16 = vpop.permute.xlu1 %504 }
  0xc5   : > { %7881 = vst [vmem:[#allocation18_spill] sm:$0xff] %v4540_v16  ;;  %v4542_v53 = vpop.permute.xlu0 %502  ;;  %v734_v16 = vrot.slane %v4172_v28, 5  ;;  %v738_v4 = vsel %vm7839_vm4, %v735_v19, %v737_v57  ;;  %v742_v57 = vrot.slane %v4202_v40, 5 }
  0xc6   : > { %7882 = vst [vmem:[#allocation19_spill] sm:$0xff] %v4542_v53 }
  0xc7   : > { %v736_v18 = vsel %vm7839_vm4, %v734_v16, %v735_v19  ;;  %v739_v16 = vrot.slane %v4160_v24, 5 }
  0xc9   : > { %767 = vrot.lane.b32.xlu2 %v731_v43, %s4035_s29  ;;  %v733_v43 = vsel %vm7839_vm4, %v730_v62, %v732_v44 }
  0xca   : > { %765 = vrot.lane.b32.xlu1 %v728_v13, %s4035_s29  ;;  %v744_v13 = vrot.slane %v4199_v39, 5 }
  0xcb   : > { %763 = vrot.lane.b32.xlu0 %v726_v36, %s4035_s29  ;;  %v4552_v20 = vpop.permute.xlu2 %587  ;;  %v745_v36 = vrot.slane %v4193_v37, 5 }
  0xcc   : > { %7883 = vst [vmem:[#allocation20_spill] sm:$0xff] %v4552_v20  ;;  %v4556_v53 = vpop.permute.xlu1 %510 }
  0xcd   : > { %7884 = vst [vmem:[#allocation21_spill] sm:$0xff] %v4556_v53  ;;  %v4558_v42 = vpop.permute.xlu0 %508  ;;  %v740_v53 = vrot.slane %v4163_v25, 5  ;;  %v746_v44 = vsel %vm7839_vm4, %v744_v13, %v745_v36  ;;  %v747_v13 = vrot.slane %v4196_v38, 5 }
  0xce   : > { %7885 = vst [vmem:[#allocation22_spill] sm:$0xff] %v4558_v42  ;;  %v752_v42 = vrot.slane %v4233_v51, 5 }
  0xd1   : > { %773 = vrot.lane.b32.xlu2 %v738_v4, %s4035_s29  ;;  %v743_v4 = vsel %vm7839_vm4, %v740_v53, %v742_v57 }
  0xd2   : > { %771 = vrot.lane.b32.xlu1 %v736_v18, %s4035_s29  ;;  %v741_v18 = vsel %vm7839_vm4, %v739_v16, %v740_v53 }
  0xd3   : > { %769 = vrot.lane.b32.xlu0 %v733_v43, %s4035_s29  ;;  %v4568_v20 = vpop.permute.xlu2 %593  ;;  %v750_v43 = vrot.slane %v4230_v50, 5 }
  0xd4   : > { %7886 = vst [vmem:[#allocation23_spill] sm:$0xff] %v4568_v20  ;;  %v4573_v19 = vpop.permute.xlu1 %516 }
  0xd5   : > { %7887 = vst [vmem:[#allocation24_spill] sm:$0xff] %v4573_v19  ;;  %v4575_v62 = vpop.permute.xlu0 %514  ;;  %v749_v19 = vrot.slane %v4236_v52, 5  ;;  %v753_v53 = vsel %vm7839_vm4, %v750_v43, %v752_v42  ;;  %v757_v42 = vrot.slane %v4256_v61, 5 }
  0xd6   : > { %7888 = vst [vmem:[#allocation25_spill] sm:$0xff] %v4575_v62 }
  0xd7   : > { %v751_v16 = vsel %vm7839_vm4, %v749_v19, %v750_v43  ;;  %v754_v19 = vrot.slane %v4224_v48, 5 }
  0xd9   : > { %779 = vrot.lane.b32.xlu2 %v746_v44, %s4035_s29  ;;  %v748_v44 = vsel %vm7839_vm4, %v745_v36, %v747_v13 }
  0xda   : > { %777 = vrot.lane.b32.xlu1 %v743_v4, %s4035_s29  ;;  %v808_v4 = vrot.slane %v4118_v7, 6 }
  0xdb   : > { %775 = vrot.lane.b32.xlu0 %v741_v18, %s4035_s29  ;;  %v4585_v20 = vpop.permute.xlu2 %599  ;;  %v809_v18 = vrot.slane %v4121_v8, 6 }
  0xdc   : > { %7889 = vst [vmem:[#allocation26_spill] sm:$0xff] %v4585_v20  ;;  %v4589_v62 = vpop.permute.xlu1 %522 }
  0xdd   : > { %7890 = vst [vmem:[#allocation27_spill] sm:$0xff] %v4589_v62  ;;  %v4591_v57 = vpop.permute.xlu0 %520  ;;  %v755_v62 = vrot.slane %v4227_v49, 5  ;;  %v810_v13 = vsel %vm7833_vm5, %v808_v4, %v809_v18  ;;  %v811_v4 = vrot.slane %v4134_v15, 6 }
  0xde   : > { %7891 = vst [vmem:[#allocation28_spill] sm:$0xff] %v4591_v57 }
  0xe1   : > { %785 = vrot.lane.b32.xlu2 %v753_v53, %s4035_s29  ;;  %v758_v53 = vsel %vm7839_vm4, %v755_v62, %v757_v42 }
  0xe2   : > { %783 = vrot.lane.b32.xlu1 %v751_v16, %s4035_s29  ;;  %v756_v16 = vsel %vm7839_vm4, %v754_v19, %v755_v62 }
  0xe3   : > { %781 = vrot.lane.b32.xlu0 %v748_v44, %s4035_s29  ;;  %v4601_v20 = vpop.permute.xlu2 %605  ;;  %v814_v44 = vrot.slane %v4114_v5, 6 }
  0xe4   : > { %7892 = vst [vmem:[#allocation29_spill] sm:$0xff] %v4601_v20  ;;  %v4606_v36 = vpop.permute.xlu1 %585  ;;  %v816_v20 = vrot.slane %v4131_v14, 6 }
  0xe5   : > { %v4608_v43 = vpop.permute.xlu0 %583 }
  0xe6   : > { %7893 = vst [vmem:[#allocation30_spill] sm:$0xff] %v4608_v43  ;;  %v813_v43 = vrot.slane %v4109_v2, 6  ;;  %v817_v19 = vsel %vm7833_vm5, %v814_v44, %v816_v20  ;;  %v821_v20 = vrot.slane %v4127_v12, 6 }
  0xe9   : > { %848 = vrot.lane.b32.xlu2 %v810_v13, %s4036_s30  ;;  %v815_v13 = vsel %vm7833_vm5, %v813_v43, %v814_v44  ;;  %v818_v43 = vrot.slane %v4103_v0, 6 }
  0xea   : > { %789 = vrot.lane.b32.xlu1 %v758_v53, %s4035_s29  ;;  %v812_v53 = vsel %vm7833_vm5, %v809_v18, %v811_v4 }
  0xeb   : > { %787 = vrot.lane.b32.xlu0 %v756_v16, %s4035_s29  ;;  %v4618_v57 = vpop.permute.xlu2 %611  ;;  %v823_v16 = vrot.slane %v4172_v28, 6 }
  0xec   : > { %7894 = vst [vmem:[#allocation31_spill] sm:$0xff] %v4618_v57  ;;  %v4622_v42 = vpop.permute.xlu1 %591  ;;  %v824_v57 = vrot.slane %v4166_v26, 6 }
  0xed   : > { %7895 = vst [vmem:[#allocation32_spill] sm:$0xff] %v4622_v42  ;;  %v4624_v62 = vpop.permute.xlu0 %589  ;;  %v819_v42 = vrot.slane %v4106_v1, 6 }
  0xee   : > { %7896 = vst [vmem:[#allocation33_spill] sm:$0xff] %v4624_v62  ;;  %v825_v4 = vsel %vm7833_vm5, %v823_v16, %v824_v57  ;;  %v831_v62 = vrot.slane %v4202_v40, 6  ;;  %v826_v16 = vrot.slane %v4169_v27, 6 }
  0xf1   : > { %854 = vrot.lane.b32.xlu2 %v817_v19, %s4036_s30  ;;  %v822_v19 = vsel %vm7833_vm5, %v819_v42, %v821_v20 }
  0xf2   : > { %852 = vrot.lane.b32.xlu1 %v815_v13, %s4036_s30  ;;  %v820_v13 = vsel %vm7833_vm5, %v818_v43, %v819_v42 }
  0xf3   : > { %850 = vrot.lane.b32.xlu0 %v812_v53, %s4036_s30  ;;  %v4634_v32 = vpop.permute.xlu2 %674  ;;  %v829_v53 = vrot.slane %v4163_v25, 6 }
  0xf4   : > { %v4639_v44 = vpop.permute.xlu1 %597 }
  0xf5   : > { %7897 = vst [vmem:[#allocation34_spill] sm:$0xff] %v4639_v44  ;;  %v4641_v18 = vpop.permute.xlu0 %595  ;;  %v828_v44 = vrot.slane %v4160_v24, 6  ;;  %v832_v42 = vsel %vm7833_vm5, %v829_v53, %v831_v62  ;;  %v836_v62 = vrot.slane %v4196_v38, 6 }
  0xf6   : > { %7898 = vst [vmem:[#allocation35_spill] sm:$0xff] %v4641_v18 }
  0xf7   : > { %v830_v43 = vsel %vm7833_vm5, %v828_v44, %v829_v53  ;;  %v833_v44 = vrot.slane %v4199_v39, 6 }
  0xf9   : > { %860 = vrot.lane.b32.xlu2 %v825_v4, %s4036_s30  ;;  %v827_v4 = vsel %vm7833_vm5, %v824_v57, %v826_v16 }
  0xfa   : > { %858 = vrot.lane.b32.xlu1 %v822_v19, %s4036_s30  ;;  %v838_v19 = vrot.slane %v4236_v52, 6 }
  0xfb   : > { %856 = vrot.lane.b32.xlu0 %v820_v13, %s4036_s30  ;;  %v4651_v29 = vpop.permute.xlu2 %680  ;;  %v839_v13 = vrot.slane %v4230_v50, 6 }
  0xfc   : > { %7899 = vst [vmem:[#allocation36_spill] sm:$0xff] %v4651_v29  ;;  %v4655_v18 = vpop.permute.xlu1 %603 }
  0xfd   : > { %7900 = vst [vmem:[#allocation37_spill] sm:$0xff] %v4655_v18  ;;  %v4657_v20 = vpop.permute.xlu0 %601  ;;  %v834_v18 = vrot.slane %v4193_v37, 6  ;;  %v840_v16 = vsel %vm7833_vm5, %v838_v19, %v839_v13  ;;  %v841_v19 = vrot.slane %v4233_v51, 6 }
  0xfe   : > { %7901 = vst [vmem:[#allocation38_spill] sm:$0xff] %v4657_v20  ;;  %v846_v20 = vrot.slane %v4256_v61, 6 }
 0x101   : > { %866 = vrot.lane.b32.xlu2 %v832_v42, %s4036_s30  ;;  %v837_v42 = vsel %vm7833_vm5, %v834_v18, %v836_v62 }
 0x102   : > { %864 = vrot.lane.b32.xlu1 %v830_v43, %s4036_s30  ;;  %v835_v43 = vsel %vm7833_vm5, %v833_v44, %v834_v18 }
 0x103   : > { %862 = vrot.lane.b32.xlu0 %v827_v4, %s4036_s30  ;;  %v4667_v29 = vpop.permute.xlu2 %686  ;;  %v844_v4 = vrot.slane %v4227_v49, 6 }
 0x104   : > { %7902 = vst [vmem:[#allocation39_spill] sm:$0xff] %v4667_v29  ;;  %v4672_v53 = vpop.permute.xlu1 %609 }
 0x105   : > { %7903 = vst [vmem:[#allocation40_spill] sm:$0xff] %v4672_v53  ;;  %v4674_v57 = vpop.permute.xlu0 %607  ;;  %v847_v18 = vsel %vm7833_vm5, %v844_v4, %v846_v20  ;;  %v900_v20 = vrot.slane %v4134_v15, 7 }
 0x106   : > { %7904 = vst [vmem:[#allocation41_spill] sm:$0xff] %v4674_v57  ;;  %v843_v57 = vrot.slane %v4224_v48, 6 }
 0x108   : > { %v845_v44 = vsel %vm7833_vm5, %v843_v57, %v844_v4  ;;  %v897_v57 = vrot.slane %v4118_v7, 7  ;;  %v910_v7 = vrot.slane %v4127_v12, 7 }
 0x109   : > { %872 = vrot.lane.b32.xlu2 %v840_v16, %s4036_s30  ;;  %v842_v16 = vsel %vm7833_vm5, %v839_v13, %v841_v19 }
 0x10a   : > { %870 = vrot.lane.b32.xlu1 %v837_v42, %s4036_s30  ;;  %v902_v42 = vrot.slane %v4109_v2, 7 }
 0x10b   : > { %868 = vrot.lane.b32.xlu0 %v835_v43, %s4036_s30  ;;  %v4684_v29 = vpop.permute.xlu2 %692  ;;  %v903_v43 = vrot.slane %v4114_v5, 7 }
 0x10c   : > { %7905 = vst [vmem:[#allocation42_spill] sm:$0xff] %v4684_v29  ;;  %v4688_v53 = vpop.permute.xlu1 %672 }
 0x10d   : > { %7906 = vst [vmem:[#allocation43_spill] sm:$0xff] %v4688_v53  ;;  %v4690_v62 = vpop.permute.xlu0 %670  ;;  %v898_v53 = vrot.slane %v4121_v8, 7  ;;  %v904_v19 = vsel %vm7832_vm6, %v902_v42, %v903_v43  ;;  %v905_v42 = vrot.slane %v4131_v14, 7 }
 0x10f   : > { %v899_v2 = vsel %vm7832_vm6, %v897_v57, %v898_v53 }
 0x111   : > { %878 = vrot.lane.b32.xlu2 %v847_v18, %s4036_s30  ;;  %v901_v18 = vsel %vm7832_vm6, %v898_v53, %v900_v20 }
 0x112   : > { %876 = vrot.lane.b32.xlu1 %v845_v44, %s4036_s30  ;;  %v908_v44 = vrot.slane %v4106_v1, 7 }
 0x113   : > { %874 = vrot.lane.b32.xlu0 %v842_v16, %s4036_s30  ;;  %v4700_v29 = vpop.permute.xlu2 %698 }
 0x114   : > { %v4705_v13 = vpop.permute.xlu1 %678  ;;  %v911_v57 = vsel %vm7832_vm6, %v908_v44, %v910_v7  ;;  %v915_v7 = vrot.slane %v4169_v27, 7 }
 0x115   : > { %v4707_v4 = vpop.permute.xlu0 %676 }
 0x116   : > { %7907 = vst [vmem:[#allocation44_spill] sm:$0xff] %v4707_v4  ;;  %v907_v4 = vrot.slane %v4103_v0, 7  ;;  %v917_v0 = vrot.slane %v4160_v24, 7 }
 0x119   : > { %941 = vrot.lane.b32.xlu2 %v904_v19, %s4037_s4  ;;  %v909_v19 = vsel %vm7832_vm6, %v907_v4, %v908_v44  ;;  %v912_v4 = vrot.slane %v4172_v28, 7  ;;  %v925_v28 = vrot.slane %v4196_v38, 7 }
 0x11a   : > { %939 = vrot.lane.b32.xlu1 %v901_v18, %s4037_s4  ;;  %v906_v18 = vsel %vm7832_vm6, %v903_v43, %v905_v42 }
 0x11b   : > { %937 = vrot.lane.b32.xlu0 %v899_v2, %s4037_s4  ;;  %v4717_v16 = vpop.permute.xlu2 %761  ;;  %v918_v2 = vrot.slane %v4163_v25, 7 }
 0x11c   : > { %7908 = vst [vmem:[#allocation45_spill] sm:$0xff] %v4717_v16  ;;  %v4721_v20 = vpop.permute.xlu1 %684 }
 0x11d   : > { %7909 = vst [vmem:[#allocation46_spill] sm:$0xff] %v4721_v20  ;;  %v4723_v53 = vpop.permute.xlu0 %682  ;;  %v913_v20 = vrot.slane %v4166_v26, 7  ;;  %v919_v42 = vsel %vm7832_vm6, %v917_v0, %v918_v2  ;;  %v920_v0 = vrot.slane %v4202_v40, 7 }
 0x11e   : > { %7910 = vst [vmem:[#allocation47_spill] sm:$0xff] %v4723_v53 }
 0x11f   : > { %v914_v24 = vsel %vm7832_vm6, %v912_v4, %v913_v20 }
 0x121   : > { %947 = vrot.lane.b32.xlu2 %v911_v57, %s4037_s4  ;;  %v916_v57 = vsel %vm7832_vm6, %v913_v20, %v915_v7 }
 0x122   : > { %945 = vrot.lane.b32.xlu1 %v909_v19, %s4037_s4  ;;  %v923_v19 = vrot.slane %v4193_v37, 7 }
 0x123   : > { %943 = vrot.lane.b32.xlu0 %v906_v18, %s4037_s4  ;;  %v4733_v16 = vpop.permute.xlu2 %767 }
 0x124   : > { %v4738_v44 = vpop.permute.xlu1 %690  ;;  %v926_v20 = vsel %vm7832_vm6, %v923_v19, %v925_v28  ;;  %v930_v28 = vrot.slane %v4233_v51, 7 }
 0x125   : > { %7911 = vst [vmem:[#allocation48_spill] sm:$0xff] %v4738_v44  ;;  %v4740_v43 = vpop.permute.xlu0 %688  ;;  %v922_v44 = vrot.slane %v4199_v39, 7  ;;  %v932_v39 = vrot.slane %v4224_v48, 7 }
 0x126   : > { %7912 = vst [vmem:[#allocation49_spill] sm:$0xff] %v4740_v43 }
 0x127   : > { %v924_v4 = vsel %vm7832_vm6, %v922_v44, %v923_v19  ;;  %v927_v44 = vrot.slane %v4236_v52, 7  ;;  %v935_v52 = vrot.slane %v4256_v61, 7 }
 0x129   : > { %953 = vrot.lane.b32.xlu2 %v919_v42, %s4037_s4  ;;  %v921_v42 = vsel %vm7832_vm6, %v918_v2, %v920_v0 }
 0x12a   : > { %951 = vrot.lane.b32.xlu1 %v916_v57, %s4037_s4  ;;  %v933_v57 = vrot.slane %v4227_v49, 7 }
 0x12b   : > { %949 = vrot.lane.b32.xlu0 %v914_v24, %s4037_s4  ;;  %v4750_v18 = vpop.permute.xlu2 %773 }
 0x12c   : > { %7913 = vst [vmem:[#allocation50_spill] sm:$0xff] %v4750_v18  ;;  %v4754_v43 = vpop.permute.xlu1 %696  ;;  %v934_v0 = vsel %vm7832_vm6, %v932_v39, %v933_v57  ;;  %v936_v39 = vsel %vm7832_vm6, %v933_v57, %v935_v52 }
 0x12d   : > { %7914 = vst [vmem:[#allocation51_spill] sm:$0xff] %v4754_v43  ;;  %v4756_v7 = vpop.permute.xlu0 %694  ;;  %v928_v43 = vrot.slane %v4230_v50, 7 }
 0x12e   : > { %7915 = vst [vmem:[#allocation52_spill] sm:$0xff] %v4756_v7 }
 0x12f   : > { %v929_v48 = vsel %vm7832_vm6, %v927_v44, %v928_v43 }
 0x131   : > { %959 = vrot.lane.b32.xlu2 %v926_v20, %s4037_s4  ;;  %v931_v20 = vsel %vm7832_vm6, %v928_v43, %v930_v28 }
 0x132   : > { %957 = vrot.lane.b32.xlu1 %v924_v4, %s4037_s4 }
 0x133   : > { %955 = vrot.lane.b32.xlu0 %v921_v42, %s4037_s4  ;;  %v4766_v24 = vpop.permute.xlu2 %779 }
 0x134   : > { %7916 = vst [vmem:[#allocation53_spill] sm:$0xff] %v4766_v24  ;;  %v4771_v19 = vpop.permute.xlu1 %759 }
 0x135   : > { %v4773_v2 = vpop.permute.xlu0 %700 }
 0x136   : > { %7917 = vst [vmem:[#allocation54_spill] sm:$0xff] %v4773_v2 }
 0x139   : > { %965 = vrot.lane.b32.xlu2 %v934_v0, %s4037_s4 }
 0x13a   : > { %963 = vrot.lane.b32.xlu1 %v931_v20, %s4037_s4 }
 0x13b   : > { %961 = vrot.lane.b32.xlu0 %v929_v48, %s4037_s4  ;;  %v4781_v4 = vpop.permute.xlu2 %785 }
 0x13c   : > { %7918 = vst [vmem:[#allocation55_spill] sm:$0xff] %v4781_v4  ;;  %v4784_v42 = vpop.permute.xlu1 %765  ;;  %v4849_v4 = vld [vmem:[%s4100_s24 + $0x38] sm:$0x3] }
 0x13d   : > { %v4786_v7 = vpop.permute.xlu0 %763 }
 0x141   : > { %987 = vrot.lane.b32.xlu2 %v4134_v15, %s4038_s5 }
 0x142   : > { %985 = vrot.lane.b32.xlu1 %v4121_v8, %s4038_s5 }
 0x143   : > { %967 = vrot.lane.b32.xlu0 %v936_v39, %s4037_s4  ;;  %v4794_v43 = vpop.permute.xlu2 %848 }
 0x144   : > { %v4796_v28 = vpop.permute.xlu1 %771 }
 0x145   : > { %7919 = vst [vmem:[#allocation56_spill] sm:$0xff] %v4796_v28  ;;  %v4798_v44 = vpop.permute.xlu0 %769 }
 0x149   : > { %993 = vrot.lane.b32.xlu2 %v4106_v1, %s4038_s5 }
 0x14a   : > { %991 = vrot.lane.b32.xlu1 %v4131_v14, %s4038_s5 }
 0x14b   : > { %989 = vrot.lane.b32.xlu0 %v4114_v5, %s4038_s5  ;;  %v4806_v57 = vpop.permute.xlu2 %854 }
 0x14c   : > { %v4808_v8 = vpop.permute.xlu1 %777 }
 0x14d   : > { %7920 = vst [vmem:[#allocation57_spill] sm:$0xff] %v4808_v8  ;;  %v4810_v0 = vpop.permute.xlu0 %775 }
 0x14e   : > { %7921 = vst [vmem:[#allocation58_spill] sm:$0xff] %v4810_v0  ;;  %v210_v0 = vld [vmem:[%s4100_s24 + $0x58] sm:$0x3] }
 0x14f   : > { %v1045_v2 = vrot.slane %v210_v0, 1 }
 0x151   : > { %999 = vrot.lane.b32.xlu2 %v4169_v27, %s4038_s5 }
 0x152   : > { %997 = vrot.lane.b32.xlu1 %v4166_v26, %s4038_s5 }
 0x153   : > { %995 = vrot.lane.b32.xlu0 %v4127_v12, %s4038_s5  ;;  %v4818_v1 = vpop.permute.xlu2 %860 }
 0x154   : > { %7922 = vst [vmem:[#allocation59_spill] sm:$0xff] %v4818_v1  ;;  %v4820_v5 = vpop.permute.xlu1 %783 }
 0x155   : > { %7923 = vst [vmem:[#allocation60_spill] sm:$0xff] %v4820_v5  ;;  %v4822_v20 = vpop.permute.xlu0 %781  ;;  %v4852_v5 = vld [vmem:[%s4100_s24 + $0x18] sm:$0x3] }
 0x156   : > { %7924 = vst [vmem:[#allocation61_spill] sm:$0xff] %v4822_v20  ;;  %v1041_v20 = vrot.slane %v4852_v5, 1 }
 0x159   : > { %1005 = vrot.lane.b32.xlu2 %v4193_v37, %s4038_s5 }
 0x15a   : > { %1003 = vrot.lane.b32.xlu1 %v4202_v40, %s4038_s5 }
 0x15b   : > { %1001 = vrot.lane.b32.xlu0 %v4163_v25, %s4038_s5  ;;  %v4830_v26 = vpop.permute.xlu2 %866 }
 0x15c   : > { %7925 = vst [vmem:[#allocation62_spill] sm:$0xff] %v4830_v26  ;;  %v4832_v48 = vpop.permute.xlu1 %789 }
 0x15d   : > { %7926 = vst [vmem:[#allocation63_spill] sm:$0xff] %v4832_v48  ;;  %v4834_v52 = vpop.permute.xlu0 %787  ;;  %v7931_v48 = vrot.slane %v4134_v15, 1 }
 0x161   : > { %1011 = vrot.lane.b32.xlu2 %v4233_v51, %s4038_s5 }
 0x162   : > { %1009 = vrot.lane.b32.xlu1 %v4230_v50, %s4038_s5  ;;  %v1043_v50 = vrot.slane %v4849_v4, 1 }
 0x163   : > { %1007 = vrot.lane.b32.xlu0 %v4196_v38, %s4038_s5  ;;  %v4842_v37 = vpop.permute.xlu2 %872 }
 0x164   : > { %7927 = vst [vmem:[#allocation64_spill] sm:$0xff] %v4842_v37  ;;  %v4844_v39 = vpop.permute.xlu1 %852 }
 0x165   : > { %v4846_v25 = vpop.permute.xlu0 %850 }
 0x169   : > { %1057 = vrot.lane.b32.xlu2 %v4157_v23, %s4039_s6  ;;  %v7930_v23 = vrot.slane %v4131_v14, 1 }
 0x16a   : > { %1015 = vrot.lane.b32.xlu1 %v4256_v61, %s4038_s5 }
 0x16b   : > { %1013 = vrot.lane.b32.xlu0 %v4227_v49, %s4038_s5  ;;  %v4861_v37 = vpop.permute.xlu2 %878  ;;  %v1044_v8 = vsel %vm362_vm0, %v7930_v23, %v1043_v50  ;;  %v1042_v49 = vsel %vm362_vm0, %v7931_v48, %v1041_v20  ;;  %v7934_v50 = vrot.slane %v4127_v12, 1  ;;  %v4889_v48 = vld [vmem:[%s4100_s24 + $0x98] sm:$0x3] }
 0x16c   : > { %7928 = vst [vmem:[#allocation65_spill] sm:$0xff] %v4861_v37  ;;  %v4864_v24 = vpop.permute.xlu1 %858 }
 0x16d   : > { %7929 = vst [vmem:[#allocation66_spill] sm:$0xff] %v4864_v24  ;;  %v4866_v26 = vpop.permute.xlu0 %856  ;;  %v1046_v20 = vsel %vm362_vm0, %v7934_v50, %v1045_v2  ;;  %v7938_v50 = vrot.slane %v4202_v40, 1 }
 0x171   : > { %1063 = vrot.lane.b32.xlu2 %v1044_v8, %s4039_s6  ;;  %v214_v8 = vld [vmem:[%s4100_s24 + $0x78] sm:$0x3] }
 0x172   : > { %1061 = vrot.lane.b32.xlu1 %v4152_v22, %s4039_s6  ;;  %v1049_v22 = vrot.slane %v4889_v48, 1 }
 0x173   : > { %1059 = vrot.lane.b32.xlu0 %v1042_v49, %s4039_s6  ;;  %v4879_v37 = vpop.permute.xlu2 %941  ;;  %v1047_v49 = vrot.slane %v214_v8, 1 }
 0x174   : > { %v4881_v18 = vpop.permute.xlu1 %864 }
 0x175   : > { %7932 = vst [vmem:[#allocation67_spill] sm:$0xff] %v4881_v18  ;;  %v4883_v1 = vpop.permute.xlu0 %862 }
 0x176   : > { %7933 = vst [vmem:[#allocation68_spill] sm:$0xff] %v4883_v1 }
 0x179   : > { %1069 = vrot.lane.b32.xlu2 %v4189_v35, %s4039_s6  ;;  %v1050_v35 = vsel %vm362_vm0, %v7938_v50, %v1049_v22  ;;  %v7942_v22 = vrot.slane %v4196_v38, 1 }
 0x17a   : > { %1067 = vrot.lane.b32.xlu1 %v1046_v20, %s4039_s6  ;;  %v7939_v20 = vrot.slane %v4169_v27, 1 }
 0x17b   : > { %1065 = vrot.lane.b32.xlu0 %v4147_v21, %s4039_s6  ;;  %v4898_v23 = vpop.permute.xlu2 %947  ;;  %v222_v21 = vld [vmem:[%s4100_s24 + $0xb8] sm:$0x3] }
 0x17c   : > { %7935 = vst [vmem:[#allocation69_spill] sm:$0xff] %v4898_v23  ;;  %v4900_v18 = vpop.permute.xlu1 %870  ;;  %v1048_v1 = vsel %vm362_vm0, %v7939_v20, %v1047_v49  ;;  %v4925_v49 = vld [vmem:[%s4100_s24 + $0xf8] sm:$0x3] }
 0x17d   : > { %7936 = vst [vmem:[#allocation70_spill] sm:$0xff] %v4900_v18  ;;  %v4902_v2 = vpop.permute.xlu0 %868  ;;  %v1051_v18 = vrot.slane %v222_v21, 1  ;;  %v226_v20 = vld [vmem:[%s4100_s24 + $0xd8] sm:$0x3] }
 0x17e   : > { %7937 = vst [vmem:[#allocation71_spill] sm:$0xff] %v4902_v2 }
 0x17f   : > { %v1052_v50 = vsel %vm362_vm0, %v7942_v22, %v1051_v18  ;;  %v7944_v18 = vrot.slane %v4256_v61, 1 }
 0x181   : > { %1075 = vrot.lane.b32.xlu2 %v1050_v35, %s4039_s6  ;;  %v1053_v35 = vrot.slane %v226_v20, 1 }
 0x182   : > { %1073 = vrot.lane.b32.xlu1 %v4221_v47, %s4039_s6  ;;  %v1055_v47 = vrot.slane %v4925_v49, 1 }
 0x183   : > { %1071 = vrot.lane.b32.xlu0 %v1048_v1, %s4039_s6  ;;  %v4915_v28 = vpop.permute.xlu2 %953 }
 0x184   : > { %7940 = vst [vmem:[#allocation72_spill] sm:$0xff] %v4915_v28  ;;  %v4917_v2 = vpop.permute.xlu1 %876  ;;  %v1056_v22 = vsel %vm362_vm0, %v7944_v18, %v1055_v47  ;;  %v7946_v47 = vrot.slane %v4134_v15, 2  ;;  %v7948_v15 = vrot.slane %v4127_v12, 2  ;;  %v7952_v12 = vrot.slane %v4169_v27, 2 }
 0x185   : > { %v4919_v53 = vpop.permute.xlu0 %874 }
 0x186   : > { %7941 = vst [vmem:[#allocation73_spill] sm:$0xff] %v4919_v53 }
 0x189   : > { %1081 = vrot.lane.b32.xlu2 %v4252_v59, %s4039_s6  ;;  %v7945_v59 = vrot.slane %v4233_v51, 1 }
 0x18a   : > { %1079 = vrot.lane.b32.xlu1 %v1052_v50, %s4039_s6 }
 0x18b   : > { %1077 = vrot.lane.b32.xlu0 %v4215_v45, %s4039_s6  ;;  %v4934_v1 = vpop.permute.xlu2 %959  ;;  %v1054_v50 = vsel %vm362_vm0, %v7945_v59, %v1053_v35 }
 0x18c   : > { %7943 = vst [vmem:[#allocation74_spill] sm:$0xff] %v4934_v1  ;;  %v4936_v53 = vpop.permute.xlu1 %939  ;;  %v1105_v1 = vrot.slane %v4852_v5, 2  ;;  %v1107_v5 = vrot.slane %v4849_v4, 2  ;;  %v1111_v4 = vrot.slane %v214_v8, 2 }
 0x18d   : > { %v4938_v28 = vpop.permute.xlu0 %937 }
 0x18e   : > { %v1106_v18 = vsel %vm7838_vm1, %v7946_v47, %v1105_v1 }
 0x191   : > { %1087 = vrot.lane.b32.xlu2 %v1056_v22, %s4039_s6 }
 0x192   : > { %1085 = vrot.lane.b32.xlu1 %v4275_v10, %s4039_s6  ;;  %v1109_v10 = vrot.slane %v210_v0, 2 }
 0x193   : > { %1083 = vrot.lane.b32.xlu0 %v1054_v50, %s4039_s6  ;;  %v4950_v45 = vpop.permute.xlu2 %965 }
 0x194   : > { %v4953_v23 = vpop.permute.xlu1 %945  ;;  %v1110_v1 = vsel %vm7838_vm1, %v7948_v15, %v1109_v10  ;;  %v7957_v15 = vrot.slane %v4202_v40, 2 }
 0x195   : > { %v4955_v24 = vpop.permute.xlu0 %943 }
 0x199   : > { %1125 = vrot.lane.b32.xlu2 %v4291_v31, %s4040_s7  ;;  %v7949_v31 = vrot.slane %v4131_v14, 2  ;;  %v1112_v14 = vsel %vm7838_vm1, %v7952_v12, %v1111_v4  ;;  %v5026_v4 = vld [vmem:[%s4100_s24 + $0x108] sm:$0xff] }
 0x19a   : > { %1123 = vrot.lane.b32.xlu1 %v1106_v18, %s4040_s7  ;;  %v1113_v18 = vrot.slane %v4889_v48, 2 }
 0x19b   : > { %1121 = vrot.lane.b32.xlu0 %v4269_v6, %s4040_s7  ;;  %v4965_v35 = vpop.permute.xlu2 %987  ;;  %v1108_v50 = vsel %vm7838_vm1, %v7949_v31, %v1107_v5  ;;  %v7956_v5 = vrot.slane %v4196_v38, 2  ;;  %v7960_v38 = vrot.slane %v4233_v51, 2 }
 0x19c   : > { %v4968_v22 = vpop.permute.xlu1 %951 }
 0x19d   : > { %7947 = vst [vmem:[#allocation75_spill] sm:$0xff] %v4968_v22  ;;  %v4970_v59 = vpop.permute.xlu0 %949 }
 0x1a1   : > { %1131 = vrot.lane.b32.xlu2 %v1110_v1, %s4040_s7 }
 0x1a2   : > { %1129 = vrot.lane.b32.xlu1 %v4311_v54, %s4040_s7  ;;  %v1115_v54 = vrot.slane %v222_v21, 2  ;;  %v1117_v21 = vrot.slane %v226_v20, 2 }
 0x1a3   : > { %1127 = vrot.lane.b32.xlu0 %v1108_v50, %s4040_s7  ;;  %v4982_v6 = vpop.permute.xlu2 %993  ;;  %v5023_v50 = vld [vmem:[%s4100_s24 + $0x100] sm:$0xff] }
 0x1a4   : > { %v4984_v0 = vpop.permute.xlu1 %957  ;;  %v1118_v40 = vsel %vm7838_vm1, %v7960_v38, %v1117_v21  ;;  %v1342_v51 = vrot.slane %v5023_v50, 1  ;;  %v1354_v21 = vrot.slane %v5026_v4, 2 }
 0x1a5   : > { %7950 = vst [vmem:[#allocation76_spill] sm:$0xff] %v4984_v0  ;;  %v4986_v47 = vpop.permute.xlu0 %955 }
 0x1a6   : > { %7951 = vst [vmem:[#allocation77_spill] sm:$0xff] %v4986_v47 }
 0x1a9   : > { %1137 = vrot.lane.b32.xlu2 %v4327_v9, %s4040_s7  ;;  %v1116_v9 = vsel %vm7838_vm1, %v7956_v5, %v1115_v54  ;;  %v1119_v54 = vrot.slane %v4925_v49, 2  ;;  %v1364_v49 = vrot.slane %v5023_v50, 3 }
 0x1aa   : > { %1135 = vrot.lane.b32.xlu1 %v1112_v14, %s4040_s7  ;;  %v1343_v14 = vrot.slane %v5026_v4, 1 }
 0x1ab   : > { %1133 = vrot.lane.b32.xlu0 %v4305_v46, %s4040_s7  ;;  %v4996_v8 = vpop.permute.xlu2 %999  ;;  %v1114_v46 = vsel %vm7838_vm1, %v7957_v15, %v1113_v18 }
 0x1ac   : > { %7953 = vst [vmem:[#allocation78_spill] sm:$0xff] %v4996_v8  ;;  %v4999_v10 = vpop.permute.xlu1 %963  ;;  %v3971_v8 = vld [vmem:[%s4100_s24 + $0x40] sm:$0xff] }
 0x1ad   : > { %7954 = vst [vmem:[#allocation79_spill] sm:$0xff] %v4999_v10  ;;  %v5001_v27 = vpop.permute.xlu0 %961  ;;  %v280_v10 = vld [vmem:[%s7811_s1 + $0x48] sm:$0xff]  ;;  %v1174_v22 = vsel %vm1169_vm7, %v3971_v8, %v4382_v60 }
 0x1ae   : > { %7955 = vst [vmem:[#allocation80_spill] sm:$0xff] %v5001_v27  ;;  %v3974_v8 = vld [vmem:[%s4100_s24 + $0x8] sm:$0xff] }
 0x1b1   : > { %1143 = vrot.lane.b32.xlu2 %v1116_v9, %s4040_s7  ;;  %v7962_v9 = vrot.slane %v4256_v61, 2 }
 0x1b2   : > { %1141 = vrot.lane.b32.xlu1 %v4347_v41, %s4040_s7  ;;  %v5031_v41 = vld [vmem:[%s4100_s24 + $0x110] sm:$0xff] }
 0x1b3   : > { %1139 = vrot.lane.b32.xlu0 %v1114_v46, %s4040_s7  ;;  %v5013_v48 = vpop.permute.xlu2 %1005  ;;  %v7830_v20 = vrot.slane %v5031_v41, 1  ;;  %v1120_v15 = vsel %vm7838_vm1, %v7962_v9, %v1119_v54  ;;  %v7831_v38 = vrot.slane %v5031_v41, 2 }
 0x1b4   : > { %7958 = vst [vmem:[#allocation81_spill] sm:$0xff] %v5013_v48  ;;  %v5015_v1 = vpop.permute.xlu1 %985 }
 0x1b5   : > { %v5017_v31 = vpop.permute.xlu0 %967  ;;  %v5049_v5 = vsel %vm362_vm0, %v1343_v14, %v7830_v20 }
 0x1b6   : > { %7959 = vst [vmem:[#allocation82_spill] sm:$0xff] %v5017_v31  ;;  %v5239_v31 = vld [vmem:[%s4100_s24 + $0x120] sm:$0xff] }
 0x1b9   : > { %1149 = vrot.lane.b32.xlu2 %v4363_v11, %s4040_s7 }
 0x1ba   : > { %1147 = vrot.lane.b32.xlu1 %v1118_v40, %s4040_s7  ;;  %v1353_v40 = vrot.slane %v5023_v50, 2 }
 0x1bb   : > { %1145 = vrot.lane.b32.xlu0 %v4341_v33, %s4040_s7  ;;  %v5037_v12 = vpop.permute.xlu2 %1011  ;;  %v1344_v33 = vsel %vm362_vm0, %v1342_v51, %v1343_v14  ;;  %v1365_v14 = vrot.slane %v5026_v4, 3 }
 0x1bc   : > { %7961 = vst [vmem:[#allocation83_spill] sm:$0xff] %v5037_v12  ;;  %v5042_v18 = vpop.permute.xlu1 %991  ;;  %v1355_v9 = vsel %vm7838_vm1, %v1353_v40, %v1354_v21  ;;  %v1376_v12 = vrot.slane %v5026_v4, 4 }
 0x1bd   : > { %v5044_v11 = vpop.permute.xlu0 %989  ;;  %v1366_v54 = vsel %vm7837_vm2, %v1364_v49, %v1365_v14  ;;  %v1378_v49 = vrot.slane %v5031_v41, 4 }
 0x1bf   : > { %v1379_v27 = vsel %vm629_vm3, %v1376_v12, %v1378_v49  ;;  %v278_v49 = vld [vmem:[%s7811_s1 + $0x38] sm:$0xff] }
 0x1c1   : > { %1349 = vrot.lane.b32.xlu2 %v5049_v5, %s4031_s25 }
 0x1c2   : > { %1347 = vrot.lane.b32.xlu1 %v1344_v33, %s4031_s25  ;;  %v5074_v33 = vsel %vm7838_vm1, %v1354_v21, %v7831_v38  ;;  %v1375_v38 = vrot.slane %v5023_v50, 4  ;;  %v1367_v21 = vrot.slane %v5031_v41, 3 }
 0x1c3   : > { %1151 = vrot.lane.b32.xlu0 %v1120_v15, %s4040_s7  ;;  %v5060_v46 = vpop.permute.xlu2 %1057  ;;  %v282_v15 = vld [vmem:[%s7811_s1 + $0x58] sm:$0xf] }
 0x1c4   : > { %v5065_v61 = vpop.permute.xlu1 %997  ;;  %3709 = vmatpush.msk.msra.mxu0 %vm629_vm3, %v282_v15  ;;  %3899 = vmatpush.msk.msra.mxu3 %vm629_vm3, %v282_v15  ;;  %v279_v15 = vld [vmem:[%s7811_s1 + $0x40] sm:$0xff]  ;;  %v1377_v48 = vsel %vm629_vm3, %v1375_v38, %v1376_v12  ;;  %v1368_v0 = vsel %vm7837_vm2, %v1365_v14, %v1367_v21  ;;  %v1387_v12 = vrot.slane %v5026_v4, 5  ;;  %v1389_v38 = vrot.slane %v5031_v41, 5  ;;  %v277_v14 = vld [vmem:[%s7811_s1 + $0x30] sm:$0xff] }
 0x1c5   : > { %7963 = vst [vmem:[#allocation84_spill] sm:$0xff] %v5065_v61  ;;  %v5067_v51 = vpop.permute.xlu0 %995 }
 0x1c6   : > { %v1390_v47 = vsel %vm7839_vm4, %v1387_v12, %v1389_v38 }
 0x1c9   : > { %1369 = vrot.lane.b32.xlu2 %v1366_v54, %s4033_s27 }
 0x1ca   : > { %1360 = vrot.lane.b32.xlu1 %v5074_v33, %s4032_s26 }
 0x1cb   : > { %1358 = vrot.lane.b32.xlu0 %v1355_v9, %s4032_s26  ;;  %v5085_v20 = vpop.permute.xlu2 %1063  ;;  %v281_v9 = vld [vmem:[%s7811_s1 + $0x50] sm:$0xff] }
 0x1cc   : > { %v5092_v40 = vpop.permute.xlu1 %1003  ;;  %1525 = vmatpush.msra.mxu0 %v281_v9  ;;  %3900 = vmatpush.msra.mxu3 %v281_v9  ;;  %v1397_v9 = vrot.slane %v5023_v50, 6 }
 0x1cd   : > { %7964 = vst [vmem:[#allocation85_spill] sm:$0xff] %v5092_v40  ;;  %v5094_v54 = vpop.permute.xlu0 %1001 }
 0x1ce   : > { %7965 = vst [vmem:[#allocation86_spill] sm:$0xff] %v5094_v54  ;;  %1526 = vmatpush.msra.mxu0 %v280_v10  ;;  %3901 = vmatpush.msra.mxu3 %v280_v10  ;;  %v1386_v10 = vrot.slane %v5023_v50, 5 }
 0x1d0   : > { %1527 = vmatpush.msra.mxu0 %v279_v15  ;;  %3902 = vmatpush.msra.mxu3 %v279_v15  ;;  %v1388_v54 = vsel %vm7839_vm4, %v1386_v10, %v1387_v12  ;;  %v1411_v15 = vrot.slane %v5031_v41, 7 }
 0x1d1   : > { %1382 = vrot.lane.b32.xlu2 %v1379_v27, %s4034_s28 }
 0x1d2   : > { %1380 = vrot.lane.b32.xlu1 %v1377_v48, %s4034_s28  ;;  %1528 = vmatpush.msra.mxu0 %v278_v49 }
 0x1d3   : > { %1371 = vrot.lane.b32.xlu0 %v1368_v0, %s4033_s27  ;;  %v5115_v40 = vpop.permute.xlu2 %1069  ;;  %v1398_v0 = vrot.slane %v5026_v4, 6  ;;  %3903 = vmatpush.msra.mxu3 %v278_v49  ;;  %v1409_v49 = vrot.slane %v5026_v4, 7 }
 0x1d4   : > { %7966 = vst [vmem:[#allocation87_spill] sm:$0xff] %v5115_v40  ;;  %v5120_v27 = vpop.permute.xlu1 %1009  ;;  %1529 = vmatpush.msra.mxu0 %v277_v14 }
 0x1d5   : > { %7967 = vst [vmem:[#allocation88_spill] sm:$0xff] %v5120_v27  ;;  %v5122_v48 = vpop.permute.xlu0 %1007  ;;  %v1399_v21 = vsel %vm7833_vm5, %v1397_v9, %v1398_v0  ;;  %3904 = vmatpush.msra.mxu3 %v277_v14  ;;  %v1400_v9 = vrot.slane %v5031_v41, 6  ;;  %v1412_v10 = vsel %vm7832_vm6, %v1409_v49, %v1411_v15  ;;  %v274_v15 = vld [vmem:[%s7811_s1 + $0x18] sm:$0xff] }
 0x1d6   : > { %7968 = vst [vmem:[#allocation89_spill] sm:$0xff] %v5122_v48  ;;  %v1408_v48 = vrot.slane %v5023_v50, 7  ;;  %v276_v50 = vld [vmem:[%s7811_s1 + $0x28] sm:$0xf] }
 0x1d7   : > { %3726 = vmatpush.msk.msra.mxu1 %vm629_vm3, %v276_v50  ;;  %3905 = vmatpush.msk.msrb.mxu3 %vm629_vm3, %v276_v50  ;;  %v3969_v50 = vld [vmem:[%s4100_s24 + $0x20] sm:$0xff] }
 0x1d9   : > { %1402 = vrot.lane.b32.xlu2 %v1399_v21, %s4036_s30  ;;  %v275_v21 = vld [vmem:[%s7811_s1 + $0x20] sm:$0xff] }
 0x1da   : > { %1393 = vrot.lane.b32.xlu1 %v1390_v47, %s4035_s29  ;;  %v1410_v47 = vsel %vm7832_vm6, %v1408_v48, %v1409_v49  ;;  %1599 = vmatpush.msra.mxu1 %v275_v21  ;;  %v273_v49 = vld [vmem:[%s7811_s1 + $0x10] sm:$0xff]  ;;  %vm1305_vm6 = vcmask 293888  }
 0x1db   : > { %1391 = vrot.lane.b32.xlu0 %v1388_v54, %s4035_s29  ;;  %v5135_v27 = vpop.permute.xlu2 %1075  ;;  %v1401_v54 = vsel %vm7833_vm5, %v1398_v0, %v1400_v9  ;;  %3906 = vmatpush.msrb.mxu3 %v275_v21  ;;  %v234_v9 = vld [vmem:[%s4100_s24 + $0x118] sm:$0x3]  ;;  %vm1462_vm5 = vcmask 359424  }
 0x1dc   : > { %7969 = vst [vmem:[#allocation90_spill] sm:$0xff] %v5135_v27  ;;  %v5140_v38 = vpop.permute.xlu1 %1015  ;;  %1600 = vmatpush.msra.mxu1 %v274_v15 }
 0x1dd   : > { %7970 = vst [vmem:[#allocation91_spill] sm:$0xff] %v5140_v38  ;;  %v5142_v12 = vpop.permute.xlu0 %1013  ;;  %3907 = vmatpush.msrb.mxu3 %v274_v15  ;;  %v1426_v15 = vrot.slane %v234_v9, 1  ;;  %v5236_v38 = vld [vmem:[%s4100_s24 + $0x130] sm:$0xff] }
 0x1de   : > { %1601 = vmatpush.msra.mxu1 %v273_v49 }
 0x1df   : > { %3908 = vmatpush.msrb.mxu3 %v273_v49  ;;  %v5217_v49 = vld [vmem:[%s7811_s1 + $0x78] sm:$0xff] }
 0x1e1   : > { %1415 = vrot.lane.b32.xlu2 %v1412_v10, %s4037_s4  ;;  %v272_v10 = vld [vmem:[%s7811_s1 + $0x8] sm:$0xff] }
 0x1e2   : > { %1413 = vrot.lane.b32.xlu1 %v1410_v47, %s4037_s4  ;;  %v5183_v47 = vld [vmem:[%s7811_s1 + $0x88] sm:$0xf]  ;;  %1602 = vmatpush.msra.mxu1 %v272_v10 }
 0x1e3   : > { %1404 = vrot.lane.b32.xlu0 %v1401_v54, %s4036_s30  ;;  %v5153_v14 = vpop.permute.xlu2 %1081  ;;  %v1434_v54 = vrot.slane %v234_v9, 2  ;;  %3743 = vmatpush.msk.msra.mxu2 %vm629_vm3, %v5183_v47  ;;  %v5204_v9 = vld [vmem:[%s7811_s1 + $0x80] sm:$0xff] }
 0x1e4   : > { %7971 = vst [vmem:[#allocation92_spill] sm:$0xff] %v5153_v14  ;;  %v5157_v48 = vpop.permute.xlu1 %1061  ;;  %3909 = vmatpush.msrb.mxu3 %v272_v10 }
 0x1e5   : > { %v5159_v0 = vpop.permute.xlu0 %1059  ;;  %1796 = vmatpush.msra.mxu2 %v5204_v9 }
 0x1e7   : > { %1797 = vmatpush.msra.mxu2 %v5217_v49 }
 0x1e9   : > { %1428 = vrot.lane.b32.xlu2 %v5049_v5, %s4039_s6  ;;  %v1172_v5 = vsel %vm1169_vm7, %v3969_v50, %v4424_v63  ;;  %v271_v63 = vld [vmem:[%s7811_s1] sm:$0xff] }
 0x1ea   : > { %1421 = vrot.lane.b32.xlu1 %v5031_v41, %s4038_s5  ;;  %1603 = vmatpush.msra.mxu1 %v271_v63 }
 0x1eb   : > { %1419 = vrot.lane.b32.xlu0 %v5026_v4, %s4038_s5  ;;  %v5188_v21 = vpop.permute.xlu2 %1087  ;;  %v1189_v4 = vsel %vm1186_vm8, %v1172_v5, %v4525_v3  ;;  %v7973_v5 = vrot.slane %v5031_v41, 2  ;;  %3910 = vmatpush.msrb.mxu3 %v271_v63 }
 0x1ec   : > { %7972 = vst [vmem:[#allocation93_spill] sm:$0xff] %v5188_v21  ;;  %v5194_v14 = vpop.permute.xlu1 %1067  ;;  %v1206_v50 = vsel %vm1203_vm10, %v1189_v4, %v4606_v36  ;;  %v5222_v36 = vld [vmem:[%s7811_s1 + $0x70] sm:$0xff]  ;;  %v7974_v4 = vrot.slane %v5031_v41, 1 }
 0x1ed   : > { %v5196_v27 = vpop.permute.xlu0 %1065  ;;  %v1223_v3 = vsel %vm1220_vm9, %v1206_v50, %v4634_v32  ;;  %v1435_v21 = vsel %vm7838_vm1, %v7973_v5, %v1434_v54  ;;  %v5233_v5 = vld [vmem:[%s4100_s24 + $0x128] sm:$0xff]  ;;  %1798 = vmatpush.msra.mxu2 %v5222_v36 }
 0x1ee   : > { %v1240_v32 = vsel %vm1237_vm11, %v1223_v3, %v4786_v7  ;;  %v1427_v50 = vsel %vm362_vm0, %v7974_v4, %v1426_v15  ;;  %v7834_v15 = vrot.slane %v5236_v38, 1  ;;  %v1668_v4 = vrot.slane %v5233_v5, 2 }
 0x1ef   : > { %v1257_v54 = vsel %vm1254_vm13, %v1240_v32, %v4844_v39  ;;  %v1667_v39 = vrot.slane %v5239_v31, 2 }
 0x1f0   : > { %v1274_v7 = vsel %vm1271_vm12, %v1257_v54, %v4879_v37  ;;  %v5253_v37 = vld [vmem:[%s7811_s1 + $0x68] sm:$0xff] }
 0x1f1   : > { %1438 = vrot.lane.b32.xlu2 %v1435_v21, %s4040_s7  ;;  %v1291_v41 = vsel %vm1288_vm14, %v1274_v7, %v5044_v11  ;;  %v1657_v11 = vrot.slane %v5233_v5, 1  ;;  %1799 = vmatpush.msra.mxu2 %v5253_v37 }
 0x1f2   : > { %1436 = vrot.lane.b32.xlu1 %v5074_v33, %s4040_s7  ;;  %v1308_v10 = vsel %vm1305_vm6, %v1291_v41, %v5157_v48  ;;  %v1656_v33 = vrot.slane %v5239_v31, 1  ;;  %v5273_v48 = vld [vmem:[%s7811_s1 + $0x60] sm:$0xff]  ;;  %v1681_v41 = vrot.slane %v5236_v38, 3 }
 0x1f3   : > { %1430 = vrot.lane.b32.xlu0 %v1427_v50, %s4039_s6  ;;  %v1126_v21 = vpop.permute.xlu2 %1125  ;;  %1800 = vmatpush.msra.mxu2 %v5273_v48  ;;  %v1669_v50 = vsel %vm7838_vm1, %v1667_v39, %v1668_v4  ;;  %v5282_v54 = vsel %vm362_vm0, %v1657_v11, %v7834_v15  ;;  %v1678_v39 = vrot.slane %v5239_v31, 3  ;;  %v7835_v15 = vrot.slane %v5236_v38, 2 }
 0x1f4   : > { %v5262_v63 = vpop.permute.xlu1 %1073  ;;  %v5267_v32 = vsel %vm1322_vm15, %v1308_v10, %v1126_v21  ;;  %v1658_v7 = vsel %vm362_vm0, %v1656_v33, %v1657_v11  ;;  %v1679_v21 = vrot.slane %v5233_v5, 3 }
 0x1f5   : > { %7975 = vst [vmem:[#allocation94_spill] sm:$0xff] %v5262_v63  ;;  %v5264_v3 = vpop.permute.xlu0 %1071  ;;  %3710 = vmatmul.msk.f32.vlgmr.msra.gmra.mxu0 %vm1462_vm5, %v5267_v32 }
 0x1f6   : > { %7976 = vst [vmem:[#allocation95_spill] sm:$0xff] %v5264_v3  ;;  %v1682_v33 = vsel %vm7837_vm2, %v1679_v21, %v1681_v41  ;;  %v1690_v41 = vrot.slane %v5233_v5, 4  ;;  %v1701_v3 = vrot.slane %v5233_v5, 5 }
 0x1f9   : > { %1672 = vrot.lane.b32.xlu2 %v1669_v50, %s4032_s26  ;;  %v1680_v50 = vsel %vm7837_vm2, %v1678_v39, %v1679_v21  ;;  %v1692_v39 = vrot.slane %v5236_v38, 4  ;;  %v1689_v21 = vrot.slane %v5239_v31, 4  ;;  %vm7993_vm2 = vcmask 1041408  }
 0x1fa   : > { %1663 = vrot.lane.b32.xlu1 %v5282_v54, %s4031_s25 }
 0x1fb   : > { %1661 = vrot.lane.b32.xlu0 %v1658_v7, %s4031_s25  ;;  %v5290_v10 = vpop.permute.xlu2 %1131  ;;  %v5304_v7 = vsel %vm7838_vm1, %v1668_v4, %v7835_v15  ;;  %v3970_v4 = vld [vmem:[%s4100_s24] sm:$0xff]  ;;  %v1693_v61 = vsel %vm629_vm3, %v1690_v41, %v1692_v39  ;;  %v7985_v39 = vld [vmem:[#allocation20_spill] sm:$0xff]  ;;  %vm7994_vm1 = vmmov %vm7993_vm2 }
 0x1fc   : > { %v5295_v63 = vpop.permute.xlu1 %1079  ;;  %7979 = vst [vmem:[#allocation98_spill] sm:$0xff] %v5304_v7 }
 0x1fd   : > { %7977 = vst [vmem:[#allocation96_spill] sm:$0xff] %v5295_v63  ;;  %v5297_v11 = vpop.permute.xlu0 %1077  ;;  %v1700_v63 = vrot.slane %v5239_v31, 5 }
 0x1fe   : > { %7978 = vst [vmem:[#allocation97_spill] sm:$0xff] %v5297_v11 }
 0x1ff   : > { %v1702_v40 = vsel %vm7839_vm4, %v1700_v63, %v1701_v3  ;;  %v7982_v63 = vld [vmem:[#allocation17_spill] sm:$0xff] }
 0x201   : > { %1685 = vrot.lane.b32.xlu2 %v1682_v33, %s4033_s27  ;;  %v1170_v33 = vsel %vm1169_vm7, %v3970_v4, %v4426_v58  ;;  %v3972_v58 = vld [vmem:[%s4100_s24 + $0x28] sm:$0xff] }
 0x202   : > { %1683 = vrot.lane.b32.xlu1 %v1680_v50, %s4033_s27  ;;  %v1173_v4 = vsel %vm1169_vm7, %v3972_v58, %v4441_v55  ;;  %v7983_v58 = vld [vmem:[#allocation5_spill] sm:$0xff] }
 0x203   : > { %1674 = vrot.lane.b32.xlu0 %v5304_v7, %s4032_s26  ;;  %v5311_v11 = vpop.permute.xlu2 %1137 }
 0x204   : > { %7980 = vst [vmem:[#allocation99_spill] sm:$0xff] %v5311_v11  ;;  %v5319_v50 = vpop.permute.xlu1 %1085  ;;  %v1187_v11 = vsel %vm1186_vm8, %v1170_v33, %v4507_v17  ;;  %v1691_v17 = vsel %vm629_vm3, %v1689_v21, %v1690_v41  ;;  %v3973_v33 = vld [vmem:[%s4100_s24 + $0xe0] sm:$0xff] }
 0x205   : > { %v5321_v15 = vpop.permute.xlu0 %1083  ;;  %v1204_v7 = vsel %vm1203_vm10, %v1187_v11, %v4535_v30  ;;  %v1184_v60 = vsel %vm1169_vm7, %v3973_v33, %v4436_v56  ;;  %v1171_v30 = vsel %vm1169_vm7, %v3974_v8, %v4443_v34  ;;  %v1190_v11 = vsel %vm1186_vm8, %v1173_v4, %v7982_v63  ;;  %v7986_v34 = vld [vmem:[#allocation28_spill] sm:$0xff]  ;;  %v7987_v33 = vld [vmem:[#allocation30_spill] sm:$0xff]  ;;  %v7988_v63 = vld [vmem:[#allocation33_spill] sm:$0xff] }
 0x206   : > { %7981 = vst [vmem:[#allocation100_spill] sm:$0xff] %v5321_v15  ;;  %v1221_v15 = vsel %vm1220_vm9, %v1204_v7, %v4690_v62  ;;  %v1188_v62 = vsel %vm1186_vm8, %v1171_v30, %v7983_v58  ;;  %v7984_v7 = vld [vmem:[#allocation8_spill] sm:$0xff]  ;;  %v1207_v21 = vsel %vm1203_vm10, %v1190_v11, %v7985_v39  ;;  %v1201_v4 = vsel %vm1186_vm8, %v1184_v60, %v7986_v34 }
 0x207   : > { %v1238_v55 = vsel %vm1237_vm11, %v1221_v15, %v4771_v19  ;;  %v1191_v41 = vsel %vm1186_vm8, %v1174_v22, %v7984_v7  ;;  %v1205_v19 = vsel %vm1203_vm10, %v1188_v62, %v7987_v33  ;;  %v1714_v22 = vrot.slane %v5236_v38, 6  ;;  %v7989_v11 = vld [vmem:[#allocation40_spill] sm:$0xff] }
 0x208   : > { %v1255_v56 = vsel %vm1254_vm13, %v1238_v55, %v4794_v43  ;;  %v1712_v60 = vrot.slane %v5233_v5, 6  ;;  %v1703_v30 = vrot.slane %v5236_v38, 5 }
 0x209   : > { %1705 = vrot.lane.b32.xlu2 %v1702_v40, %s4035_s29  ;;  %v1272_v15 = vsel %vm1271_vm12, %v1255_v56, %v4938_v28  ;;  %v1711_v40 = vrot.slane %v5239_v31, 6  ;;  %v1208_v28 = vsel %vm1203_vm10, %v1191_v41, %v7988_v63  ;;  %v7991_v56 = vld [vmem:[#allocation44_spill] sm:$0xff] }
 0x20a   : > { %1696 = vrot.lane.b32.xlu1 %v1693_v61, %s4034_s28  ;;  %v1289_v43 = vsel %vm1288_vm14, %v1272_v15, %v5015_v1  ;;  %v1218_v61 = vsel %vm1203_vm10, %v1201_v4, %v7989_v11  ;;  %v1225_v39 = vsel %vm1220_vm9, %v1208_v28, %v4705_v13  ;;  %v1224_v41 = vsel %vm1220_vm9, %v1207_v21, %v7991_v56  ;;  %v7992_v4 = vld [vmem:[#allocation45_spill] sm:$0xff]  ;;  %v3975_v28 = vld [vmem:[%s4100_s24 + $0x48] sm:$0xff]  ;;  %v7995_v11 = vld [vmem:[#allocation2_spill] sm:$0xff] }
 0x20b   : > { %1694 = vrot.lane.b32.xlu0 %v1691_v17, %s4034_s28  ;;  %v5369_v8 = vpop.permute.xlu2 %1143  ;;  %v7990_v17 = vld [vmem:[#allocation43_spill] sm:$0xff]  ;;  %v1306_v1 = vsel %vm1305_vm6, %v1289_v43, %v5060_v46  ;;  %v1235_v7 = vsel %vm1220_vm9, %v1218_v61, %v4700_v29  ;;  %v1241_v46 = vsel %vm1237_vm11, %v1224_v41, %v4784_v42  ;;  %v1715_v29 = vsel %vm7993_vm2, %v1712_v60, %v1714_v22  ;;  %v238_v41 = vld [vmem:[%s4100_s24 + $0x138] sm:$0x3] }
 0x20c   : > { %v1222_v55 = vsel %vm1220_vm9, %v1205_v19, %v7990_v17  ;;  %v1124_v58 = vpop.permute.xlu1 %1123  ;;  %v1242_v19 = vsel %vm1237_vm11, %v1225_v39, %v4733_v16  ;;  %v1252_v13 = vsel %vm1237_vm11, %v1235_v7, %v4834_v52  ;;  %v1713_v15 = vsel %vm7994_vm1, %v1711_v40, %v1712_v60  ;;  %v8000_v7 = vld [vmem:[#allocation36_spill] sm:$0xff] }
 0x20d   : > { %v1122_v62 = vpop.permute.xlu0 %1121  ;;  %v1239_v33 = vsel %vm1237_vm11, %v1222_v55, %v7992_v4  ;;  %v1704_v43 = vsel %vm7839_vm4, %v1701_v3, %v1703_v30  ;;  %v1258_v16 = vsel %vm1254_vm13, %v1241_v46, %v4806_v57  ;;  %v1259_v42 = vsel %vm1254_vm13, %v1242_v19, %v4866_v26  ;;  %v7997_v55 = vld [vmem:[#allocation32_spill] sm:$0xff] }
 0x20e   : > { %v1323_v34 = vsel %vm1322_vm15, %v1306_v1, %v1122_v62  ;;  %v1256_v21 = vsel %vm1254_vm13, %v1239_v33, %v4846_v25  ;;  %v1269_v63 = vsel %vm1254_vm13, %v1252_v13, %v4917_v2  ;;  %v1276_v25 = vsel %vm1271_vm12, %v1259_v42, %v4953_v23  ;;  %v8002_v33 = vld [vmem:[#allocation69_spill] sm:$0xff]  ;;  %v8003_v13 = vld [vmem:[#allocation7_spill] sm:$0xff] }
 0x20f   : > { %3727 = vmatmul.msk.f32.vlgmr.msra.gmra.mxu1 %vm1462_vm5, %v1323_v34  ;;  %v1273_v22 = vsel %vm1271_vm12, %v1256_v21, %v4936_v53  ;;  %v1286_v52 = vsel %vm1271_vm12, %v1269_v63, %v4950_v45  ;;  %v1275_v3 = vsel %vm1271_vm12, %v1258_v16, %v4955_v24  ;;  %v1293_v26 = vsel %vm1288_vm14, %v1276_v25, %v4982_v6  ;;  %v8001_v34 = vld [vmem:[#allocation66_spill] sm:$0xff]  ;;  %v8007_v63 = vld [vmem:[#allocation47_spill] sm:$0xff] }
 0x210   : > { %v1290_v57 = vsel %vm1288_vm14, %v1273_v22, %v4965_v35  ;;  %v1292_v53 = vsel %vm1288_vm14, %v1275_v3, %v5042_v18  ;;  %v1303_v2 = vsel %vm1288_vm14, %v1286_v52, %v5142_v12  ;;  %v1723_v45 = vrot.slane %v5233_v5, 7  ;;  %v5517_v25 = vld [vmem:[%s4100_s24 + $0x148] sm:$0xff] }
 0x211   : > { %1718 = vrot.lane.b32.xlu2 %v1715_v29, %s4036_s30  ;;  %v1320_v24 = vsel %vm1305_vm6, %v1303_v2, %v5319_v50  ;;  %v1725_v35 = vrot.slane %v5236_v38, 7  ;;  %v1722_v6 = vrot.slane %v5239_v31, 7  ;;  %v1309_v18 = vsel %vm1305_vm6, %v1292_v53, %v5085_v20  ;;  %v3976_v29 = vld [vmem:[%s4100_s24 + $0x60] sm:$0xff]  ;;  %v8009_v3 = vld [vmem:[#allocation59_spill] sm:$0xff] }
 0x212   : > { %1716 = vrot.lane.b32.xlu1 %v1713_v15, %s4036_s30  ;;  %v1307_v12 = vsel %vm1305_vm6, %v1290_v57, %v5159_v0  ;;  %v1310_v40 = vsel %vm1305_vm6, %v1293_v26, %v5196_v27  ;;  %v1175_v61 = vsel %vm1169_vm7, %v3975_v28, %v7995_v11  ;;  %v7996_v27 = vld [vmem:[#allocation19_spill] sm:$0xff]  ;;  %vm7998_vm1 = vcmask 1040384  }
 0x213   : > { %1707 = vrot.lane.b32.xlu0 %v1704_v43, %s4035_s29  ;;  %v1150_v23 = vpop.permute.xlu2 %1149  ;;  %v1324_v20 = vsel %vm1322_vm15, %v1307_v12, %v1124_v58  ;;  %v1192_v17 = vsel %vm1186_vm8, %v1175_v61, %v7996_v27  ;;  %v1726_v62 = vsel %vm7998_vm1, %v1723_v45, %v1725_v35  ;;  %vm7999_vm2 = vmmov %vm7998_vm1  ;;  %v1176_v21 = vsel %vm1169_vm7, %v3976_v29, %v8003_v13  ;;  %v8004_v43 = vld [vmem:[#allocation18_spill] sm:$0xff]  ;;  %v3977_v35 = vld [vmem:[%s4100_s24 + $0x68] sm:$0xff] }
 0x214   : > { %v5440_v60 = vsel %vm1322_vm15, %v1320_v24, %v1150_v23  ;;  %v1130_v50 = vpop.permute.xlu1 %1129  ;;  %v1209_v1 = vsel %vm1203_vm10, %v1192_v17, %v7997_v55  ;;  %v1724_v58 = vsel %vm7999_vm2, %v1722_v6, %v1723_v45  ;;  %v8005_v16 = vrot.slane %v5236_v38, 1  ;;  %v8010_v24 = vld [vmem:[#allocation84_spill] sm:$0xff]  ;;  %v8011_v6 = vld [vmem:[#allocation6_spill] sm:$0xff]  ;;  %v8012_v12 = vld [vmem:[#allocation87_spill] sm:$0xff] }
 0x215   : > { %v1128_v30 = vpop.permute.xlu0 %1127  ;;  %3722 = vmatmul.msk.f32.vlgmr.msra.gmra.mxu3 %vm1462_vm5, %v5440_v60  ;;  %v5450_v0 = vsel %vm1322_vm15, %v1310_v40, %v1130_v50  ;;  %v1226_v39 = vsel %vm1220_vm9, %v1209_v1, %v8000_v7  ;;  %v1748_v53 = vrot.slane %v238_v41, 2  ;;  %v8013_v40 = vld [vmem:[#allocation11_spill] sm:$0xff]  ;;  %vm8016_vm1 = vcmask 1045504   ;;  %v8017_v17 = vld [vmem:[#allocation46_spill] sm:$0xff]  ;;  %v5563_v1 = vld [vmem:[%s4100_s24 + $0x150] sm:$0xff] }
 0x216   : > { %v1326_v31 = vsel %vm1322_vm15, %v1309_v18, %v1128_v30  ;;  %3744 = vmatmul.msk.f32.vlgmr.msra.gmra.mxu2 %vm1462_vm5, %v5450_v0  ;;  %3911 = vmatpush.msk.msra.mxu3 %vm629_vm3, %v5183_v47  ;;  %v1243_v56 = vsel %vm1237_vm11, %v1226_v39, %v4798_v44  ;;  %v1740_v47 = vrot.slane %v238_v41, 1  ;;  %v1177_v18 = vsel %vm1169_vm7, %v3977_v35, %v8011_v6  ;;  %v8014_v11 = vld [vmem:[#allocation35_spill] sm:$0xff]  ;;  %v8021_v41 = vld [vmem:[#allocation98_spill] sm:$0xff]  ;;  %vm8030_vm2 = vmmov %vm8016_vm1 }
 0x217   : > { %3711 = vmatmul.msk.f32.gmra.mxu0 %vm1462_vm5, %v1326_v31  ;;  %3728 = vmatmul.msk.f32.gmra.mxu1 %vm1462_vm5, %v1324_v20  ;;  %v1260_v4 = vsel %vm1254_vm13, %v1243_v56, %v8001_v34  ;;  %v1194_v50 = vsel %vm1186_vm8, %v1177_v18, %v8013_v40  ;;  %v8015_v20 = vrot.slane %v5236_v38, 2  ;;  %v8019_v7 = vld [vmem:[#allocation15_spill] sm:$0xff]  ;;  %v8020_v56 = vld [vmem:[#allocation68_spill] sm:$0xff]  ;;  %v1883_v34 = vrot.slane %v5563_v1, 2  ;;  %v3979_v29 = vld [vmem:[%s4100_s24 + $0x80] sm:$0xff] }
 0x218   : > { %3912 = vmatpush.msra.mxu3 %v5204_v9  ;;  %v1277_v19 = vsel %vm1271_vm12, %v1260_v4, %v8002_v33  ;;  %v1741_v42 = vsel %vm362_vm0, %v8005_v16, %v1740_v47  ;;  %v1211_v61 = vsel %vm1203_vm10, %v1194_v50, %v8014_v11  ;;  %v8022_v4 = vld [vmem:[#allocation75_spill] sm:$0xff]  ;;  %v8032_v35 = vld [vmem:[#allocation54_spill] sm:$0xff]  ;;  %v8035_v50 = vld [vmem:[#allocation65_spill] sm:$0xff] }
 0x219   : > { %1733 = vrot.lane.b32.xlu2 %v5233_v5, %s4038_s5  ;;  %v1294_v44 = vsel %vm1288_vm14, %v1277_v19, %v5067_v51  ;;  %v1749_v27 = vsel %vm8016_vm1, %v8015_v20, %v1748_v53  ;;  %v1228_v55 = vsel %vm1220_vm9, %v1211_v61, %v8017_v17  ;;  %v1881_v19 = vrot.slane %v5517_v25, 2  ;;  %v8023_v13 = vld [vmem:[#allocation3_spill] sm:$0xff]  ;;  %v8033_v18 = vld [vmem:[#allocation58_spill] sm:$0xff]  ;;  %v8037_v20 = vld [vmem:[#allocation72_spill] sm:$0xff] }
 0x21a   : > { %1729 = vrot.lane.b32.xlu1 %v1726_v62, %s4037_s4  ;;  %3913 = vmatpush.msra.mxu3 %v5217_v49  ;;  %v1311_v15 = vsel %vm1305_vm6, %v1294_v44, %v5194_v14  ;;  %v1193_v49 = vsel %vm1186_vm8, %v1176_v21, %v8004_v43  ;;  %v8006_v14 = vld [vmem:[#allocation23_spill] sm:$0xff]  ;;  %v8018_v62 = vld [vmem:[#allocation50_spill] sm:$0xff]  ;;  %v1872_v44 = vrot.slane %v5563_v1, 1  ;;  %v1178_v21 = vsel %vm1169_vm7, %v3979_v29, %v8023_v13 }
 0x21b   : > { %1727 = vrot.lane.b32.xlu0 %v1724_v58, %s4037_s4  ;;  %v5478_v46 = vpop.permute.xlu2 %1349  ;;  %v5499_v51 = vsel %vm1322_vm15, %v1311_v15, %v5290_v10  ;;  %v5514_v10 = vld [vmem:[%s4100_s24 + $0x140] sm:$0xff]  ;;  %v3978_v58 = vld [vmem:[%s4100_s24 + $0xe8] sm:$0xff]  ;;  %v5614_v53 = vsel %vm8030_vm2, %v1881_v19, %v1883_v34  ;;  %v1903_v29 = vrot.slane %v5517_v25, 4  ;;  %vm8047_vm2 = vcmask 1044480  }
 0x21c   : > { %v5483_v5 = vpop.permute.xlu1 %1135  ;;  %3914 = vmatpush.msra.mxu3 %v5222_v36  ;;  %v1210_v36 = vsel %vm1203_vm10, %v1193_v49, %v8006_v14  ;;  %v1185_v39 = vsel %vm1169_vm7, %v3978_v58, %v8019_v7  ;;  %v1880_v33 = vrot.slane %v5514_v10, 2  ;;  %v8024_v15 = vld [vmem:[#allocation27_spill] sm:$0xff]  ;;  %v8025_v49 = vld [vmem:[#allocation78_spill] sm:$0xff]  ;;  %v1892_v58 = vrot.slane %v5517_v25, 3 }
 0x21d   : > { %v1134_v9 = vpop.permute.xlu0 %1133  ;;  %v1227_v22 = vsel %vm1220_vm9, %v1210_v36, %v8007_v63  ;;  %v1202_v43 = vsel %vm1186_vm8, %v1185_v39, %v8024_v15  ;;  %v8026_v36 = vld [vmem:[#allocation22_spill] sm:$0xff]  ;;  %v8036_v11 = vld [vmem:[#allocation67_spill] sm:$0xff]  ;;  %v1894_v7 = vrot.slane %v5563_v1, 3  ;;  %v1891_v39 = vrot.slane %v5514_v10, 3 }
 0x21e   : > { %3745 = vmatmul.msk.f32.gmra.mxu2 %vm1462_vm5, %v5499_v51  ;;  %3915 = vmatpush.msra.mxu3 %v5253_v37  ;;  %v1869_v37 = vrot.slane %v5514_v10, 1  ;;  %v1195_v63 = vsel %vm1186_vm8, %v1178_v21, %v8026_v36  ;;  %v3980_v13 = vld [vmem:[%s4100_s24 + $0x88] sm:$0xff]  ;;  %v8042_v21 = vld [vmem:[#allocation10_spill] sm:$0xff]  ;;  %v8044_v36 = vld [vmem:[#allocation21_spill] sm:$0xff] }
 0x21f   : > { %3712 = vmatmul.msk.f32.gmra.mxu0 %vm1462_vm5, %v5450_v0  ;;  %3729 = vmatmul.msk.f32.gmra.mxu1 %vm1462_vm5, %v5267_v32  ;;  %v8008_v32 = vld [vmem:[#allocation56_spill] sm:$0xff]  ;;  %v1179_v15 = vsel %vm1169_vm7, %v3980_v13, %v8042_v21 }
 0x220   : > { %v1244_v52 = vsel %vm1237_vm11, %v1227_v22, %v8008_v32  ;;  %3916 = vmatpush.msra.mxu3 %v5273_v48  ;;  %v8027_v22 = vld [vmem:[#allocation31_spill] sm:$0xff] }
 0x221   : > { %1744 = vrot.lane.b32.xlu2 %v1741_v42, %s4039_s6  ;;  %v1261_v57 = vsel %vm1254_vm13, %v1244_v52, %v8009_v3  ;;  %v1219_v32 = vsel %vm1203_vm10, %v1202_v43, %v8027_v22  ;;  %v8028_v52 = vld [vmem:[#allocation95_spill] sm:$0xff]  ;;  %v8043_v43 = vld [vmem:[#allocation94_spill] sm:$0xff] }
 0x222   : > { %1742 = vrot.lane.b32.xlu1 %v5282_v54, %s4039_s6  ;;  %v1278_v26 = vsel %vm1271_vm12, %v1261_v57, %v4970_v59  ;;  %v1870_v54 = vrot.slane %v5517_v25, 1  ;;  %v8029_v57 = vld [vmem:[#allocation34_spill] sm:$0xff]  ;;  %v1236_v6 = vsel %vm1220_vm9, %v1219_v32, %v8032_v35  ;;  %v8045_v22 = vld [vmem:[#allocation99_spill] sm:$0xff] }
 0x223   : > { %1735 = vrot.lane.b32.xlu0 %v5236_v38, %s4038_s5  ;;  %v5530_v2 = vpop.permute.xlu2 %1369  ;;  %v1295_v48 = vsel %vm1288_vm14, %v1278_v26, %v8010_v24  ;;  %v8031_v24 = vld [vmem:[#allocation39_spill] sm:$0xff] }
 0x224   : > { %v5534_v23 = vpop.permute.xlu1 %1141  ;;  %v1312_v59 = vsel %vm1305_vm6, %v1295_v48, %v8012_v12  ;;  %v1871_v28 = vsel %vm362_vm0, %v1869_v37, %v1870_v54  ;;  %v1212_v37 = vsel %vm1203_vm10, %v1195_v63, %v8029_v57  ;;  %v1196_v63 = vsel %vm1186_vm8, %v1179_v15, %v8044_v36  ;;  %v8060_v36 = vld [vmem:[#allocation71_spill] sm:$0xff] }
 0x225   : > { %v5536_v45 = vpop.permute.xlu0 %1139  ;;  %v5547_v30 = vsel %vm1322_vm15, %v1312_v59, %v1134_v9  ;;  %v1229_v48 = vsel %vm1220_vm9, %v1212_v37, %v8031_v24  ;;  %v8034_v59 = vld [vmem:[#allocation63_spill] sm:$0xff]  ;;  %v1895_v37 = vsel %vm8047_vm2, %v1892_v58, %v1894_v7 }
 0x226   : > { %3746 = vmatmul.msk.f32.gmra.mxu2 %vm1462_vm5, %v5547_v30  ;;  %v1246_v12 = vsel %vm1237_vm11, %v1229_v48, %v8033_v18  ;;  %v1253_v40 = vsel %vm1237_vm11, %v1236_v6, %v8034_v59  ;;  %v8049_v48 = vld [vmem:[#allocation49_spill] sm:$0xff]  ;;  %v8051_v18 = vld [vmem:[#allocation62_spill] sm:$0xff] }
 0x227   : > { %3713 = vmatmul.msk.f32.gmra.mxu0 %vm1462_vm5, %v5499_v51  ;;  %3730 = vmatmul.msk.f32.gmra.mxu1 %vm1462_vm5, %v1326_v31  ;;  %v1245_v31 = vsel %vm1237_vm11, %v1228_v55, %v8018_v62  ;;  %v1263_v61 = vsel %vm1254_vm13, %v1246_v12, %v8036_v11  ;;  %v1902_v55 = vrot.slane %v5514_v10, 4  ;;  %v8039_v62 = vld [vmem:[#allocation91_spill] sm:$0xff]  ;;  %v8050_v6 = vld [vmem:[#allocation57_spill] sm:$0xff]  ;;  %v1905_v11 = vrot.slane %v5563_v1, 4 }
 0x228   : > { %v1262_v38 = vsel %vm1254_vm13, %v1245_v31, %v8020_v56  ;;  %v8052_v59 = vld [vmem:[#allocation77_spill] sm:$0xff] }
 0x229   : > { %1874 = vrot.lane.b32.xlu2 %v1871_v28, %s4031_s25  ;;  %v1279_v47 = vsel %vm1271_vm12, %v1262_v38, %v8022_v4  ;;  %v1270_v28 = vsel %vm1254_vm13, %v1253_v40, %v8035_v50  ;;  %v8040_v38 = vld [vmem:[#allocation86_spill] sm:$0xff]  ;;  %v8041_v4 = vld [vmem:[#allocation93_spill] sm:$0xff]  ;;  %v1913_v50 = vrot.slane %v5514_v10, 5  ;;  %v1906_v21 = vsel %vm629_vm3, %v1903_v29, %v1905_v11 }
 0x22a   : > { %1752 = vrot.lane.b32.xlu1 %v1749_v27, %s4040_s7  ;;  %v1296_v16 = vsel %vm1288_vm14, %v1279_v47, %v8025_v49  ;;  %v8038_v27 = vld [vmem:[#allocation82_spill] sm:$0xff] }
 0x22b   : > { %1750 = vrot.lane.b32.xlu0 %v8021_v41, %s4040_s7  ;;  %v5582_v9 = vpop.permute.xlu2 %1382  ;;  %v1313_v3 = vsel %vm1305_vm6, %v1296_v16, %v8028_v52  ;;  %v1287_v17 = vsel %vm1271_vm12, %v1270_v28, %v8038_v27  ;;  %v1904_v52 = vsel %vm629_vm3, %v1902_v55, %v1903_v29  ;;  %v1914_v28 = vrot.slane %v5517_v25, 5  ;;  %v3981_v55 = vld [vmem:[%s4100_s24 + $0xa0] sm:$0xff]  ;;  %v300_v29 = vld [vmem:[%s7811_s1 + $0xe8] sm:$0xf] }
 0x22c   : > { %v5591_v42 = vpop.permute.xlu1 %1147  ;;  %v5605_v26 = vsel %vm1322_vm15, %v1313_v3, %v5483_v5  ;;  %v1882_v5 = vsel %vm8016_vm1, %v1880_v33, %v1881_v19  ;;  %v1304_v31 = vsel %vm1288_vm14, %v1287_v17, %v8039_v62  ;;  %v8046_v3 = vld [vmem:[#allocation26_spill] sm:$0xff]  ;;  %vm8048_vm1 = vmmov %vm8047_vm2  ;;  %v8054_v62 = vld [vmem:[#allocation9_spill] sm:$0xff]  ;;  %3777 = vmatpush.msk.msrb.mxu0 %vm629_vm3, %v300_v29  ;;  %vm8066_vm2 = vcmask 1040384  }
 0x22d   : > { %v5593_v14 = vpop.permute.xlu0 %1145  ;;  %v1321_v47 = vsel %vm1305_vm6, %v1304_v31, %v8041_v4  ;;  %v1213_v57 = vsel %vm1203_vm10, %v1196_v63, %v8046_v3  ;;  %v1893_v24 = vsel %vm8048_vm1, %v1891_v39, %v1892_v58  ;;  %v1180_v31 = vsel %vm1169_vm7, %v3981_v55, %v8054_v62  ;;  %v8055_v58 = vld [vmem:[#allocation90_spill] sm:$0xff]  ;;  %v8061_v3 = vld [vmem:[#allocation76_spill] sm:$0xff]  ;;  %v8065_v55 = vld [vmem:[#allocation25_spill] sm:$0xff] }
 0x22e   : > { %3747 = vmatmul.msk.f32.gmra.mxu2 %vm1462_vm5, %v5605_v26  ;;  %v1230_v35 = vsel %vm1220_vm9, %v1213_v57, %v8049_v48  ;;  %v8056_v39 = vld [vmem:[#allocation14_spill] sm:$0xff]  ;;  %v1915_v13 = vsel %vm7839_vm4, %v1913_v50, %v1914_v28  ;;  %v1924_v48 = vrot.slane %v5514_v10, 6  ;;  %vm8068_vm1 = vcmask 1041408  }
 0x22f   : > { %3714 = vmatmul.msk.f32.gmra.mxu0 %vm1462_vm5, %v5547_v30  ;;  %3731 = vmatmul.msk.f32.gmra.mxu1 %vm1462_vm5, %v5450_v0  ;;  %v5626_v0 = vsel %vm362_vm0, %v1870_v54, %v1872_v44  ;;  %v1280_v54 = vsel %vm1271_vm12, %v1263_v61, %v8037_v20  ;;  %v8053_v20 = vld [vmem:[#allocation85_spill] sm:$0xff]  ;;  %v8073_v29 = vld [vmem:[#allocation74_spill] sm:$0xff] }
 0x230   : > { %v1297_v41 = vsel %vm1288_vm14, %v1280_v54, %v8040_v38  ;;  %v1197_v38 = vsel %vm1186_vm8, %v1180_v31, %v8056_v39 }
 0x231   : > { %1887 = vrot.lane.b32.xlu2 %v5614_v53, %s4032_s26  ;;  %v1314_v49 = vsel %vm1305_vm6, %v1297_v41, %v8043_v43  ;;  %v8059_v43 = vld [vmem:[#allocation53_spill] sm:$0xff] }
 0x232   : > { %1885 = vrot.lane.b32.xlu1 %v1882_v5, %s4032_s26  ;;  %v5672_v32 = vsel %vm1322_vm15, %v1314_v49, %v8045_v22  ;;  %v1247_v5 = vsel %vm1237_vm11, %v1230_v35, %v8050_v6  ;;  %v306_v22 = vld [vmem:[%s7811_s1 + $0x118] sm:$0xf] }
 0x233   : > { %1876 = vrot.lane.b32.xlu0 %v5626_v0, %s4031_s25  ;;  %v5651_v56 = vpop.permute.xlu2 %1402  ;;  %v1264_v12 = vsel %vm1254_vm13, %v1247_v5, %v8051_v18  ;;  %3794 = vmatpush.msk.msrb.mxu1 %vm629_vm3, %v306_v22  ;;  %v8062_v6 = vld [vmem:[#allocation81_spill] sm:$0xff] }
 0x234   : > { %v5657_v33 = vpop.permute.xlu1 %1347  ;;  %v1281_v40 = vsel %vm1271_vm12, %v1264_v12, %v8052_v59  ;;  %v3982_v59 = vld [vmem:[%s4100_s24 + $0xa8] sm:$0xff] }
 0x235   : > { %v1152_v19 = vpop.permute.xlu0 %1151  ;;  %v1298_v54 = vsel %vm1288_vm14, %v1281_v40, %v8053_v20  ;;  %v8063_v40 = vld [vmem:[#allocation4_spill] sm:$0xff]  ;;  %v299_v20 = vld [vmem:[%s7811_s1 + $0xe0] sm:$0xff] }
 0x236   : > { %v5666_v16 = vsel %vm1322_vm15, %v1321_v47, %v1152_v19  ;;  %3748 = vmatmul.msk.f32.gmra.mxu2 %vm1462_vm5, %v5672_v32  ;;  %v1315_v7 = vsel %vm1305_vm6, %v1298_v54, %v8055_v58  ;;  %v8057_v47 = vld [vmem:[#allocation38_spill] sm:$0xff]  ;;  %v1181_v50 = vsel %vm1169_vm7, %v3982_v59, %v8063_v40  ;;  %v305_v54 = vld [vmem:[%s7811_s1 + $0x110] sm:$0xff]  ;;  %2222 = vmatpush.msrb.mxu0 %v299_v20  ;;  %v8075_v59 = vld [vmem:[#allocation13_spill] sm:$0xff] }
 0x237   : > { %3715 = vmatmul.msk.f32.gmra.mxu0 %vm1462_vm5, %v5605_v26  ;;  %3723 = vmatmul.msk.f32.gmra.mxu3 %vm1462_vm5, %v5666_v16  ;;  %v5719_v41 = vsel %vm1322_vm15, %v1315_v7, %v5536_v45  ;;  %v1214_v19 = vsel %vm1203_vm10, %v1197_v38, %v8057_v47  ;;  %v8058_v45 = vld [vmem:[#allocation48_spill] sm:$0xff]  ;;  %v1198_v62 = vsel %vm1186_vm8, %v1181_v50, %v8065_v55  ;;  %v8067_v7 = vld [vmem:[#allocation37_spill] sm:$0xff]  ;;  %v8070_v47 = vld [vmem:[#allocation42_spill] sm:$0xff] }
 0x238   : > { %3732 = vmatmul.msk.f32.gmra.mxu1 %vm1462_vm5, %v5499_v51  ;;  %v1916_v51 = vrot.slane %v5563_v1, 5  ;;  %v1231_v15 = vsel %vm1220_vm9, %v1214_v19, %v8058_v45  ;;  %v1215_v39 = vsel %vm1203_vm10, %v1198_v62, %v8067_v7  ;;  %v8071_v45 = vld [vmem:[#allocation61_spill] sm:$0xff]  ;;  %v8076_v50 = vld [vmem:[#allocation96_spill] sm:$0xff] }
 0x239   : > { %1907 = vrot.lane.b32.xlu2 %v1904_v52, %s4034_s28  ;;  %v1248_v49 = vsel %vm1237_vm11, %v1231_v15, %v8059_v43  ;;  %v1935_v52 = vrot.slane %v5514_v10, 7  ;;  %2435 = vmatpush.msrb.mxu1 %v305_v54  ;;  %v1232_v19 = vsel %vm1220_vm9, %v1215_v39, %v8070_v47  ;;  %v8072_v43 = vld [vmem:[#allocation70_spill] sm:$0xff]  ;;  %v301_v20 = vld [vmem:[%s7811_s1 + $0xf0] sm:$0xff]  ;;  %v8078_v7 = vld [vmem:[#allocation29_spill] sm:$0xff] }
 0x23a   : > { %1898 = vrot.lane.b32.xlu1 %v1895_v37, %s4033_s27  ;;  %v1917_v4 = vsel %vm7839_vm4, %v1914_v28, %v1916_v51  ;;  %v1265_v63 = vsel %vm1254_vm13, %v1248_v49, %v8060_v36  ;;  %v1925_v37 = vrot.slane %v5517_v25, 6  ;;  %v1936_v51 = vrot.slane %v5517_v25, 7  ;;  %v8064_v28 = vld [vmem:[#allocation97_spill] sm:$0xff]  ;;  %vm8069_vm4 = vmmov %vm8068_vm1  ;;  %v297_v36 = vld [vmem:[%s7811_s1 + $0xd0] sm:$0xff] }
 0x23b   : > { %1896 = vrot.lane.b32.xlu0 %v1893_v24, %s4033_s27  ;;  %v5702_v61 = vpop.permute.xlu2 %1415  ;;  %v1282_v57 = vsel %vm1271_vm12, %v1265_v63, %v8061_v3  ;;  %v1927_v24 = vrot.slane %v5563_v1, 6  ;;  %v1249_v15 = vsel %vm1237_vm11, %v1232_v19, %v8071_v45  ;;  %v302_v63 = vld [vmem:[%s7811_s1 + $0xf8] sm:$0xff]  ;;  %v311_v54 = vld [vmem:[%s7811_s1 + $0x140] sm:$0xff]  ;;  %v8077_v55 = vld [vmem:[#allocation24_spill] sm:$0xff] }
 0x23c   : > { %v5706_v27 = vpop.permute.xlu1 %1360  ;;  %v1299_v5 = vsel %vm1288_vm14, %v1282_v57, %v8062_v6  ;;  %v1937_v58 = vsel %vm8066_vm2, %v1935_v52, %v1936_v51  ;;  %v1266_v49 = vsel %vm1254_vm13, %v1249_v15, %v8072_v43  ;;  %v1938_v52 = vrot.slane %v5563_v1, 7  ;;  %v312_v57 = vld [vmem:[%s7811_s1 + $0x148] sm:$0xf]  ;;  %v5866_v47 = vld [vmem:[%s4100_s24 + $0x158] sm:$0x3]  ;;  %v295_v19 = vld [vmem:[%s7811_s1 + $0xc0] sm:$0xff] }
 0x23d   : > { %v5708_v17 = vpop.permute.xlu0 %1358  ;;  %v1316_v11 = vsel %vm1305_vm6, %v1299_v5, %v8064_v28  ;;  %v1928_v38 = vsel %vm8068_vm1, %v1925_v37, %v1927_v24  ;;  %v1283_v22 = vsel %vm1271_vm12, %v1266_v49, %v8073_v29  ;;  %3811 = vmatpush.msk.msrb.mxu2 %vm629_vm3, %v312_v57  ;;  %v3983_v5 = vld [vmem:[%s4100_s24 + $0xc0] sm:$0xff]  ;;  %v8082_v45 = vld [vmem:[#allocation64_spill] sm:$0xff]  ;;  %v308_v43 = vld [vmem:[%s7811_s1 + $0x128] sm:$0xff]  ;;  %vm8096_vm1 = vcmask 1044480  }
 0x23e   : > { %3749 = vmatmul.msk.f32.gmra.mxu2 %vm1462_vm5, %v5719_v41  ;;  %v5779_v31 = vsel %vm1322_vm15, %v1316_v11, %v5534_v23  ;;  %v1926_v23 = vsel %vm8069_vm4, %v1924_v48, %v1925_v37  ;;  %v8074_v37 = vld [vmem:[#allocation89_spill] sm:$0xff]  ;;  %v1182_v40 = vsel %vm1169_vm7, %v3983_v5, %v8075_v59  ;;  %v296_v11 = vld [vmem:[%s7811_s1 + $0xc8] sm:$0xff]  ;;  %vm8079_vm4 = vmmov %vm8066_vm2  ;;  %vm8095_vm2 = vcmask 1045504  }
 0x23f   : > { %3716 = vmatmul.msk.f32.gmra.mxu0 %vm1462_vm5, %v5672_v32  ;;  %v1300_v24 = vsel %vm1288_vm14, %v1283_v22, %v8074_v37  ;;  %v1199_v62 = vsel %vm1186_vm8, %v1182_v40, %v8077_v55  ;;  %2648 = vmatpush.msrb.mxu2 %v311_v54  ;;  %v8083_v49 = vld [vmem:[#allocation80_spill] sm:$0xff]  ;;  %v3984_v22 = vld [vmem:[%s4100_s24 + $0xc8] sm:$0xff] }
 0x240   : > { %3733 = vmatmul.msk.f32.gmra.mxu1 %vm1462_vm5, %v5547_v30  ;;  %v1317_v28 = vsel %vm1305_vm6, %v1300_v24, %v8076_v50  ;;  %v1216_v39 = vsel %vm1203_vm10, %v1199_v62, %v8078_v7  ;;  %v8085_v57 = vld [vmem:[#allocation88_spill] sm:$0xff]  ;;  %v3985_v62 = vld [vmem:[%s4100_s24 + $0x100] sm:$0xff] }
 0x241   : > { %1920 = vrot.lane.b32.xlu2 %v1917_v4, %s4035_s29  ;;  %v304_v4 = vld [vmem:[%s7811_s1 + $0x108] sm:$0xff]  ;;  %v8086_v59 = vld [vmem:[#allocation16_spill] sm:$0xff]  ;;  %v1442_v7 = vsel %vm1169_vm7, %v3985_v62, %v5657_v33 }
 0x242   : > { %1918 = vrot.lane.b32.xlu1 %v1915_v13, %s4035_s29  ;;  %v298_v13 = vld [vmem:[%s7811_s1 + $0xd8] sm:$0xff]  ;;  %2436 = vmatpush.msrb.mxu1 %v304_v4  ;;  %v8087_v50 = vld [vmem:[#allocation92_spill] sm:$0xff]  ;;  %v8090_v33 = vld [vmem:[#allocation55_spill] sm:$0xff] }
 0x243   : > { %1909 = vrot.lane.b32.xlu0 %v1906_v21, %s4034_s28  ;;  %v5753_v35 = vpop.permute.xlu2 %1428  ;;  %v303_v21 = vld [vmem:[%s7811_s1 + $0x100] sm:$0xff]  ;;  %2223 = vmatpush.msrb.mxu0 %v298_v13  ;;  %v8081_v13 = vld [vmem:[#allocation60_spill] sm:$0xff] }
 0x244   : > { %v5759_v18 = vpop.permute.xlu1 %1380  ;;  %2437 = vmatpush.msrb.mxu1 %v303_v21 }
 0x245   : > { %v5761_v12 = vpop.permute.xlu0 %1371  ;;  %2224 = vmatpush.msrb.mxu0 %v297_v36 }
 0x246   : > { %3750 = vmatmul.msk.f32.gmra.mxu2 %vm1462_vm5, %v5779_v31  ;;  %2438 = vmatpush.msrb.mxu1 %v302_v63  ;;  %v1953_v63 = vrot.slane %v5866_v47, 1 }
 0x247   : > { %3717 = vmatmul.msk.f32.gmra.mxu0 %vm1462_vm5, %v5719_v41 }
 0x248   : > { %3734 = vmatmul.msk.f32.gmra.mxu1 %vm1462_vm5, %v5605_v26  ;;  %2225 = vmatpush.msrb.mxu0 %v296_v11  ;;  %v307_v11 = vld [vmem:[%s7811_s1 + $0x120] sm:$0xff] }
 0x249   : > { %1940 = vrot.lane.b32.xlu2 %v1937_v58, %s4037_s4  ;;  %v5849_v58 = vsel %vm1322_vm15, %v1317_v28, %v5369_v8  ;;  %v310_v8 = vld [vmem:[%s7811_s1 + $0x138] sm:$0xff]  ;;  %2439 = vmatpush.msrb.mxu1 %v301_v20 }
 0x24a   : > { %1931 = vrot.lane.b32.xlu1 %v1928_v38, %s4036_s30  ;;  %v1939_v38 = vsel %vm8079_vm4, %v1936_v51, %v1938_v52  ;;  %v309_v51 = vld [vmem:[%s7811_s1 + $0x130] sm:$0xff]  ;;  %2649 = vmatpush.msrb.mxu2 %v310_v8  ;;  %v8088_v20 = vld [vmem:[#allocation41_spill] sm:$0xff]  ;;  %v1444_v8 = vsel %vm1186_vm8, %v1442_v7, %v5708_v17  ;;  %vm8097_vm4 = vmmov %vm8095_vm2 }
 0x24b   : > { %1929 = vrot.lane.b32.xlu0 %v1926_v23, %s4036_s30  ;;  %v5819_v3 = vpop.permute.xlu2 %1438  ;;  %v8080_v23 = vld [vmem:[#allocation52_spill] sm:$0xff]  ;;  %2226 = vmatpush.msrb.mxu0 %v295_v19  ;;  %v5933_v19 = vld [vmem:[%s4100_s24 + $0x168] sm:$0xff] }
 0x24c   : > { %v5826_v48 = vpop.permute.xlu1 %1393  ;;  %v1233_v4 = vsel %vm1220_vm9, %v1216_v39, %v8080_v23  ;;  %2650 = vmatpush.msrb.mxu2 %v309_v51  ;;  %v8084_v52 = vld [vmem:[#allocation12_spill] sm:$0xff]  ;;  %v8089_v39 = vld [vmem:[#allocation51_spill] sm:$0xff]  ;;  %v8091_v51 = vld [vmem:[#allocation73_spill] sm:$0xff] }
 0x24d   : > { %v5828_v6 = vpop.permute.xlu0 %1391  ;;  %v1250_v21 = vsel %vm1237_vm11, %v1233_v4, %v8081_v13  ;;  %v5930_v4 = vld [vmem:[%s4100_s24 + $0x160] sm:$0xff]  ;;  %v5938_v13 = vld [vmem:[%s4100_s24 + $0x170] sm:$0xff] }
 0x24e   : > { %3751 = vmatmul.msk.f32.gmra.mxu2 %vm1462_vm5, %v5849_v58  ;;  %v1267_v15 = vsel %vm1254_vm13, %v1250_v21, %v8082_v45  ;;  %v8092_v21 = vld [vmem:[#allocation79_spill] sm:$0xff]  ;;  %v1446_v45 = vsel %vm1203_vm10, %v1444_v8, %v5530_v2 }
 0x24f   : > { %3718 = vmatmul.msk.f32.gmra.mxu0 %vm1462_vm5, %v5779_v31  ;;  %v1284_v36 = vsel %vm1271_vm12, %v1267_v15, %v8083_v49  ;;  %2651 = vmatpush.msrb.mxu2 %v308_v43  ;;  %v2085_v15 = vrot.slane %v5938_v13, 1  ;;  %v1448_v43 = vsel %vm1220_vm9, %v1446_v45, %v5759_v18  ;;  %v2082_v49 = vrot.slane %v5930_v4, 1  ;;  %v3986_v18 = vld [vmem:[%s4100_s24 + $0x108] sm:$0xff] }
 0x250   : > { %3735 = vmatmul.msk.f32.gmra.mxu1 %vm1462_vm5, %v5672_v32  ;;  %v1301_v37 = vsel %vm1288_vm14, %v1284_v36, %v8085_v57  ;;  %v1961_v36 = vrot.slane %v5866_v47, 2  ;;  %v8094_v57 = vld [vmem:[#allocation100_spill] sm:$0xff] }
 0x251   : > { %1948 = vrot.lane.b32.xlu2 %v5563_v1, %s4038_s5  ;;  %v1318_v28 = vsel %vm1305_vm6, %v1301_v37, %v8087_v50  ;;  %2652 = vmatpush.msrb.mxu2 %v307_v11 }
 0x252   : > { %1946 = vrot.lane.b32.xlu1 %v5517_v25, %s4038_s5  ;;  %v1183_v25 = vsel %vm1169_vm7, %v3984_v22, %v8084_v52  ;;  %v5909_v55 = vsel %vm1322_vm15, %v1318_v28, %v5593_v14  ;;  %v1954_v14 = vsel %vm362_vm0, %v1872_v44, %v1953_v63  ;;  %v8093_v22 = vld [vmem:[#allocation83_spill] sm:$0xff]  ;;  %v1450_v52 = vsel %vm1237_vm11, %v1448_v43, %v5828_v6 }
 0x253   : > { %1942 = vrot.lane.b32.xlu0 %v1939_v38, %s4037_s4  ;;  %v5889_v29 = vpop.permute.xlu2 %1672  ;;  %v1200_v40 = vsel %vm1186_vm8, %v1183_v25, %v8086_v59  ;;  %v1443_v59 = vsel %vm1169_vm7, %v3986_v18, %v5478_v46  ;;  %v1452_v50 = vsel %vm1254_vm13, %v1450_v52, %v5651_v56  ;;  %v2104_v56 = vrot.slane %v5930_v4, 3 }
 0x254   : > { %v1414_v24 = vpop.permute.xlu1 %1413  ;;  %v1217_v54 = vsel %vm1203_vm10, %v1200_v40, %v8088_v20  ;;  %v1445_v40 = vsel %vm1186_vm8, %v1443_v59, %v5706_v27  ;;  %v2129_v52 = vrot.slane %v5938_v13, 5  ;;  %v2138_v18 = vrot.slane %v5933_v19, 6 }
 0x255   : > { %v5896_v5 = vpop.permute.xlu0 %1404  ;;  %v1234_v38 = vsel %vm1220_vm9, %v1217_v54, %v8089_v39  ;;  %v1447_v27 = vsel %vm1203_vm10, %v1445_v40, %v5761_v12  ;;  %v1454_v28 = vsel %vm1271_vm12, %v1452_v50, %v1414_v24  ;;  %v2096_v12 = vrot.slane %v5938_v13, 2 }
 0x256   : > { %3752 = vmatmul.msk.f32.gmra.mxu2 %vm1462_vm5, %v5909_v55  ;;  %v1251_v23 = vsel %vm1237_vm11, %v1234_v38, %v8090_v33  ;;  %v1449_v1 = vsel %vm1220_vm9, %v1447_v27, %v5582_v9  ;;  %v2093_v24 = vrot.slane %v5930_v4, 2  ;;  %v2105_v38 = vrot.slane %v5933_v19, 3 }
 0x257   : > { %3719 = vmatmul.msk.f32.gmra.mxu0 %vm1462_vm5, %v5849_v58  ;;  %v1268_v17 = vsel %vm1254_vm13, %v1251_v23, %v8091_v51  ;;  %v1451_v54 = vsel %vm1237_vm11, %v1449_v1, %v5826_v48  ;;  %v2118_v51 = vrot.slane %v5938_v13, 4  ;;  %v2149_v27 = vrot.slane %v5933_v19, 7 }
 0x258   : > { %3736 = vmatmul.msk.f32.gmra.mxu1 %vm1462_vm5, %v5719_v41  ;;  %v1285_v44 = vsel %vm1271_vm12, %v1268_v17, %v8092_v21  ;;  %v1453_v9 = vsel %vm1254_vm13, %v1451_v54, %v5896_v5  ;;  %v2106_v48 = vsel %vm8096_vm1, %v2104_v56, %v2105_v38  ;;  %v2115_v17 = vrot.slane %v5930_v4, 4 }
 0x259   : > { %1963 = vrot.lane.b32.xlu2 %v5614_v53, %s4040_s7  ;;  %v2083_v53 = vrot.slane %v5933_v19, 1  ;;  %v1302_v2 = vsel %vm1288_vm14, %v1285_v44, %v8093_v22  ;;  %v2116_v21 = vrot.slane %v5933_v19, 4  ;;  %v2107_v44 = vrot.slane %v5938_v13, 3 }
 0x25a   : > { %1957 = vrot.lane.b32.xlu1 %v1954_v14, %s4039_s6  ;;  %v1319_v37 = vsel %vm1305_vm6, %v1302_v2, %v8094_v57  ;;  %v1455_v14 = vsel %vm1271_vm12, %v1453_v9, %v5702_v61  ;;  %v2127_v2 = vrot.slane %v5933_v19, 5 }
 0x25b   : > { %1955 = vrot.lane.b32.xlu0 %v5626_v0, %s4039_s6  ;;  %v5955_v63 = vpop.permute.xlu2 %1685  ;;  %v5968_v47 = vsel %vm1322_vm15, %v1319_v37, %v5591_v42  ;;  %v5977_v6 = vsel %vm362_vm0, %v2083_v53, %v2085_v15  ;;  %v2084_v46 = vsel %vm362_vm0, %v2082_v49, %v2083_v53  ;;  %v1962_v42 = vsel %vm8095_vm2, %v1883_v34, %v1961_v36 }
 0x25c   : > { %v1422_v0 = vpop.permute.xlu1 %1421  ;;  %v2094_v34 = vrot.slane %v5933_v19, 2  ;;  %v2119_v53 = vsel %vm629_vm3, %v2116_v21, %v2118_v51  ;;  %v2117_v36 = vsel %vm629_vm3, %v2115_v17, %v2116_v21  ;;  %v2108_v22 = vsel %vm8096_vm1, %v2105_v38, %v2107_v44  ;;  %v246_v38 = vld [vmem:[%s4100_s24 + $0x178] sm:$0x3]  ;;  %v6164_v21 = vld [vmem:[%s4100_s24 + $0x188] sm:$0xff]  ;;  %v6167_v44 = vld [vmem:[%s4100_s24 + $0x190] sm:$0xff] }
 0x25d   : > { %v1420_v25 = vpop.permute.xlu0 %1419  ;;  %v1457_v33 = vsel %vm1288_vm14, %v1455_v14, %v1422_v0  ;;  %v2126_v0 = vrot.slane %v5930_v4, 5  ;;  %v2174_v9 = vrot.slane %v246_v38, 2  ;;  %v294_v14 = vld [vmem:[%s7811_s1 + $0xb8] sm:$0xf] }
 0x25e   : > { %3753 = vmatmul.msk.f32.gmra.mxu2 %vm1462_vm5, %v5968_v47  ;;  %v1456_v11 = vsel %vm1288_vm14, %v1454_v28, %v1420_v25  ;;  %v2095_v5 = vsel %vm8095_vm2, %v2093_v24, %v2094_v34  ;;  %vm8099_vm2 = vcmask 1042432   ;;  %v2140_v28 = vrot.slane %v5938_v13, 6 }
 0x25f   : > { %3720 = vmatmul.msk.f32.gmra.mxu0 %vm1462_vm5, %v5909_v55  ;;  %v1458_v62 = vsel %vm1305_vm6, %v1456_v11, %v5753_v35  ;;  %v6027_v35 = vsel %vm8097_vm4, %v2094_v34, %v2096_v12  ;;  %vm8098_vm4 = vcmask 1041408   ;;  %v2130_v40 = vsel %vm8099_vm2, %v2127_v2, %v2129_v52  ;;  %vm8100_vm1 = vmmov %vm8099_vm2 }
 0x260   : > { %3737 = vmatmul.msk.f32.gmra.mxu1 %vm1462_vm5, %v5779_v31  ;;  %v2128_v50 = vsel %vm8100_vm1, %v2126_v0, %v2127_v2  ;;  %vm8103_vm1 = vcmask 1041408  }
 0x261   : > { %2089 = vrot.lane.b32.xlu2 %v5977_v6, %s4031_s25  ;;  %v2141_v54 = vsel %vm8103_vm1, %v2138_v18, %v2140_v28  ;;  %vm8106_vm1 = vcmask 1044480  }
 0x262   : > { %2087 = vrot.lane.b32.xlu1 %v2084_v46, %s4031_s25  ;;  %v2151_v46 = vrot.slane %v5938_v13, 7 }
 0x263   : > { %1965 = vrot.lane.b32.xlu0 %v1962_v42, %s4040_s7  ;;  %v6003_v20 = vpop.permute.xlu2 %1705  ;;  %v2148_v42 = vrot.slane %v5930_v4, 7 }
 0x264   : > { %v1437_v7 = vpop.permute.xlu1 %1436 }
 0x265   : > { %v1431_v39 = vpop.permute.xlu0 %1430  ;;  %v6013_v8 = vsel %vm1322_vm15, %v1458_v62, %v1437_v7 }
 0x266   : > { %3724 = vmatmul.msk.f32.gmra.mxu3 %vm1462_vm5, %v6013_v8  ;;  %3754 = vmatmul.msk.f32.gmra.mxu2 %vm1462_vm5, %v5440_v60  ;;  %v1459_v23 = vsel %vm1305_vm6, %v1457_v33, %v1431_v39 }
 0x267   : > { %3721 = vmatmul.msk.f32.gmra.mxu0 %vm1462_vm5, %v5968_v47  ;;  %v6050_v49 = vsel %vm1322_vm15, %v1459_v23, %v5819_v3  ;;  %v2137_v3 = vrot.slane %v5930_v4, 6  ;;  %v293_v23 = vld [vmem:[%s7811_s1 + $0xb0] sm:$0xff] }
 0x268   : > { %3738 = vmatmul.msk.f32.gmra.mxu1 %vm1462_vm5, %v5849_v58 }
 0x269   : > { %2109 = vrot.lane.b32.xlu2 %v2106_v48, %s4033_s27  ;;  %v2139_v59 = vsel %vm8098_vm4, %v2137_v3, %v2138_v18  ;;  %vm8101_vm4 = vcmask 1040384   ;;  %v2166_v48 = vrot.slane %v246_v38, 1  ;;  %v290_v18 = vld [vmem:[%s7811_s1 + $0x98] sm:$0xff]  ;;  %v2318_v38 = vrot.slane %v6164_v21, 3 }
 0x26a   : > { %2100 = vrot.lane.b32.xlu1 %v6027_v35, %s4032_s26  ;;  %v2152_v34 = vsel %vm8101_vm4, %v2149_v27, %v2151_v46  ;;  %vm8102_vm2 = vmmov %vm8101_vm4  ;;  %vm8104_vm4 = vcmask 1045504  }
 0x26b   : > { %2098 = vrot.lane.b32.xlu0 %v2095_v5, %s4032_s26  ;;  %v6042_v61 = vpop.permute.xlu2 %1718  ;;  %v2150_v24 = vsel %vm8102_vm2, %v2148_v42, %v2149_v27  ;;  %v2175_v51 = vsel %vm8104_vm4, %v2096_v12, %v2174_v9  ;;  %v2167_v17 = vsel %vm362_vm0, %v2085_v15, %v2166_v48  ;;  %v292_v12 = vld [vmem:[%s7811_s1 + $0xa8] sm:$0xff]  ;;  %vm8105_vm2 = vmmov %vm8104_vm4  ;;  %v289_v42 = vld [vmem:[%s7811_s1 + $0x90] sm:$0xff] }
 0x26c   : > { %v6044_v45 = vpop.permute.xlu1 %1663  ;;  %vm8107_vm4 = vmmov %vm8106_vm1 }
 0x26d   : > { %v6046_v43 = vpop.permute.xlu0 %1661 }
 0x26e   : > { %3725 = vmatmul.msk.f32.gmra.mxu3 %vm1462_vm5, %v6050_v49  ;;  %3755 = vmatmul.msk.f32.gmra.mxu2 %vm1462_vm5, %v5666_v16 }
 0x26f   : > { %3778 = vmatmul.msk.f32.vlgmr.msrb.gmra.mxu0 %vm1462_vm5, %v5672_v32 }
 0x270   : > { %3795 = vmatmul.msk.f32.vlgmr.msrb.gmra.mxu1 %vm1462_vm5, %v5779_v31 }
 0x271   : > { %2122 = vrot.lane.b32.xlu2 %v2119_v53, %s4034_s28  ;;  %v6170_v53 = vld [vmem:[%s4100_s24 + $0x180] sm:$0xff] }
 0x272   : > { %2120 = vrot.lane.b32.xlu1 %v2117_v36, %s4034_s28  ;;  %v2306_v15 = vrot.slane %v6170_v53, 2  ;;  %v2296_v36 = vrot.slane %v6164_v21, 1  ;;  %v2295_v3 = vrot.slane %v6170_v53, 1 }
 0x273   : > { %2111 = vrot.lane.b32.xlu0 %v2108_v22, %s4033_s27  ;;  %v6070_v25 = vpop.permute.xlu2 %1733  ;;  %v2298_v22 = vrot.slane %v6167_v44, 1 }
 0x274   : > { %v6072_v57 = vpop.permute.xlu1 %1683 }
 0x275   : > { %v6074_v37 = vpop.permute.xlu0 %1674  ;;  %v6209_v46 = vsel %vm362_vm0, %v2296_v36, %v2298_v22 }
 0x276   : > { %3739 = vmatmul.msk.f32.vlgmr.msrb.gmra.mxu3 %vm1462_vm5, %v5909_v55  ;;  %3812 = vmatmul.msk.f32.vlgmr.msrb.gmra.mxu2 %vm1462_vm5, %v5909_v55 }
 0x277   : > { %3779 = vmatmul.msk.f32.gmra.mxu0 %vm1462_vm5, %v5719_v41  ;;  %3760 = vmatpush.msk.msrb.mxu3 %vm629_vm3, %v294_v14 }
 0x278   : > { %3796 = vmatmul.msk.f32.gmra.mxu1 %vm1462_vm5, %v5849_v58 }
 0x279   : > { %2142 = vrot.lane.b32.xlu2 %v2139_v59, %s4036_s30  ;;  %2009 = vmatpush.msrb.mxu3 %v293_v23  ;;  %v3987_v59 = vld [vmem:[%s4100_s24 + $0x120] sm:$0xff] }
 0x27a   : > { %2133 = vrot.lane.b32.xlu1 %v2130_v40, %s4035_s29  ;;  %v1756_v40 = vsel %vm1169_vm7, %v3987_v59, %v6046_v43  ;;  %v2297_v43 = vsel %vm362_vm0, %v2295_v3, %v2296_v36  ;;  %v2329_v3 = vrot.slane %v6164_v21, 4 }
 0x27b   : > { %2131 = vrot.lane.b32.xlu0 %v2128_v50, %s4035_s29  ;;  %v6095_v11 = vpop.permute.xlu2 %1744  ;;  %2010 = vmatpush.msrb.mxu3 %v292_v12  ;;  %v1758_v27 = vsel %vm1186_vm8, %v1756_v40, %v5889_v29  ;;  %v2309_v29 = vrot.slane %v6167_v44, 2  ;;  %v2340_v40 = vrot.slane %v6164_v21, 5 }
 0x27c   : > { %v6097_v56 = vpop.permute.xlu1 %1696  ;;  %v1760_v28 = vsel %vm1203_vm10, %v1758_v27, %v6072_v57  ;;  %v3988_v57 = vld [vmem:[%s4100_s24 + $0x128] sm:$0xff]  ;;  %v6294_v27 = vpop.f32.mrf.mxu0 }
 0x27d   : > { %v6099_v1 = vpop.permute.xlu0 %1694  ;;  %v1757_v14 = vsel %vm1169_vm7, %v3988_v57, %v6044_v45  ;;  %v2362_v57 = vrot.slane %v6164_v21, 7 }
 0x27e   : > { %3740 = vmatmul.msk.f32.gmra.mxu3 %vm1462_vm5, %v5968_v47  ;;  %3813 = vmatmul.msk.f32.gmra.mxu2 %vm1462_vm5, %v5968_v47 }
 0x27f   : > { %3780 = vmatmul.msk.f32.gmra.mxu0 %vm1462_vm5, %v5779_v31 }
 0x280   : > { %3797 = vmatmul.msk.f32.gmra.mxu1 %vm1462_vm5, %v5909_v55 }
 0x281   : > { %2155 = vrot.lane.b32.xlu2 %v2152_v34, %s4037_s4  ;;  %v2320_v34 = vrot.slane %v6167_v44, 3 }
 0x282   : > { %2153 = vrot.lane.b32.xlu1 %v2150_v24, %s4037_s4  ;;  %v1762_v24 = vsel %vm1220_vm9, %v1760_v28, %v6099_v1 }
 0x283   : > { %2144 = vrot.lane.b32.xlu0 %v2141_v54, %s4036_s30  ;;  %v6115_v62 = vpop.permute.xlu2 %1874  ;;  %v2317_v54 = vrot.slane %v6170_v53, 3  ;;  %v1764_v1 = vsel %vm1237_vm11, %v1762_v24, %v6003_v20  ;;  %v2350_v24 = vrot.slane %v6170_v53, 6 }
 0x284   : > { %v6117_v7 = vpop.permute.xlu1 %1716 }
 0x285   : > { %v6119_v39 = vpop.permute.xlu0 %1707  ;;  %v1766_v12 = vsel %vm1254_vm13, %v1764_v1, %v6117_v7  ;;  %v2319_v45 = vsel %vm8107_vm4, %v2317_v54, %v2318_v38  ;;  %v2351_v54 = vrot.slane %v6164_v21, 6  ;;  %vm8109_vm4 = vcmask 1040384  }
 0x286   : > { %3741 = vmatmul.msk.f32.gmra.mxu3 %vm1462_vm5, %v5440_v60  ;;  %3814 = vmatmul.msk.f32.gmra.mxu2 %vm1462_vm5, %v5440_v60 }
 0x287   : > { %3781 = vmatmul.msk.f32.gmra.mxu0 %vm1462_vm5, %v5849_v58 }
 0x288   : > { %3798 = vmatmul.msk.f32.gmra.mxu1 %vm1462_vm5, %v5968_v47 }
 0x289   : > { %2168 = vrot.lane.b32.xlu2 %v5977_v6, %s4039_s6 }
 0x28a   : > { %2161 = vrot.lane.b32.xlu1 %v5938_v13, %s4038_s5  ;;  %v291_v13 = vld [vmem:[%s7811_s1 + $0xa0] sm:$0xff] }
 0x28b   : > { %2159 = vrot.lane.b32.xlu0 %v5933_v19, %s4038_s5  ;;  %v6136_v5 = vpop.permute.xlu2 %1887  ;;  %2011 = vmatpush.msrb.mxu3 %v291_v13 }
 0x28c   : > { %v6141_v33 = vpop.permute.xlu1 %1729  ;;  %v6317_v1 = vpop.f32.mrf.mxu1 }
 0x28d   : > { %v6143_v6 = vpop.permute.xlu0 %1727  ;;  %2012 = vmatpush.msrb.mxu3 %v290_v18 }
 0x28e   : > { %3742 = vmatmul.msk.f32.gmra.mxu3 %vm1462_vm5, %v5666_v16  ;;  %3815 = vmatmul.msk.f32.gmra.mxu2 %vm1462_vm5, %v5666_v16 }
 0x28f   : > { %3782 = vmatmul.msk.f32.gmra.mxu0 %vm1462_vm5, %v5909_v55  ;;  %2013 = vmatpush.msrb.mxu3 %v289_v42 }
 0x290   : > { %3799 = vmatmul.msk.f32.gmra.mxu1 %vm1462_vm5, %v5440_v60 }
 0x291   : > { %2178 = vrot.lane.b32.xlu2 %v2175_v51, %s4040_s7  ;;  %v1759_v51 = vsel %vm1186_vm8, %v1757_v14, %v6074_v37  ;;  %v1768_v37 = vsel %vm1271_vm12, %v1766_v12, %v6143_v6  ;;  %v2331_v6 = vrot.slane %v6167_v44, 4 }
 0x292   : > { %2176 = vrot.lane.b32.xlu1 %v6027_v35, %s4040_s7  ;;  %v2307_v35 = vrot.slane %v6164_v21, 2  ;;  %v1761_v13 = vsel %vm1203_vm10, %v1759_v51, %v5955_v63  ;;  %v1770_v36 = vsel %vm1288_vm14, %v1768_v37, %v6070_v25  ;;  %v2328_v63 = vrot.slane %v6170_v53, 4 }
 0x293   : > { %2170 = vrot.lane.b32.xlu0 %v2167_v17, %s4039_s6  ;;  %v6189_v0 = vpop.permute.xlu2 %1907  ;;  %v2321_v17 = vsel %vm8106_vm1, %v2318_v38, %v2320_v34  ;;  %v1763_v7 = vsel %vm1220_vm9, %v1761_v13, %v6097_v56  ;;  %vm8108_vm1 = vcmask 1042432   ;;  %v2342_v38 = vrot.slane %v6167_v44, 5 }
 0x294   : > { %v1743_v2 = vpop.permute.xlu1 %1742  ;;  %v2308_v50 = vsel %vm8105_vm2, %v2306_v15, %v2307_v35  ;;  %v2310_v20 = vsel %vm8105_vm2, %v2307_v35, %v2309_v29  ;;  %v2339_v15 = vrot.slane %v6170_v53, 5  ;;  %v1765_v35 = vsel %vm1237_vm11, %v1763_v7, %v6119_v39  ;;  %v6330_v12 = vpop.f32.mrf.mxu0 }
 0x295   : > { %v6186_v52 = vpop.permute.xlu0 %1735  ;;  %v1772_v56 = vsel %vm1305_vm6, %v1770_v36, %v1743_v2  ;;  %v1767_v2 = vsel %vm1254_vm13, %v1765_v35, %v6042_v61  ;;  %v2330_v42 = vsel %vm629_vm3, %v2328_v63, %v2329_v3  ;;  %v2361_v61 = vrot.slane %v6170_v53, 7 }
 0x296   : > { %3756 = vmatmul.msk.f32.vlgmr.msra.gmra.mxu3 %vm1462_vm5, %v6013_v8  ;;  %3816 = vmatmul.msk.f32.gmra.mxu2 %vm1462_vm5, %v6013_v8  ;;  %v2341_v39 = vsel %vm8108_vm1, %v2339_v15, %v2340_v40  ;;  %v1769_v28 = vsel %vm1271_vm12, %v1767_v2, %v6141_v33  ;;  %vm8110_vm2 = vcmask 1041408   ;;  %v6345_v15 = vpop.f32.mrf.mxu1  ;;  %v250_v2 = vld [vmem:[%s4100_s24 + $0x198] sm:$0x3] }
 0x297   : > { %3783 = vmatmul.msk.f32.gmra.mxu0 %vm1462_vm5, %v5968_v47  ;;  %v1771_v34 = vsel %vm1288_vm14, %v1769_v28, %v6186_v52 }
 0x298   : > { %3800 = vmatmul.msk.f32.gmra.mxu1 %vm1462_vm5, %v5666_v16  ;;  %v1773_v33 = vsel %vm1305_vm6, %v1771_v34, %v6095_v11  ;;  %v2363_v11 = vsel %vm8109_vm4, %v2361_v61, %v2362_v57 }
 0x299   : > { %2311 = vrot.lane.b32.xlu2 %v2308_v50, %s4032_s26 }
 0x29a   : > { %2302 = vrot.lane.b32.xlu1 %v6209_v46, %s4031_s25 }
 0x29b   : > { %2300 = vrot.lane.b32.xlu0 %v2297_v43, %s4031_s25  ;;  %v6232_v23 = vpop.permute.xlu2 %1920  ;;  %v2332_v43 = vsel %vm629_vm3, %v2329_v3, %v2331_v6  ;;  %v2353_v3 = vrot.slane %v6167_v44, 6 }
 0x29c   : > { %v1753_v9 = vpop.permute.xlu1 %1752  ;;  %v6348_v36 = vpop.f32.mrf.mxu0 }
 0x29d   : > { %v1751_v48 = vpop.permute.xlu0 %1750  ;;  %v6313_v14 = vsel %vm1322_vm15, %v1773_v33, %v1753_v9  ;;  %v2352_v9 = vsel %vm8110_vm2, %v2350_v24, %v2351_v54  ;;  %8111 = vst [vmem:[#allocation17_spill] sm:$0xff] %v6348_v36  ;;  %v2379_v24 = vrot.slane %v250_v2, 1 }
 0x29e   : > { %3757 = vmatmul.msk.f32.gmra.mxu3 %vm1462_vm5, %v6050_v49  ;;  %3817 = vmatmul.msk.f32.gmra.mxu2 %vm1462_vm5, %v6050_v49  ;;  %v6277_v50 = vsel %vm1322_vm15, %v1772_v56, %v1751_v48 }
 0x29f   : > { %3784 = vmatmul.msk.f32.gmra.mxu0 %vm1462_vm5, %v5440_v60 }
 0x2a0   : > { %3801 = vmatmul.msk.f32.gmra.mxu1 %vm1462_vm5, %v6013_v8 }
 0x2a1   : > { %2324 = vrot.lane.b32.xlu2 %v2321_v17, %s4033_s27  ;;  %v2343_v17 = vsel %vm8108_vm1, %v2340_v40, %v2342_v38  ;;  %v6369_v40 = vld [vmem:[%s4100_s24 + $0x1a0] sm:$0xff]  ;;  %vm8114_vm1 = vcmask 1045504  }
 0x2a2   : > { %2322 = vrot.lane.b32.xlu1 %v2319_v45, %s4033_s27  ;;  %v6335_v45 = vpop.f32.mrf.mxu2  ;;  %v2508_v34 = vrot.slane %v6369_v40, 1 }
 0x2a3   : > { %2313 = vrot.lane.b32.xlu0 %v2310_v20, %s4032_s26  ;;  %v6279_v25 = vpop.permute.xlu2 %1940 }
 0x2a4   : > { %v6271_v18 = vpop.permute.xlu1 %1885 }
 0x2a5   : > { %v6273_v59 = vpop.permute.xlu0 %1876 }
 0x2a6   : > { %3758 = vmatmul.msk.f32.gmra.mxu3 %vm1462_vm5, %v6277_v50  ;;  %3818 = vmatmul.msk.f32.gmra.mxu2 %vm1462_vm5, %v6277_v50 }
 0x2a7   : > { %3785 = vmatmul.msk.f32.gmra.mxu0 %vm1462_vm5, %v5666_v16 }
 0x2a8   : > { %3802 = vmatmul.msk.f32.gmra.mxu1 %vm1462_vm5, %v6050_v49 }
 0x2a9   : > { %2344 = vrot.lane.b32.xlu2 %v2341_v39, %s4035_s29  ;;  %v6372_v39 = vld [vmem:[%s4100_s24 + $0x1a8] sm:$0xff] }
 0x2aa   : > { %2335 = vrot.lane.b32.xlu1 %v2332_v43, %s4034_s28  ;;  %v6360_v56 = vpop.f32.mrf.mxu2  ;;  %v6377_v43 = vpop.f32.mrf.mxu1  ;;  %v2509_v61 = vrot.slane %v6372_v39, 1 }
 0x2ab   : > { %2333 = vrot.lane.b32.xlu0 %v2330_v42, %s4034_s28  ;;  %v6315_v51 = vpop.permute.xlu2 %1948  ;;  %8112 = vst [vmem:[#allocation5_spill] sm:$0xff] %v6377_v43  ;;  %v2387_v42 = vrot.slane %v250_v2, 2 }
 0x2ac   : > { %v6309_v48 = vpop.permute.xlu1 %1898 }
 0x2ad   : > { %v1897_v52 = vpop.permute.xlu0 %1896 }
 0x2ae   : > { %3759 = vmatmul.msk.f32.gmra.mxu3 %vm1462_vm5, %v6313_v14  ;;  %3819 = vmatmul.msk.f32.gmra.mxu2 %vm1462_vm5, %v6313_v14 }
 0x2af   : > { %3786 = vmatmul.msk.f32.gmra.mxu0 %vm1462_vm5, %v6013_v8 }
 0x2b0   : > { %3803 = vmatmul.msk.f32.gmra.mxu1 %vm1462_vm5, %v6277_v50 }
 0x2b1   : > { %2366 = vrot.lane.b32.xlu2 %v2363_v11, %s4037_s4 }
 0x2b2   : > { %2355 = vrot.lane.b32.xlu1 %v2352_v9, %s4036_s30  ;;  %v2510_v9 = vsel %vm362_vm0, %v2508_v34, %v2509_v61 }
 0x2b3   : > { %2346 = vrot.lane.b32.xlu0 %v2343_v17, %s4035_s29  ;;  %v6337_v7 = vpop.permute.xlu2 %1963  ;;  %v6411_v17 = vpop.f32.mrf.mxu2 }
 0x2b4   : > { %v1919_v37 = vpop.permute.xlu1 %1918  ;;  %8115 = vst [vmem:[#allocation20_spill] sm:$0xff] %v6411_v17 }
 0x2b5   : > { %v1910_v13 = vpop.permute.xlu0 %1909 }
 0x2b6   : > { %3761 = vmatmul.msk.f32.vlgmr.msrb.gmra.mxu3 %vm1462_vm5, %v5547_v30  ;;  %v2364_v30 = vrot.slane %v6167_v44, 7 }
 0x2b7   : > { %3787 = vmatmul.msk.f32.gmra.mxu0 %vm1462_vm5, %v6050_v49 }
 0x2b8   : > { %3804 = vmatmul.msk.f32.gmra.mxu1 %vm1462_vm5, %v6313_v14 }
 0x2b9   : > { %2389 = vrot.lane.b32.xlu2 %v2310_v20, %s4040_s7  ;;  %v2354_v20 = vsel %vm8110_vm2, %v2351_v54, %v2353_v3  ;;  %v6388_v54 = vpop.f32.mrf.mxu0  ;;  %v2531_v3 = vrot.slane %v6372_v39, 3  ;;  %vm8119_vm2 = vmmov %vm8114_vm1 }
 0x2ba   : > { %2381 = vrot.lane.b32.xlu1 %v6209_v46, %s4039_s6  ;;  %v2365_v46 = vsel %vm8109_vm4, %v2362_v57, %v2364_v30  ;;  %8113 = vst [vmem:[#allocation8_spill] sm:$0xff] %v6388_v54  ;;  %vm8118_vm4 = vcmask 1044480   ;;  %v328_v54 = vld [vmem:[%s7811_s1 + $0x1c8] sm:$0xff] }
 0x2bb   : > { %2372 = vrot.lane.b32.xlu0 %v6164_v21, %s4038_s5  ;;  %v6358_v35 = vpop.permute.xlu2 %2089 }
 0x2bc   : > { %v6356_v6 = vpop.permute.xlu1 %1931 }
 0x2bd   : > { %v1930_v63 = vpop.permute.xlu0 %1929 }
 0x2be   : > { %3762 = vmatmul.msk.f32.gmra.mxu3 %vm1462_vm5, %v5605_v26  ;;  %v1969_v26 = vsel %vm1169_vm7, %v5514_v10, %v6115_v62  ;;  %v3989_v62 = vld [vmem:[%s4100_s24 + $0x148] sm:$0xff] }
 0x2bf   : > { %3788 = vmatmul.msk.f32.gmra.mxu0 %vm1462_vm5, %v6277_v50  ;;  %v1971_v28 = vsel %vm1186_vm8, %v1969_v26, %v6271_v18  ;;  %v1970_v11 = vsel %vm1169_vm7, %v3989_v62, %v6273_v59  ;;  %v2388_v18 = vsel %vm8114_vm1, %v2309_v29, %v2387_v42  ;;  %v2380_v59 = vsel %vm362_vm0, %v2298_v22, %v2379_v24 }
 0x2c0   : > { %v1973_v38 = vsel %vm1203_vm10, %v1971_v28, %v1897_v52  ;;  %v1972_v30 = vsel %vm1186_vm8, %v1970_v11, %v6136_v5  ;;  %v2542_v22 = vrot.slane %v6372_v39, 4  ;;  %v2519_v5 = vrot.slane %v6369_v40, 2 }
 0x2c1   : > { %2374 = vrot.lane.b32.xlu2 %v6167_v44, %s4038_s5  ;;  %v1975_v52 = vsel %vm1220_vm9, %v1973_v38, %v6189_v0  ;;  %v1974_v0 = vsel %vm1203_vm10, %v1972_v30, %v6309_v48  ;;  %v2541_v44 = vrot.slane %v6369_v40, 4  ;;  %v6436_v34 = vpop.f32.mrf.mxu0  ;;  %v7841_v11 = vrot.slane %v6372_v39, 7 }
 0x2c2   : > { %2368 = vrot.lane.b32.xlu1 %v2365_v46, %s4037_s4  ;;  %v6428_v46 = vpop.f32.mrf.mxu1  ;;  %v1976_v48 = vsel %vm1220_vm9, %v1974_v0, %v1910_v13  ;;  %8117 = vst [vmem:[#allocation30_spill] sm:$0xff] %v6436_v34  ;;  %vm8122_vm1 = vcmask 1040384  }
 0x2c3   : > { %2357 = vrot.lane.b32.xlu0 %v2354_v20, %s4036_s30  ;;  %v6391_v10 = vpop.permute.xlu2 %2109  ;;  %8116 = vst [vmem:[#allocation28_spill] sm:$0xff] %v6428_v46  ;;  %v2543_v13 = vsel %vm629_vm3, %v2541_v44, %v2542_v22  ;;  %v329_v46 = vld [vmem:[%s7811_s1 + $0x1d0] sm:$0xff] }
 0x2c4   : > { %v1947_v33 = vpop.permute.xlu1 %1946 }
 0x2c5   : > { %v1943_v57 = vpop.permute.xlu0 %1942 }
 0x2c6   : > { %3763 = vmatmul.msk.f32.gmra.mxu3 %vm1462_vm5, %v5672_v32  ;;  %v1977_v32 = vsel %vm1237_vm11, %v1975_v52, %v1919_v37  ;;  %v2530_v37 = vrot.slane %v6369_v40, 3  ;;  %v2564_v52 = vrot.slane %v6372_v39, 6 }
 0x2c7   : > { %3789 = vmatmul.msk.f32.gmra.mxu0 %vm1462_vm5, %v6313_v14  ;;  %v1979_v29 = vsel %vm1254_vm13, %v1977_v32, %v1930_v63  ;;  %v2520_v63 = vrot.slane %v6372_v39, 2 }
 0x2c8   : > { %v1981_v20 = vsel %vm1271_vm12, %v1979_v29, %v6279_v25  ;;  %v1978_v25 = vsel %vm1237_vm11, %v1976_v48, %v6232_v23 }
 0x2c9   : > { %2391 = vrot.lane.b32.xlu2 %v2388_v18, %s4040_s7  ;;  %v1983_v26 = vsel %vm1288_vm14, %v1981_v20, %v1947_v33  ;;  %v2532_v33 = vsel %vm8118_vm4, %v2530_v37, %v2531_v3  ;;  %v2521_v62 = vsel %vm8119_vm2, %v2519_v5, %v2520_v63  ;;  %v2563_v18 = vrot.slane %v6369_v40, 6  ;;  %v6495_v20 = vpop.f32.mrf.mxu0 }
 0x2ca   : > { %2513 = vrot.lane.b32.xlu1 %v2510_v9, %s4031_s25  ;;  %v2553_v9 = vrot.slane %v6372_v39, 5  ;;  %v6483_v44 = vpop.f32.mrf.mxu1  ;;  %vm8123_vm4 = vcmask 1041408   ;;  %vm8124_vm2 = vcmask 1042432   ;;  %8125 = vst [vmem:[#allocation43_spill] sm:$0xff] %v6495_v20 }
 0x2cb   : > { %2383 = vrot.lane.b32.xlu0 %v2380_v59, %s4039_s6  ;;  %v6434_v28 = vpop.permute.xlu2 %2122  ;;  %8121 = vst [vmem:[#allocation40_spill] sm:$0xff] %v6483_v44 }
 0x2cc   : > { %v1958_v2 = vpop.permute.xlu1 %1957 }
 0x2cd   : > { %v1956_v42 = vpop.permute.xlu0 %1955 }
 0x2ce   : > { %v1985_v24 = vsel %vm1305_vm6, %v1983_v26, %v1956_v42  ;;  %3764 = vmatmul.msk.f32.gmra.mxu3 %vm1462_vm5, %v5719_v41  ;;  %v1980_v41 = vsel %vm1254_vm13, %v1978_v25, %v6356_v6  ;;  %v2574_v6 = vrot.slane %v6369_v40, 7  ;;  %v6504_v26 = vpop.f32.mrf.mxu3 }
 0x2cf   : > { %v6448_v38 = vsel %vm1322_vm15, %v1985_v24, %v6337_v7  ;;  %v1982_v23 = vsel %vm1271_vm12, %v1980_v41, %v1943_v57  ;;  %v6466_v7 = vpop.f32.mrf.mxu2  ;;  %v2552_v57 = vrot.slane %v6369_v40, 5 }
 0x2d0   : > { %3790 = vmatmul.msk.f32.gmra.mxu0 %vm1462_vm5, %v6448_v38  ;;  %3805 = vmatmul.msk.f32.gmra.mxu1 %vm1462_vm5, %v6448_v38  ;;  %8120 = vst [vmem:[#allocation33_spill] sm:$0xff] %v6466_v7  ;;  %v1984_v59 = vsel %vm1288_vm14, %v1982_v23, %v6315_v51  ;;  %v2576_v5 = vsel %vm8122_vm1, %v2574_v6, %v7841_v11  ;;  %vm8130_vm1 = vcmask 1044480   ;;  %v323_v11 = vld [vmem:[%s7811_s1 + $0x1a0] sm:$0xff] }
 0x2d1   : > { %3820 = vmatmul.msk.f32.gmra.mxu2 %vm1462_vm5, %v6448_v38  ;;  %2546 = vrot.lane.b32.xlu2 %v2543_v13, %s4034_s28  ;;  %v1986_v30 = vsel %vm1305_vm6, %v1984_v59, %v1958_v2  ;;  %v2565_v51 = vsel %vm8123_vm4, %v2563_v18, %v2564_v52  ;;  %v2554_v48 = vsel %vm8124_vm2, %v2552_v57, %v2553_v9  ;;  %v6502_v2 = vld [vmem:[%s4100_s24 + $0x1b0] sm:$0xff]  ;;  %v6532_v23 = vpop.f32.mrf.mxu0  ;;  %vm8131_vm4 = vcmask 1045504  }
 0x2d2   : > { %2535 = vrot.lane.b32.xlu1 %v2532_v33, %s4033_s27  ;;  %8128 = vst [vmem:[#allocation2_spill] sm:$0xff] %v6532_v23  ;;  %v7840_v6 = vrot.slane %v6502_v2, 2  ;;  %vm8134_vm2 = vcmask 1041408   ;;  %v8139_v23 = vrot.slane %v6372_v39, 7 }
 0x2d3   : > { %2524 = vrot.lane.b32.xlu0 %v2521_v62, %s4032_s26  ;;  %v6481_v0 = vpop.permute.xlu2 %2142  ;;  %v6527_v62 = vpop.f32.mrf.mxu1 }
 0x2d4   : > { %v6478_v32 = vpop.permute.xlu1 %2087  ;;  %8127 = vst [vmem:[#allocation45_spill] sm:$0xff] %v6527_v62 }
 0x2d5   : > { %v1966_v29 = vpop.permute.xlu0 %1965 }
 0x2d6   : > { %v6486_v37 = vsel %vm1322_vm15, %v1986_v30, %v1966_v29  ;;  %3765 = vmatmul.msk.f32.gmra.mxu3 %vm1462_vm5, %v5779_v31  ;;  %v7842_v31 = vrot.slane %v6502_v2, 1  ;;  %v6529_v41 = vpop.f32.mrf.mxu3  ;;  %v2523_v29 = vsel %vm8131_vm4, %v2520_v63, %v7840_v6  ;;  %vm8140_vm4 = vcmask 1040384  }
 0x2d7   : > { %v6512_v42 = vpop.f32.mrf.mxu2 }
 0x2d8   : > { %3791 = vmatmul.msk.f32.gmra.mxu0 %vm1462_vm5, %v6486_v37  ;;  %3806 = vmatmul.msk.f32.gmra.mxu1 %vm1462_vm5, %v6486_v37  ;;  %8126 = vst [vmem:[#allocation44_spill] sm:$0xff] %v6512_v42  ;;  %v2512_v33 = vsel %vm362_vm0, %v2509_v61, %v7842_v31 }
 0x2d9   : > { %3821 = vmatmul.msk.f32.gmra.mxu2 %vm1462_vm5, %v6486_v37  ;;  %2579 = vrot.lane.b32.xlu2 %v2576_v5, %s4037_s4 }
 0x2da   : > { %2568 = vrot.lane.b32.xlu1 %v2565_v51, %s4036_s30 }
 0x2db   : > { %2557 = vrot.lane.b32.xlu0 %v2554_v48, %s4035_s29  ;;  %v6518_v25 = vpop.permute.xlu2 %2155  ;;  %v6560_v51 = vpop.f32.mrf.mxu1  ;;  %v2544_v48 = vrot.slane %v6502_v2, 4 }
 0x2dc   : > { %v6514_v24 = vpop.permute.xlu1 %2100  ;;  %8132 = vst [vmem:[#allocation32_spill] sm:$0xff] %v6560_v51 }
 0x2dd   : > { %v6516_v13 = vpop.permute.xlu0 %2098 }
 0x2de   : > { %3766 = vmatmul.msk.f32.gmra.mxu3 %vm1462_vm5, %v5849_v58  ;;  %v2533_v58 = vrot.slane %v6502_v2, 3 }
 0x2df   : > { %v6545_v59 = vpop.f32.mrf.mxu2 }
 0x2e0   : > { %8129 = vst [vmem:[#allocation19_spill] sm:$0xff] %v6545_v59  ;;  %v2534_v30 = vsel %vm8130_vm1, %v2531_v3, %v2533_v58  ;;  %v2555_v3 = vrot.slane %v6502_v2, 5  ;;  %v324_v58 = vld [vmem:[%s7811_s1 + $0x1a8] sm:$0xf]  ;;  %vm8135_vm1 = vcmask 1042432  }
 0x2e1   : > { %2594 = vrot.lane.b32.xlu2 %v2512_v33, %s4039_s6  ;;  %3845 = vmatpush.msk.msra.mxu0 %vm629_vm3, %v324_v58  ;;  %v322_v58 = vld [vmem:[%s7811_s1 + $0x198] sm:$0xff] }
 0x2e2   : > { %2515 = vrot.lane.b32.xlu1 %v2512_v33, %s4031_s25  ;;  %v6567_v33 = vpop.f32.mrf.mxu0  ;;  %v2556_v31 = vsel %vm8135_vm1, %v2553_v9, %v2555_v3  ;;  %v2577_v9 = vrot.slane %v6502_v2, 7 }
 0x2e3   : > { %2585 = vrot.lane.b32.xlu0 %v6372_v39, %s4038_s5  ;;  %v6543_v57 = vpop.permute.xlu2 %2168  ;;  %8133 = vst [vmem:[#allocation36_spill] sm:$0xff] %v6567_v33  ;;  %v2545_v33 = vsel %vm629_vm3, %v2542_v22, %v2544_v48  ;;  %3074 = vmatpush.msra.mxu0 %v323_v11  ;;  %v321_v22 = vld [vmem:[%s7811_s1 + $0x190] sm:$0xff]  ;;  %v320_v48 = vld [vmem:[%s7811_s1 + $0x188] sm:$0xff] }
 0x2e4   : > { %v6539_v18 = vpop.permute.xlu1 %2120  ;;  %v2578_v59 = vsel %vm8140_vm4, %v8139_v23, %v2577_v9  ;;  %vm8145_vm4 = vcmask 1042432  }
 0x2e5   : > { %v6541_v61 = vpop.permute.xlu0 %2111  ;;  %3075 = vmatpush.msra.mxu0 %v322_v58  ;;  %v2182_v58 = vsel %vm1169_vm7, %v5930_v4, %v6478_v32  ;;  %v6628_v4 = vld [vmem:[%s4100_s24 + $0x1c0] sm:$0xff]  ;;  %v6631_v32 = vld [vmem:[%s4100_s24 + $0x1c8] sm:$0xff] }
 0x2e6   : > { %3767 = vmatmul.msk.f32.gmra.mxu3 %vm1462_vm5, %v5909_v55  ;;  %v2566_v55 = vrot.slane %v6502_v2, 6  ;;  %v7843_v23 = vrot.slane %v6631_v32, 2  ;;  %v2721_v9 = vrot.slane %v6628_v4, 1 }
 0x2e7   : > { %v6590_v51 = vpop.f32.mrf.mxu2  ;;  %3076 = vmatpush.msra.mxu0 %v321_v22  ;;  %v8138_v22 = vrot.slane %v6502_v2, 1 }
 0x2e8   : > { %8136 = vst [vmem:[#allocation66_spill] sm:$0xff] %v6590_v51  ;;  %v319_v51 = vld [vmem:[%s7811_s1 + $0x180] sm:$0xff] }
 0x2e9   : > { %v6557_v5 = vpop.f32.mrf.mxu3  ;;  %2537 = vrot.lane.b32.xlu2 %v2534_v30, %s4033_s27  ;;  %3077 = vmatpush.msra.mxu0 %v320_v48  ;;  %v2184_v48 = vsel %vm1186_vm8, %v2182_v58, %v6516_v13  ;;  %v2732_v13 = vrot.slane %v6628_v4, 2 }
 0x2ea   : > { %2602 = vrot.lane.b32.xlu1 %v2523_v29, %s4040_s7 }
 0x2eb   : > { %2526 = vrot.lane.b32.xlu0 %v2523_v29, %s4032_s26  ;;  %v6574_v6 = vpop.permute.xlu2 %2178  ;;  %v2567_v29 = vsel %vm8134_vm2, %v2564_v52, %v2566_v55  ;;  %v254_v52 = vld [vmem:[%s4100_s24 + $0x1b8] sm:$0x3]  ;;  %v6602_v55 = vpop.f32.mrf.mxu1  ;;  %3078 = vmatpush.msra.mxu0 %v319_v51  ;;  %vm8142_vm2 = vcmask 1045504  }
 0x2ec   : > { %v6569_v63 = vpop.permute.xlu1 %2133  ;;  %v2592_v11 = vrot.slane %v254_v52, 1  ;;  %8137 = vst [vmem:[#allocation69_spill] sm:$0xff] %v6602_v55  ;;  %v2600_v58 = vrot.slane %v254_v52, 2  ;;  %vm8144_vm1 = vmmov %vm8142_vm2 }
 0x2ed   : > { %v2132_v30 = vpop.permute.xlu0 %2131 }
 0x2ee   : > { %3768 = vmatmul.msk.f32.gmra.mxu3 %vm1462_vm5, %v5968_v47  ;;  %v2593_v55 = vsel %vm362_vm0, %v8138_v22, %v2592_v11  ;;  %v2186_v22 = vsel %vm1203_vm10, %v2184_v48, %v6391_v10  ;;  %v2183_v48 = vsel %vm1169_vm7, %v5933_v19, %v6358_v35 }
 0x2ef   : > { %v6636_v11 = vpop.f32.mrf.mxu2  ;;  %v2188_v51 = vsel %vm1220_vm9, %v2186_v22, %v6539_v18  ;;  %v2185_v18 = vsel %vm1186_vm8, %v2183_v48, %v6514_v24  ;;  %v8143_v22 = vrot.slane %v6502_v2, 2 }
 0x2f0   : > { %8141 = vst [vmem:[#allocation7_spill] sm:$0xff] %v6636_v11  ;;  %v2190_v11 = vsel %vm1237_vm11, %v2188_v51, %v2132_v30  ;;  %v2734_v30 = vsel %vm8142_vm2, %v2732_v13, %v7843_v23  ;;  %v2187_v52 = vsel %vm1203_vm10, %v2185_v18, %v6541_v61  ;;  %vm8146_vm2 = vcmask 1044480  }
 0x2f1   : > { %v6592_v47 = vpop.f32.mrf.mxu3  ;;  %2570 = vrot.lane.b32.xlu2 %v2567_v29, %s4036_s30  ;;  %v2192_v19 = vsel %vm1254_vm13, %v2190_v11, %v6481_v0  ;;  %v2601_v24 = vsel %vm8144_vm1, %v8143_v22, %v2600_v58  ;;  %v2189_v0 = vsel %vm1220_vm9, %v2187_v52, %v6434_v28  ;;  %v7844_v11 = vrot.slane %v6631_v32, 5 }
 0x2f2   : > { %2559 = vrot.lane.b32.xlu1 %v2556_v31, %s4035_s29  ;;  %v2743_v58 = vrot.slane %v6628_v4, 3  ;;  %vm8147_vm1 = vcmask 1040384  }
 0x2f3   : > { %2548 = vrot.lane.b32.xlu0 %v2545_v33, %s4034_s28  ;;  %v6607_v29 = vpop.permute.xlu2 %2311  ;;  %v6609_v33 = vpop.f32.mrf.mxu0 }
 0x2f4   : > { %v2154_v3 = vpop.permute.xlu1 %2153  ;;  %v6655_v42 = vpop.f32.mrf.mxu1 }
 0x2f5   : > { %v2145_v31 = vpop.permute.xlu0 %2144  ;;  %v2194_v48 = vsel %vm1271_vm12, %v2192_v19, %v2154_v3  ;;  %v2754_v3 = vrot.slane %v6628_v4, 4 }
 0x2f6   : > { %3769 = vmatmul.msk.f32.gmra.mxu3 %vm1462_vm5, %v5440_v60 }
 0x2f7   : > { %v6692_v28 = vpop.f32.mrf.mxu2 }
 0x2f9   : > { %v6633_v62 = vpop.f32.mrf.mxu3  ;;  %2596 = vrot.lane.b32.xlu2 %v2593_v55, %s4039_s6  ;;  %v2722_v55 = vrot.slane %v6631_v32, 1 }
 0x2fa   : > { %2587 = vrot.lane.b32.xlu1 %v6502_v2, %s4038_s5  ;;  %v2765_v2 = vrot.slane %v6628_v4, 5 }
 0x2fb   : > { %2581 = vrot.lane.b32.xlu0 %v2578_v59, %s4037_s4  ;;  %v6653_v20 = vpop.permute.xlu2 %2324  ;;  %v2723_v35 = vsel %vm362_vm0, %v2721_v9, %v2722_v55  ;;  %v6674_v51 = vpop.f32.mrf.mxu0  ;;  %v7848_v9 = vrot.slane %v6631_v32, 4 }
 0x2fc   : > { %v2162_v10 = vpop.permute.xlu1 %2161  ;;  %v6721_v22 = vpop.f32.mrf.mxu1 }
 0x2fd   : > { %v2160_v59 = vpop.permute.xlu0 %2159 }
 0x2fe   : > { %3770 = vmatmul.msk.f32.gmra.mxu3 %vm1462_vm5, %v5666_v16  ;;  %v2196_v13 = vsel %vm1288_vm14, %v2194_v48, %v2160_v59  ;;  %v7847_v59 = vrot.slane %v6631_v32, 3 }
 0x301   : > { %v1644_v23 = vpop.f32.mrf.mxu3  ;;  %2737 = vrot.lane.b32.xlu2 %v2734_v30, %s4032_s26 }
 0x302   : > { %v6682_v61 = vadd.f32 %v1644_v23, %v6529_v41  ;;  %2726 = vrot.lane.b32.xlu1 %v2723_v35, %s4031_s25  ;;  %v2191_v41 = vsel %vm1237_vm11, %v2189_v0, %v6569_v63  ;;  %v2198_v23 = vsel %vm1305_vm6, %v2196_v13, %v6543_v57  ;;  %v2767_v63 = vsel %vm8145_vm4, %v2765_v2, %v7844_v11 }
 0x303   : > { %2604 = vrot.lane.b32.xlu0 %v2601_v24, %s4040_s7  ;;  %v2193_v30 = vsel %vm1254_vm13, %v2191_v41, %v2145_v31  ;;  %v6702_v35 = vpop.permute.xlu2 %2344  ;;  %v2756_v57 = vsel %vm629_vm3, %v2754_v3, %v7848_v9  ;;  %v2745_v31 = vsel %vm8146_vm2, %v2743_v58, %v7847_v59  ;;  %v6727_v0 = vpop.f32.mrf.mxu0  ;;  %v2787_v58 = vrot.slane %v6628_v4, 7 }
 0x304   : > { %v2177_v18 = vpop.permute.xlu1 %2176  ;;  %v2195_v24 = vsel %vm1271_vm12, %v2193_v30, %v6518_v25  ;;  %v7846_v25 = vrot.slane %v6631_v32, 7  ;;  %v7845_v41 = vrot.slane %v6631_v32, 6  ;;  %vm8148_vm4 = vcmask 1041408  }
 0x305   : > { %v6700_v52 = vsel %vm1322_vm15, %v2198_v23, %v2177_v18  ;;  %v2171_v19 = vpop.permute.xlu0 %2170  ;;  %v2197_v48 = vsel %vm1288_vm14, %v2195_v24, %v2162_v10  ;;  %v2776_v10 = vrot.slane %v6628_v4, 6  ;;  %v6771_v24 = vld [vmem:[%s4100_s24 + $0x1d0] sm:$0xff]  ;;  %v8149_v59 = vrot.slane %v6631_v32, 2 }
 0x306   : > { %3771 = vmatmul.msk.f32.gmra.mxu3 %vm1462_vm5, %v6013_v8  ;;  %3792 = vmatmul.msk.f32.gmra.mxu0 %vm1462_vm5, %v6700_v52  ;;  %v2199_v2 = vsel %vm1305_vm6, %v2197_v48, %v2171_v19  ;;  %v316_v48 = vld [vmem:[%s7811_s1 + $0x168] sm:$0xff]  ;;  %vm8150_vm2 = vcmask 1045504  }
 0x307   : > { %3807 = vmatmul.msk.f32.gmra.mxu1 %vm1462_vm5, %v6700_v52  ;;  %3822 = vmatmul.msk.f32.gmra.mxu2 %vm1462_vm5, %v6700_v52  ;;  %v6746_v18 = vsel %vm1322_vm15, %v2199_v2, %v6574_v6  ;;  %v2789_v6 = vsel %vm8147_vm1, %v2787_v58, %v7846_v25  ;;  %v6778_v2 = vpop.f32.mrf.mxu1  ;;  %v315_v58 = vld [vmem:[%s7811_s1 + $0x160] sm:$0xff]  ;;  %vm8153_vm1 = vcmask 1044480  }
 0x309   : > { %v1647_v13 = vpop.f32.mrf.mxu3  ;;  %2770 = vrot.lane.b32.xlu2 %v2767_v63, %s4035_s29  ;;  %v6751_v63 = vpop.f32.mrf.mxu2 }
 0x30a   : > { %v6731_v3 = vadd.f32 %v1647_v13, %v6557_v5  ;;  %2759 = vrot.lane.b32.xlu1 %v2756_v57, %s4034_s28  ;;  %v318_v5 = vld [vmem:[%s7811_s1 + $0x178] sm:$0xf]  ;;  %v317_v57 = vld [vmem:[%s7811_s1 + $0x170] sm:$0xff] }
 0x30b   : > { %2748 = vrot.lane.b32.xlu0 %v2745_v31, %s4033_s27  ;;  %v6748_v19 = vpop.permute.xlu2 %2366  ;;  %3828 = vmatpush.msk.msra.mxu3 %vm629_vm3, %v318_v5  ;;  %v2778_v31 = vsel %vm8148_vm4, %v2776_v10, %v7845_v41  ;;  %v7849_v10 = vrot.slane %v6771_v24, 1  ;;  %v7850_v41 = vrot.slane %v6771_v24, 2  ;;  %vm8156_vm4 = vcmask 1040384  }
 0x30c   : > { %v6739_v23 = vpop.permute.xlu1 %2302 }
 0x30d   : > { %v2301_v30 = vpop.permute.xlu0 %2300  ;;  %2861 = vmatpush.msra.mxu3 %v317_v57  ;;  %v6789_v57 = vpop.f32.mrf.mxu0  ;;  %v2736_v9 = vsel %vm8150_vm2, %v8149_v59, %v7850_v41  ;;  %v8152_v41 = vrot.slane %v6631_v32, 3  ;;  %vm8158_vm2 = vcmask 1041408  }
 0x30e   : > { %3772 = vmatmul.msk.f32.gmra.mxu3 %vm1462_vm5, %v6050_v49  ;;  %3793 = vmatmul.msk.f32.gmra.mxu0 %vm1462_vm5, %v6746_v18  ;;  %v2395_v17 = vsel %vm1169_vm7, %v6170_v53, %v2301_v30  ;;  %v327_v53 = vld [vmem:[%s7811_s1 + $0x1c0] sm:$0xff] }
 0x30f   : > { %3808 = vmatmul.msk.f32.gmra.mxu1 %vm1462_vm5, %v6746_v18  ;;  %3823 = vmatmul.msk.f32.gmra.mxu2 %vm1462_vm5, %v6746_v18 }
 0x310   : > { %2862 = vmatpush.msra.mxu3 %v316_v48  ;;  %v2725_v48 = vsel %vm362_vm0, %v2722_v55, %v7849_v10  ;;  %v2757_v55 = vrot.slane %v6771_v24, 4 }
 0x311   : > { %v1650_v13 = vpop.f32.mrf.mxu3  ;;  %2798 = vrot.lane.b32.xlu2 %v6631_v32, %s4038_s5  ;;  %v6811_v25 = vpop.f32.mrf.mxu2 }
 0x312   : > { %v6781_v5 = vadd.f32 %v1650_v13, %v6592_v47  ;;  %2792 = vrot.lane.b32.xlu1 %v2789_v6, %s4037_s4  ;;  %v314_v47 = vld [vmem:[%s7811_s1 + $0x158] sm:$0xff]  ;;  %2863 = vmatpush.msra.mxu3 %v315_v58  ;;  %v1642_v58 = vadd.f32 %v6633_v62, %v6504_v26  ;;  %v2746_v26 = vrot.slane %v6771_v24, 3  ;;  %v6827_v62 = vpop.f32.mrf.mxu1 }
 0x313   : > { %2781 = vrot.lane.b32.xlu0 %v2778_v31, %s4036_s30  ;;  %v6797_v6 = vpop.permute.xlu2 %2389  ;;  %v313_v31 = vld [vmem:[%s7811_s1 + $0x150] sm:$0xff] }
 0x314   : > { %v2323_v11 = vpop.permute.xlu1 %2322  ;;  %2864 = vmatpush.msra.mxu3 %v314_v47  ;;  %v2747_v7 = vsel %vm8153_vm1, %v8152_v41, %v2746_v26  ;;  %v2790_v26 = vrot.slane %v6771_v24, 7  ;;  %vm8160_vm1 = vcmask 1042432  }
 0x315   : > { %v6795_v13 = vpop.permute.xlu0 %2313 }
 0x316   : > { %3773 = vmatmul.msk.f32.gmra.mxu3 %vm1462_vm5, %v6277_v50  ;;  %3846 = vmatmul.msk.f32.vlgmr.msra.gmra.mxu0 %vm1462_vm5, %v6013_v8 }
 0x317   : > { %2865 = vmatpush.msra.mxu3 %v313_v31  ;;  %v6836_v31 = vpop.f32.mrf.mxu0 }
 0x319   : > { %v1838_v44 = vpop.f32.mrf.mxu3  ;;  %2739 = vrot.lane.b32.xlu2 %v2736_v9, %s4032_s26 }
 0x31a   : > { %v6821_v34 = vadd.f32 %v1838_v44, %v1642_v58  ;;  %2807 = vrot.lane.b32.xlu1 %v2725_v48, %s4039_s6  ;;  %v330_v44 = vld [vmem:[%s7811_s1 + $0x1d8] sm:$0xf] }
 0x31b   : > { %2728 = vrot.lane.b32.xlu0 %v2725_v48, %s4031_s25  ;;  %v6831_v59 = vpop.permute.xlu2 %2374  ;;  %v8151_v48 = vrot.slane %v6631_v32, 4  ;;  %3862 = vmatpush.msk.msra.mxu1 %vm629_vm3, %v330_v44  ;;  %v2779_v44 = vrot.slane %v6771_v24, 6 }
 0x31c   : > { %v6829_v47 = vpop.permute.xlu1 %2335 }
 0x31d   : > { %v2334_v10 = vpop.permute.xlu0 %2333  ;;  %v2758_v58 = vsel %vm629_vm3, %v8151_v48, %v2757_v55  ;;  %3287 = vmatpush.msra.mxu1 %v329_v46  ;;  %v6858_v55 = vpop.f32.mrf.mxu2  ;;  %v2768_v48 = vrot.slane %v6771_v24, 5  ;;  %v2397_v46 = vsel %vm1186_vm8, %v2395_v17, %v6607_v29  ;;  %v8155_v17 = vrot.slane %v6631_v32, 7 }
 0x31e   : > { %3774 = vmatmul.msk.f32.gmra.mxu3 %vm1462_vm5, %v6313_v14  ;;  %3847 = vmatmul.msk.f32.gmra.mxu0 %vm1462_vm5, %v6050_v49 }
 0x31f   : > { %3288 = vmatpush.msra.mxu1 %v328_v54  ;;  %v6881_v54 = vpop.f32.mrf.mxu1  ;;  %v2791_v29 = vsel %vm8156_vm4, %v8155_v17, %v2790_v26  ;;  %v6900_v36 = vpop.f32.mrf.mxu0  ;;  %vm8164_vm4 = vcmask 1045504  }
 0x320   : > { %8154 = vst [vmem:[#allocation18_spill] sm:$0xff] %v6881_v54  ;;  %v258_v54 = vld [vmem:[%s4100_s24 + $0x1d8] sm:$0x3] }
 0x321   : > { %v1841_v43 = vpop.f32.mrf.mxu3  ;;  %2761 = vrot.lane.b32.xlu2 %v2758_v58, %s4034_s28  ;;  %3289 = vmatpush.msra.mxu1 %v327_v53  ;;  %v8159_v53 = vrot.slane %v6631_v32, 5 }
 0x322   : > { %v6861_v41 = vadd.f32 %v1841_v43, %v6682_v61  ;;  %2750 = vrot.lane.b32.xlu1 %v2747_v7, %s4033_s27  ;;  %v326_v7 = vld [vmem:[%s7811_s1 + $0x1b8] sm:$0xff]  ;;  %v2399_v61 = vsel %vm1203_vm10, %v2397_v46, %v2323_v11  ;;  %v8157_v11 = vrot.slane %v6631_v32, 6 }
 0x323   : > { %2815 = vrot.lane.b32.xlu0 %v2736_v9, %s4040_s7  ;;  %v6879_v30 = vpop.permute.xlu2 %2391  ;;  %v2401_v58 = vsel %vm1220_vm9, %v2399_v61, %v2334_v10  ;;  %v2769_v10 = vsel %vm8160_vm1, %v8159_v53, %v2768_v48  ;;  %3290 = vmatpush.msra.mxu1 %v326_v7  ;;  %v325_v61 = vld [vmem:[%s7811_s1 + $0x1b0] sm:$0xff]  ;;  %v2805_v48 = vrot.slane %v258_v54, 1  ;;  %v6913_v7 = vld [vmem:[%s4100_s24 + $0x1e0] sm:$0xff]  ;;  %vm8167_vm1 = vcmask 1044480  }
 0x324   : > { %v2356_v43 = vpop.permute.xlu1 %2355  ;;  %v2780_v46 = vsel %vm8158_vm2, %v8157_v11, %v2779_v44  ;;  %v2403_v26 = vsel %vm1237_vm11, %v2401_v58, %v6702_v35  ;;  %v6916_v11 = vld [vmem:[%s4100_s24 + $0x1e8] sm:$0xff]  ;;  %v2934_v58 = vrot.slane %v6913_v7, 1  ;;  %vm8166_vm2 = vmmov %vm8164_vm4 }
 0x325   : > { %v6877_v9 = vpop.permute.xlu0 %2346  ;;  %3291 = vmatpush.msra.mxu1 %v325_v61  ;;  %v2405_v32 = vsel %vm1254_vm13, %v2403_v26, %v2356_v43  ;;  %v6918_v53 = vpop.f32.mrf.mxu2  ;;  %v8161_v26 = vrot.slane %v6771_v24, 1 }
 0x326   : > { %3775 = vmatmul.msk.f32.gmra.mxu3 %vm1462_vm5, %v6448_v38  ;;  %3848 = vmatmul.msk.f32.gmra.mxu0 %vm1462_vm5, %v6277_v50 }
 0x329   : > { %v1844_v17 = vpop.f32.mrf.mxu3  ;;  %2794 = vrot.lane.b32.xlu2 %v2791_v29, %s4037_s4  ;;  %v6935_v29 = vpop.f32.mrf.mxu1 }
 0x32a   : > { %v6908_v44 = vadd.f32 %v1844_v17, %v6731_v3  ;;  %2783 = vrot.lane.b32.xlu1 %v2780_v46, %s4036_s30  ;;  %v2407_v3 = vsel %vm1271_vm12, %v2405_v32, %v6748_v19  ;;  %v2806_v17 = vsel %vm362_vm0, %v8161_v26, %v2805_v48  ;;  %v2396_v19 = vsel %vm1169_vm7, %v6164_v21, %v6739_v23  ;;  %v336_v21 = vld [vmem:[%s7811_s1 + $0x208] sm:$0xf]  ;;  %v6956_v23 = vpop.f32.mrf.mxu0 }
 0x32b   : > { %2772 = vrot.lane.b32.xlu0 %v2769_v10, %s4035_s29  ;;  %v6924_v61 = vpop.permute.xlu2 %2546  ;;  %3879 = vmatpush.msk.msra.mxu2 %vm629_vm3, %v336_v21 }
 0x32c   : > { %v2382_v35 = vpop.permute.xlu1 %2381 }
 0x32d   : > { %v2373_v43 = vpop.permute.xlu0 %2372 }
 0x32e   : > { %v2409_v46 = vsel %vm1288_vm14, %v2407_v3, %v2373_v43  ;;  %3776 = vmatmul.msk.f32.gmra.mxu3 %vm1462_vm5, %v6486_v37  ;;  %3849 = vmatmul.msk.f32.gmra.mxu0 %vm1462_vm5, %v6313_v14  ;;  %v8162_v3 = vrot.slane %v6916_v11, 1 }
 0x32f   : > { %v2411_v10 = vsel %vm1305_vm6, %v2409_v46, %v2382_v35  ;;  %v2398_v35 = vsel %vm1186_vm8, %v2396_v19, %v6795_v13  ;;  %v2945_v13 = vrot.slane %v6913_v7, 2  ;;  %v2813_v46 = vrot.slane %v258_v54, 2 }
 0x330   : > { %v6942_v32 = vsel %vm1322_vm15, %v2411_v10, %v6797_v6  ;;  %v2936_v43 = vsel %vm362_vm0, %v2934_v58, %v8162_v3  ;;  %v7855_v58 = vrot.slane %v6916_v11, 2  ;;  %v2400_v10 = vsel %vm1203_vm10, %v2398_v35, %v6653_v20  ;;  %v6982_v20 = vpop.f32.mrf.mxu2 }
 0x331   : > { %3809 = vmatmul.msk.f32.gmra.mxu1 %vm1462_vm5, %v6942_v32  ;;  %3824 = vmatmul.msk.f32.gmra.mxu2 %vm1462_vm5, %v6942_v32  ;;  %v1847_v48 = vpop.f32.mrf.mxu3  ;;  %v2402_v19 = vsel %vm1220_vm9, %v2400_v10, %v6829_v47  ;;  %8163 = vst [vmem:[#allocation23_spill] sm:$0xff] %v6982_v20  ;;  %v8165_v35 = vrot.slane %v6771_v24, 2  ;;  %v6996_v10 = vpop.f32.mrf.mxu1 }
 0x332   : > { %v6959_v6 = vadd.f32 %v1847_v48, %v6781_v5  ;;  %2809 = vrot.lane.b32.xlu1 %v2806_v17, %s4039_s6  ;;  %2939 = vrot.lane.b32.xlu2 %v2936_v43, %s4031_s25  ;;  %v2956_v5 = vrot.slane %v6913_v7, 3  ;;  %v7851_v17 = vrot.slane %v6916_v11, 3  ;;  %v2404_v54 = vsel %vm1237_vm11, %v2402_v19, %v6877_v9  ;;  %8168 = vst [vmem:[#allocation47_spill] sm:$0xff] %v6996_v10 }
 0x333   : > { %2800 = vrot.lane.b32.xlu0 %v6771_v24, %s4038_s5  ;;  %v6974_v48 = vpop.permute.xlu2 %2579  ;;  %v2947_v47 = vsel %vm8164_vm4, %v2945_v13, %v7855_v58  ;;  %v2814_v21 = vsel %vm8166_vm2, %v8165_v35, %v2813_v46  ;;  %v2978_v13 = vrot.slane %v6913_v7, 5  ;;  %v7852_v24 = vrot.slane %v6916_v11, 5 }
 0x334   : > { %v2369_v26 = vpop.permute.xlu1 %2368  ;;  %v2958_v9 = vsel %vm8167_vm1, %v2956_v5, %v7851_v17  ;;  %v2967_v46 = vrot.slane %v6913_v7, 4  ;;  %v7006_v5 = vpop.f32.mrf.mxu0  ;;  %v2989_v35 = vrot.slane %v6913_v7, 6  ;;  %vm8170_vm4 = vcmask 1042432  }
 0x335   : > { %v2358_v3 = vpop.permute.xlu0 %2357  ;;  %8169 = vst [vmem:[#allocation56_spill] sm:$0xff] %v7006_v5  ;;  %vm8171_vm2 = vcmask 1041408   ;;  %vm8175_vm1 = vcmask 1040384  }
 0x336   : > { %3829 = vmatmul.msk.f32.vlgmr.msra.gmra.mxu3 %vm1462_vm5, %v5440_v60  ;;  %3850 = vmatmul.msk.f32.gmra.mxu0 %vm1462_vm5, %v6448_v38  ;;  %v2406_v43 = vsel %vm1254_vm13, %v2404_v54, %v2358_v3  ;;  %v7854_v3 = vrot.slane %v6916_v11, 4 }
 0x337   : > { %v2408_v19 = vsel %vm1271_vm12, %v2406_v43, %v2369_v26  ;;  %v7853_v26 = vrot.slane %v6916_v11, 6 }
 0x338   : > { %v2410_v43 = vsel %vm1288_vm14, %v2408_v19, %v6831_v59  ;;  %v2980_v59 = vsel %vm8170_vm4, %v2978_v13, %v7852_v24  ;;  %v2969_v19 = vsel %vm629_vm3, %v2967_v46, %v7854_v3  ;;  %v3000_v13 = vrot.slane %v6913_v7, 7 }
 0x339   : > { %v6994_v60 = vpop.f32.mrf.mxu3  ;;  %v7856_v46 = vrot.slane %v6916_v11, 7  ;;  %vm8180_vm4 = vcmask 1045504  }
 0x33a   : > { %2950 = vrot.lane.b32.xlu1 %v2947_v47, %s4032_s26  ;;  %2961 = vrot.lane.b32.xlu2 %v2958_v9, %s4033_s27 }
 0x33b   : > { %2817 = vrot.lane.b32.xlu0 %v2814_v21, %s4040_s7  ;;  %v7012_v21 = vpop.permute.xlu2 %2594 }
 0x33c   : > { %v2514_v54 = vpop.permute.xlu1 %2513 }
 0x33d   : > { %v2384_v47 = vpop.permute.xlu0 %2383  ;;  %v2608_v58 = vsel %vm1169_vm7, %v6369_v40, %v2514_v54 }
 0x33e   : > { %v2412_v17 = vsel %vm1305_vm6, %v2410_v43, %v2384_v47  ;;  %3830 = vmatmul.msk.f32.gmra.mxu3 %vm1462_vm5, %v5666_v16  ;;  %3851 = vmatmul.msk.f32.gmra.mxu0 %vm1462_vm5, %v6486_v37  ;;  %v2991_v16 = vsel %vm8171_vm2, %v2989_v35, %v7853_v26  ;;  %v7045_v43 = vld [vmem:[%s4100_s24 + $0x1f0] sm:$0xff]  ;;  %v7048_v47 = vpop.f32.mrf.mxu1  ;;  %vm8186_vm2 = vcmask 1044480  }
 0x33f   : > { %v7021_v9 = vsel %vm1322_vm15, %v2412_v17, %v6879_v30  ;;  %v7036_v30 = vpop.f32.mrf.mxu2  ;;  %8173 = vst [vmem:[#allocation84_spill] sm:$0xff] %v7048_v47 }
 0x340   : > { %3810 = vmatmul.msk.f32.gmra.mxu1 %vm1462_vm5, %v7021_v9  ;;  %3825 = vmatmul.msk.f32.gmra.mxu2 %vm1462_vm5, %v7021_v9  ;;  %8172 = vst [vmem:[#allocation59_spill] sm:$0xff] %v7036_v30  ;;  %v7858_v30 = vrot.slane %v7045_v43, 2 }
 0x341   : > { %v7038_v17 = vpop.f32.mrf.mxu3 }
 0x342   : > { %2983 = vrot.lane.b32.xlu1 %v2980_v59, %s4035_s29  ;;  %2994 = vrot.lane.b32.xlu2 %v2991_v16, %s4036_s30  ;;  %v7857_v59 = vrot.slane %v7045_v43, 1  ;;  %v3002_v16 = vsel %vm8175_vm1, %v3000_v13, %v7856_v46  ;;  %v8176_v13 = vrot.slane %v6916_v11, 1  ;;  %vm8188_vm1 = vcmask 1042432  }
 0x343   : > { %2972 = vrot.lane.b32.xlu0 %v2969_v19, %s4034_s28  ;;  %v7050_v26 = vpop.permute.xlu2 %2537  ;;  %v7057_v19 = vpop.f32.mrf.mxu0 }
 0x344   : > { %v2536_v24 = vpop.permute.xlu1 %2535  ;;  %8174 = vst [vmem:[#allocation6_spill] sm:$0xff] %v7057_v19  ;;  %v2938_v46 = vsel %vm362_vm0, %v8176_v13, %v7857_v59  ;;  %v2970_v59 = vrot.slane %v7045_v43, 4 }
 0x345   : > { %v2525_v35 = vpop.permute.xlu0 %2524 }
 0x346   : > { %3831 = vmatmul.msk.f32.gmra.mxu3 %vm1462_vm5, %v6013_v8  ;;  %3852 = vmatmul.msk.f32.gmra.mxu0 %vm1462_vm5, %v6700_v52  ;;  %v335_v8 = vld [vmem:[%s7811_s1 + $0x200] sm:$0xff]  ;;  %v2610_v47 = vsel %vm1186_vm8, %v2608_v58, %v2525_v35  ;;  %v7091_v13 = vpop.f32.mrf.mxu1  ;;  %v8179_v58 = vrot.slane %v6916_v11, 2 }
 0x347   : > { %v7079_v19 = vpop.f32.mrf.mxu2  ;;  %3500 = vmatpush.msra.mxu2 %v335_v8  ;;  %v2612_v54 = vsel %vm1203_vm10, %v2610_v47, %v2536_v24  ;;  %8178 = vst [vmem:[#allocation11_spill] sm:$0xff] %v7091_v13 }
 0x348   : > { %3863 = vmatmul.msk.f32.vlgmr.msra.gmra.mxu1 %vm1462_vm5, %v6277_v50  ;;  %8177 = vst [vmem:[#allocation87_spill] sm:$0xff] %v7079_v19  ;;  %v2949_v35 = vsel %vm8180_vm4, %v8179_v58, %v7858_v30  ;;  %v2959_v58 = vrot.slane %v7045_v43, 3  ;;  %vm8194_vm4 = vcmask 1040384  }
 0x349   : > { %v7064_v3 = vpop.f32.mrf.mxu3 }
 0x34a   : > { %3011 = vrot.lane.b32.xlu1 %v6916_v11, %s4038_s5  ;;  %2941 = vrot.lane.b32.xlu2 %v2938_v46, %s4031_s25 }
 0x34b   : > { %3005 = vrot.lane.b32.xlu0 %v3002_v16, %s4037_s4  ;;  %v7089_v16 = vpop.permute.xlu2 %2570  ;;  %v7100_v24 = vpop.f32.mrf.mxu0 }
 0x34c   : > { %v2569_v40 = vpop.permute.xlu1 %2568  ;;  %8181 = vst [vmem:[#allocation35_spill] sm:$0xff] %v7100_v24  ;;  %v2981_v24 = vrot.slane %v7045_v43, 5 }
 0x34d   : > { %v2558_v5 = vpop.permute.xlu0 %2557 }
 0x34e   : > { %3832 = vmatmul.msk.f32.gmra.mxu3 %vm1462_vm5, %v6050_v49  ;;  %3853 = vmatmul.msk.f32.gmra.mxu0 %vm1462_vm5, %v6746_v18  ;;  %v2614_v49 = vsel %vm1220_vm9, %v2612_v54, %v6924_v61  ;;  %v7138_v10 = vpop.f32.mrf.mxu1 }
 0x34f   : > { %v2616_v8 = vsel %vm1237_vm11, %v2614_v49, %v2558_v5  ;;  %v7113_v13 = vpop.f32.mrf.mxu2  ;;  %v8185_v49 = vrot.slane %v6916_v11, 3  ;;  %8189 = vst [vmem:[#allocation15_spill] sm:$0xff] %v7138_v10 }
 0x350   : > { %3864 = vmatmul.msk.f32.gmra.mxu1 %vm1462_vm5, %v6313_v14  ;;  %8183 = vst [vmem:[#allocation50_spill] sm:$0xff] %v7113_v13  ;;  %v2618_v61 = vsel %vm1254_vm13, %v2616_v8, %v2569_v40  ;;  %v334_v13 = vld [vmem:[%s7811_s1 + $0x1f8] sm:$0xff] }
 0x351   : > { %v7104_v47 = vpop.f32.mrf.mxu3  ;;  %v2960_v19 = vsel %vm8186_vm2, %v8185_v49, %v2959_v58  ;;  %v2620_v40 = vsel %vm1271_vm12, %v2618_v61, %v6974_v48  ;;  %3501 = vmatpush.msra.mxu2 %v334_v13  ;;  %v333_v48 = vld [vmem:[%s7811_s1 + $0x1f0] sm:$0xff]  ;;  %v3003_v58 = vrot.slane %v7045_v43, 7  ;;  %v2992_v61 = vrot.slane %v7045_v43, 6 }
 0x352   : > { %8182 = vst [vmem:[#allocation46_spill] sm:$0xff] %v7104_v47  ;;  %2952 = vrot.lane.b32.xlu1 %v2949_v35, %s4032_s26  ;;  %3028 = vrot.lane.b32.xlu2 %v2949_v35, %s4040_s7  ;;  %vm8196_vm2 = vcmask 1041408  }
 0x353   : > { %3020 = vrot.lane.b32.xlu0 %v2938_v46, %s4039_s6  ;;  %v7120_v5 = vpop.permute.xlu2 %2596  ;;  %v8184_v46 = vrot.slane %v6916_v11, 4  ;;  %3502 = vmatpush.msra.mxu2 %v333_v48  ;;  %v8195_v48 = vrot.slane %v6916_v11, 6 }
 0x354   : > { %v2516_v30 = vpop.permute.xlu1 %2515 }
 0x355   : > { %v2586_v54 = vpop.permute.xlu0 %2585  ;;  %v2971_v35 = vsel %vm629_vm3, %v8184_v46, %v2970_v59 }
 0x356   : > { %3833 = vmatmul.msk.f32.gmra.mxu3 %vm1462_vm5, %v6277_v50  ;;  %3854 = vmatmul.msk.f32.gmra.mxu0 %vm1462_vm5, %v6942_v32  ;;  %v8187_v50 = vrot.slane %v6916_v11, 5  ;;  %v2622_v59 = vsel %vm1288_vm14, %v2620_v40, %v2586_v54  ;;  %v331_v40 = vld [vmem:[%s7811_s1 + $0x1e0] sm:$0xff] }
 0x357   : > { %v2624_v13 = vsel %vm1305_vm6, %v2622_v59, %v7012_v21 }
 0x358   : > { %3865 = vmatmul.msk.f32.gmra.mxu1 %vm1462_vm5, %v6448_v38  ;;  %v2982_v8 = vsel %vm8188_vm1, %v8187_v50, %v2981_v24  ;;  %v7148_v24 = vpop.f32.mrf.mxu0  ;;  %v7170_v50 = vpop.f32.mrf.mxu2  ;;  %vm8202_vm1 = vcmask 1045504  }
 0x359   : > { %v7141_v46 = vpop.f32.mrf.mxu3  ;;  %8191 = vst [vmem:[#allocation98_spill] sm:$0xff] %v7148_v24 }
 0x35a   : > { %8190 = vst [vmem:[#allocation68_spill] sm:$0xff] %v7141_v46  ;;  %2974 = vrot.lane.b32.xlu1 %v2971_v35, %s4034_s28  ;;  %2985 = vrot.lane.b32.xlu2 %v2982_v8, %s4035_s29  ;;  %v8193_v8 = vrot.slane %v6916_v11, 7 }
 0x35b   : > { %2963 = vrot.lane.b32.xlu0 %v2960_v19, %s4033_s27  ;;  %v332_v19 = vld [vmem:[%s7811_s1 + $0x1e8] sm:$0xff]  ;;  %v7165_v21 = vpop.permute.xlu2 %2737  ;;  %8192 = vst [vmem:[#allocation75_spill] sm:$0xff] %v7170_v50 }
 0x35c   : > { %v2603_v54 = vpop.permute.xlu1 %2602  ;;  %3503 = vmatpush.msra.mxu2 %v332_v19  ;;  %v3004_v59 = vsel %vm8194_vm4, %v8193_v8, %v3003_v58  ;;  %v262_v19 = vld [vmem:[%s4100_s24 + $0x1f8] sm:$0x3]  ;;  %v7193_v58 = vpop.f32.mrf.mxu1  ;;  %vm8205_vm4 = vcmask 1044480  }
 0x35d   : > { %v7159_v35 = vsel %vm1322_vm15, %v2624_v13, %v2603_v54  ;;  %v2527_v49 = vpop.permute.xlu0 %2526  ;;  %v2993_v13 = vsel %vm8196_vm2, %v8195_v48, %v2992_v61  ;;  %v7186_v54 = vld [vmem:[%s4100_s24 + $0x208] sm:$0xff]  ;;  %8198 = vst [vmem:[#allocation27_spill] sm:$0xff] %v7193_v58  ;;  %v2609_v48 = vsel %vm1169_vm7, %v6372_v39, %v2516_v30  ;;  %v3026_v10 = vrot.slane %v262_v19, 2  ;;  %vm8206_vm2 = vmmov %vm8202_vm1 }
 0x35e   : > { %3826 = vmatmul.msk.f32.gmra.mxu2 %vm1462_vm5, %v7159_v35  ;;  %3834 = vmatmul.msk.f32.gmra.mxu3 %vm1462_vm5, %v6313_v14  ;;  %v7183_v14 = vld [vmem:[%s4100_s24 + $0x200] sm:$0xff]  ;;  %v7859_v61 = vrot.slane %v7186_v54, 1  ;;  %v8200_v39 = vrot.slane %v7045_v43, 1 }
 0x35f   : > { %3855 = vmatmul.msk.f32.gmra.mxu0 %vm1462_vm5, %v7021_v9  ;;  %3504 = vmatpush.msra.mxu2 %v331_v40  ;;  %v3147_v8 = vrot.slane %v7183_v14, 1  ;;  %v3018_v40 = vrot.slane %v262_v19, 1  ;;  %v8201_v19 = vrot.slane %v7045_v43, 2 }
 0x360   : > { %3866 = vmatmul.msk.f32.gmra.mxu1 %vm1462_vm5, %v6486_v37 }
 0x361   : > { %v7189_v24 = vpop.f32.mrf.mxu3  ;;  %v3149_v46 = vsel %vm362_vm0, %v3147_v8, %v7859_v61  ;;  %v3019_v30 = vsel %vm362_vm0, %v8200_v39, %v3018_v40  ;;  %v3169_v8 = vrot.slane %v7183_v14, 3  ;;  %v3158_v40 = vrot.slane %v7183_v14, 2 }
 0x362   : > { %8197 = vst [vmem:[#allocation3_spill] sm:$0xff] %v7189_v24  ;;  %3007 = vrot.lane.b32.xlu1 %v3004_v59, %s4037_s4  ;;  %3013 = vrot.lane.b32.xlu2 %v7045_v43, %s4038_s5  ;;  %v7201_v24 = vpop.f32.mrf.mxu0  ;;  %v2611_v59 = vsel %vm1186_vm8, %v2609_v48, %v2527_v49  ;;  %v3027_v48 = vsel %vm8202_vm1, %v8201_v19, %v3026_v10  ;;  %v7862_v43 = vrot.slane %v7186_v54, 2  ;;  %v7860_v39 = vrot.slane %v7186_v54, 4 }
 0x363   : > { %2996 = vrot.lane.b32.xlu0 %v2993_v13, %s4036_s30  ;;  %8199 = vst [vmem:[#allocation78_spill] sm:$0xff] %v7201_v24  ;;  %v7206_v58 = vpop.permute.xlu2 %2770  ;;  %v2613_v49 = vsel %vm1203_vm10, %v2611_v59, %v7050_v26  ;;  %v7223_v24 = vpop.f32.mrf.mxu2  ;;  %v7861_v26 = vrot.slane %v7186_v54, 3  ;;  %vm8208_vm1 = vcmask 1041408  }
 0x364   : > { %v2560_v50 = vpop.permute.xlu1 %2559  ;;  %8203 = vst [vmem:[#allocation22_spill] sm:$0xff] %v7223_v24 }
 0x365   : > { %v2549_v13 = vpop.permute.xlu0 %2548 }
 0x366   : > { %3835 = vmatmul.msk.f32.gmra.mxu3 %vm1462_vm5, %v6448_v38  ;;  %v2615_v47 = vsel %vm1220_vm9, %v2613_v49, %v2549_v13  ;;  %v3180_v13 = vrot.slane %v7183_v14, 4 }
 0x367   : > { %3856 = vmatmul.msk.f32.gmra.mxu0 %vm1462_vm5, %v7159_v35  ;;  %v2617_v10 = vsel %vm1237_vm11, %v2615_v47, %v2560_v50  ;;  %v3171_v47 = vsel %vm8205_vm4, %v3169_v8, %v7861_v26  ;;  %v3160_v50 = vsel %vm8206_vm2, %v3158_v40, %v7862_v43  ;;  %vm8209_vm4 = vcmask 1042432  }
 0x368   : > { %3867 = vmatmul.msk.f32.gmra.mxu1 %vm1462_vm5, %v6700_v52  ;;  %v2619_v61 = vsel %vm1254_vm13, %v2617_v10, %v7089_v16  ;;  %v3202_v16 = vrot.slane %v7183_v14, 6  ;;  %v3191_v10 = vrot.slane %v7183_v14, 5  ;;  %vm8211_vm2 = vcmask 1040384  }
 0x369   : > { %v7226_v20 = vpop.f32.mrf.mxu3 }
 0x36a   : > { %3152 = vrot.lane.b32.xlu1 %v3149_v46, %s4031_s25  ;;  %3030 = vrot.lane.b32.xlu2 %v3027_v48, %s4040_s7  ;;  %v7238_v46 = vpop.f32.mrf.mxu1  ;;  %v2252_v19 = vpop.f32.mrf.mxu0 }
 0x36b   : > { %3022 = vrot.lane.b32.xlu0 %v3019_v30, %s4039_s6  ;;  %8204 = vst [vmem:[#allocation31_spill] sm:$0xff] %v7238_v46  ;;  %v7242_v49 = vpop.permute.xlu2 %2798  ;;  %v3182_v46 = vsel %vm629_vm3, %v3180_v13, %v7860_v39  ;;  %v7263_v8 = vpop.f32.mrf.mxu2  ;;  %v1630_v39 = vadd.f32 %v6655_v42, %v6609_v33 }
 0x36c   : > { %v2588_v59 = vpop.permute.xlu1 %2587  ;;  %8207 = vst [vmem:[#allocation95_spill] sm:$0xff] %v7263_v8 }
 0x36d   : > { %v2582_v30 = vpop.permute.xlu0 %2581  ;;  %v1858_v33 = vadd.f32 %v6692_v28, %v1630_v39 }
 0x36e   : > { %3836 = vmatmul.msk.f32.gmra.mxu3 %vm1462_vm5, %v6486_v37  ;;  %v2621_v48 = vsel %vm1271_vm12, %v2619_v61, %v2582_v30  ;;  %v7863_v61 = vrot.slane %v7186_v54, 6  ;;  %v7864_v30 = vrot.slane %v7186_v54, 5 }
 0x36f   : > { %v2623_v40 = vsel %vm1288_vm14, %v2621_v48, %v2588_v59 }
 0x370   : > { %3868 = vmatmul.msk.f32.gmra.mxu1 %vm1462_vm5, %v6746_v18  ;;  %v2625_v59 = vsel %vm1305_vm6, %v2623_v40, %v7120_v5  ;;  %v3193_v42 = vsel %vm8209_vm4, %v3191_v10, %v7864_v30  ;;  %v7295_v5 = vld [vmem:[%s4100_s24 + $0x210] sm:$0xff]  ;;  %v8210_v40 = vrot.slane %v7186_v54, 7  ;;  %vm8216_vm4 = vcmask 1044480  }
 0x371   : > { %v7258_v24 = vpop.f32.mrf.mxu3  ;;  %v3150_v39 = vrot.slane %v7295_v5, 1 }
 0x372   : > { %3174 = vrot.lane.b32.xlu1 %v3171_v47, %s4033_s27  ;;  %3185 = vrot.lane.b32.xlu2 %v3182_v46, %s4034_s28  ;;  %v3213_v47 = vrot.slane %v7183_v14, 7  ;;  %v2465_v43 = vpop.f32.mrf.mxu1 }
 0x373   : > { %3163 = vrot.lane.b32.xlu0 %v3160_v50, %s4032_s26  ;;  %v7278_v26 = vpop.permute.xlu2 %2739  ;;  %v3204_v50 = vsel %vm8208_vm1, %v3202_v16, %v7863_v61  ;;  %v2678_v28 = vpop.f32.mrf.mxu2  ;;  %vm8214_vm1 = vcmask 1045504  }
 0x374   : > { %v2727_v13 = vpop.permute.xlu1 %2726 }
 0x375   : > { %v2605_v48 = vpop.permute.xlu0 %2604 }
 0x376   : > { %3837 = vmatmul.msk.f32.gmra.mxu3 %vm1462_vm5, %v6700_v52  ;;  %v7281_v46 = vsel %vm1322_vm15, %v2625_v59, %v2605_v48  ;;  %v3215_v59 = vsel %vm8211_vm2, %v3213_v47, %v8210_v40  ;;  %v2255_v48 = vpop.f32.mrf.mxu0  ;;  %v1633_v47 = vadd.f32 %v6721_v22, %v6674_v51  ;;  %vm8218_vm2 = vcmask 1042432  }
 0x377   : > { %3827 = vmatmul.msk.f32.gmra.mxu2 %vm1462_vm5, %v7281_v46  ;;  %3857 = vmatmul.msk.f32.gmra.mxu0 %vm1462_vm5, %v7281_v46 }
 0x378   : > { %3869 = vmatmul.msk.f32.gmra.mxu1 %vm1462_vm5, %v6942_v32 }
 0x379   : > { %v2039_v16 = vpop.f32.mrf.mxu3 }
 0x37a   : > { %v2071_v10 = vadd.f32 %v2039_v16, %v1858_v33  ;;  %3207 = vrot.lane.b32.xlu1 %v3204_v50, %s4036_s30  ;;  %3218 = vrot.lane.b32.xlu2 %v3215_v59, %s4037_s4  ;;  %v8212_v50 = vrot.slane %v7186_v54, 1  ;;  %v1859_v59 = vadd.f32 %v6751_v63, %v1633_v47  ;;  %v2468_v51 = vpop.f32.mrf.mxu1 }
 0x37b   : > { %3196 = vrot.lane.b32.xlu0 %v3193_v42, %s4035_s29  ;;  %v7310_v8 = vpop.permute.xlu2 %2761  ;;  %v2681_v47 = vpop.f32.mrf.mxu2 }
 0x37c   : > { %v2284_v61 = vadd.f32 %v2252_v19, %v2071_v10  ;;  %v2760_v30 = vpop.permute.xlu1 %2759  ;;  %v3151_v42 = vsel %vm362_vm0, %v8212_v50, %v3150_v39 }
 0x37d   : > { %v2749_v40 = vpop.permute.xlu0 %2748 }
 0x37e   : > { %3838 = vmatmul.msk.f32.gmra.mxu3 %vm1462_vm5, %v6746_v18  ;;  %v2497_v33 = vadd.f32 %v2465_v43, %v2284_v61  ;;  %v2258_v43 = vpop.f32.mrf.mxu0  ;;  %v3161_v61 = vrot.slane %v7295_v5, 2 }
 0x37f   : > { %3880 = vmatmul.msk.f32.vlgmr.msra.gmra.mxu2 %vm1462_vm5, %v6448_v38  ;;  %v2821_v38 = vsel %vm1169_vm7, %v6628_v4, %v2727_v13  ;;  %v8213_v4 = vrot.slane %v7186_v54, 2 }
 0x380   : > { %v7320_v19 = vadd.f32 %v2678_v28, %v2497_v33  ;;  %3870 = vmatmul.msk.f32.gmra.mxu1 %vm1462_vm5, %v7021_v9  ;;  %v3172_v28 = vrot.slane %v7295_v5, 3  ;;  %v1636_v33 = vadd.f32 %v6778_v2, %v6727_v0  ;;  %v8215_v2 = vrot.slane %v7186_v54, 3 }
 0x381   : > { %v2042_v22 = vpop.f32.mrf.mxu3  ;;  %v3162_v13 = vsel %vm8214_vm1, %v8213_v4, %v3161_v61  ;;  %v1639_v4 = vadd.f32 %v6827_v62, %v6789_v57  ;;  %vm8221_vm1 = vcmask 1041408  }
 0x382   : > { %v2072_v16 = vadd.f32 %v2042_v22, %v1859_v59  ;;  %3154 = vrot.lane.b32.xlu1 %v3151_v42, %s4031_s25  ;;  %3233 = vrot.lane.b32.xlu2 %v3151_v42, %s4039_s6  ;;  %v2823_v42 = vsel %vm1186_vm8, %v2821_v38, %v7165_v21  ;;  %v2471_v21 = vpop.f32.mrf.mxu1 }
 0x383   : > { %3224 = vrot.lane.b32.xlu0 %v7186_v54, %s4038_s5  ;;  %v7336_v59 = vpop.permute.xlu2 %2794  ;;  %v2825_v0 = vsel %vm1203_vm10, %v2823_v42, %v2749_v40  ;;  %v3183_v40 = vrot.slane %v7295_v5, 4  ;;  %v1861_v62 = vadd.f32 %v6858_v55, %v1639_v4 }
 0x384   : > { %v2285_v63 = vadd.f32 %v2255_v48, %v2072_v16  ;;  %v2793_v10 = vpop.permute.xlu1 %2792  ;;  %v1860_v48 = vadd.f32 %v6811_v25, %v1636_v33  ;;  %v2827_v25 = vsel %vm1220_vm9, %v2825_v0, %v2760_v30  ;;  %v3205_v33 = vrot.slane %v7295_v5, 6 }
 0x385   : > { %v2782_v50 = vpop.permute.xlu0 %2781 }
 0x386   : > { %3839 = vmatmul.msk.f32.gmra.mxu3 %vm1462_vm5, %v6942_v32  ;;  %v2498_v22 = vadd.f32 %v2468_v51, %v2285_v63  ;;  %v3173_v51 = vsel %vm8216_vm4, %v8215_v2, %v3172_v28  ;;  %v8217_v2 = vrot.slane %v7186_v54, 5  ;;  %vm8223_vm4 = vcmask 1040384  }
 0x387   : > { %3881 = vmatmul.msk.f32.gmra.mxu2 %vm1462_vm5, %v6486_v37  ;;  %v3194_v37 = vrot.slane %v7295_v5, 5 }
 0x388   : > { %v7352_v16 = vadd.f32 %v2681_v47, %v2498_v22  ;;  %3871 = vmatmul.msk.f32.gmra.mxu1 %vm1462_vm5, %v7159_v35  ;;  %v2261_v22 = vpop.f32.mrf.mxu0 }
 0x389   : > { %v2045_v38 = vpop.f32.mrf.mxu3 }
 0x38a   : > { %v2073_v63 = vadd.f32 %v2045_v38, %v1860_v48  ;;  %3241 = vrot.lane.b32.xlu1 %v3162_v13, %s4040_s7  ;;  %3176 = vrot.lane.b32.xlu2 %v3173_v51, %s4033_s27  ;;  %v2684_v42 = vpop.f32.mrf.mxu2  ;;  %v3195_v51 = vsel %vm8218_vm2, %v8217_v2, %v3194_v37  ;;  %v8219_v38 = vrot.slane %v7186_v54, 4  ;;  %v2474_v55 = vpop.f32.mrf.mxu1  ;;  %vm8224_vm2 = vcmask 1045504  }
 0x38b   : > { %3165 = vrot.lane.b32.xlu0 %v3162_v13, %s4032_s26  ;;  %v2829_v13 = vsel %vm1237_vm11, %v2827_v25, %v7206_v58 }
 0x38c   : > { %v2286_v28 = vadd.f32 %v2258_v43, %v2073_v63  ;;  %v2808_v47 = vpop.permute.xlu1 %2807  ;;  %v7369_v0 = vpop.permute.xlu2 %2939  ;;  %v2831_v43 = vsel %vm1254_vm13, %v2829_v13, %v2782_v50  ;;  %v3184_v57 = vsel %vm629_vm3, %v8219_v38, %v3183_v40  ;;  %v3216_v40 = vrot.slane %v7295_v5, 7 }
 0x38d   : > { %v2729_v30 = vpop.permute.xlu0 %2728  ;;  %v2833_v25 = vsel %vm1271_vm12, %v2831_v43, %v2793_v10  ;;  %v8222_v38 = vrot.slane %v7186_v54, 7 }
 0x38e   : > { %v2499_v48 = vadd.f32 %v2471_v21, %v2286_v28  ;;  %3840 = vmatmul.msk.f32.gmra.mxu3 %vm1462_vm5, %v7021_v9  ;;  %v8220_v21 = vrot.slane %v7186_v54, 6  ;;  %v266_v28 = vld [vmem:[%s4100_s24 + $0x218] sm:$0x3]  ;;  %v2835_v4 = vsel %vm1288_vm14, %v2833_v25, %v7242_v49  ;;  %v7414_v49 = vld [vmem:[%s4100_s24 + $0x220] sm:$0xff] }
 0x38f   : > { %3882 = vmatmul.msk.f32.gmra.mxu2 %vm1462_vm5, %v6700_v52  ;;  %v2837_v10 = vsel %vm1305_vm6, %v2835_v4, %v2808_v47  ;;  %v7417_v47 = vld [vmem:[%s4100_s24 + $0x228] sm:$0xff]  ;;  %v3239_v25 = vrot.slane %v266_v28, 2 }
 0x390   : > { %v7379_v58 = vadd.f32 %v2684_v42, %v2499_v48  ;;  %v3206_v63 = vsel %vm8221_vm1, %v8220_v21, %v3205_v33  ;;  %3872 = vmatmul.msk.f32.gmra.mxu1 %vm1462_vm5, %v7281_v46  ;;  %v3231_v42 = vrot.slane %v266_v28, 1  ;;  %v2264_v2 = vpop.f32.mrf.mxu0  ;;  %v3372_v4 = vrot.slane %v7417_v47, 2  ;;  %vm8225_vm1 = vmmov %vm8224_vm2 }
 0x391   : > { %v2048_v50 = vpop.f32.mrf.mxu3 }
 0x392   : > { %v2074_v37 = vadd.f32 %v2048_v50, %v1861_v62  ;;  %3198 = vrot.lane.b32.xlu1 %v3195_v51, %s4035_s29  ;;  %3209 = vrot.lane.b32.xlu2 %v3206_v63, %s4036_s30  ;;  %v2687_v51 = vpop.f32.mrf.mxu2  ;;  %v3232_v21 = vsel %vm362_vm0, %v3150_v39, %v3231_v42  ;;  %v3990_v39 = vld [vmem:[%s4100_s24 + $0x1c8] sm:$0xff] }
 0x393   : > { %3187 = vrot.lane.b32.xlu0 %v3184_v57, %s4034_s28  ;;  %v3217_v57 = vsel %vm8223_vm4, %v8222_v38, %v3216_v40  ;;  %v2822_v40 = vsel %vm1169_vm7, %v3990_v39, %v2729_v30  ;;  %v3240_v30 = vsel %vm8224_vm2, %v3161_v61, %v3239_v25  ;;  %v3404_v25 = vrot.slane %v7414_v49, 5 }
 0x394   : > { %v2287_v52 = vadd.f32 %v2261_v22, %v2074_v37  ;;  %v2751_v33 = vpop.permute.xlu1 %2750  ;;  %v7399_v43 = vpop.permute.xlu2 %2961  ;;  %v3360_v37 = vrot.slane %v7414_v49, 1  ;;  %vm8226_vm4 = vcmask 1044480   ;;  %vm8227_vm2 = vcmask 1042432  }
 0x395   : > { %v2816_v48 = vpop.permute.xlu0 %2815 }
 0x396   : > { %v2500_v13 = vadd.f32 %v2474_v55, %v2287_v52  ;;  %3841 = vmatmul.msk.f32.gmra.mxu3 %vm1462_vm5, %v7159_v35  ;;  %v7402_v22 = vsel %vm1322_vm15, %v2837_v10, %v2816_v48  ;;  %v3361_v55 = vrot.slane %v7417_v47, 1  ;;  %v2824_v48 = vsel %vm1186_vm8, %v2822_v40, %v7278_v26 }
 0x397   : > { %3858 = vmatmul.msk.f32.gmra.mxu0 %vm1462_vm5, %v7402_v22  ;;  %3883 = vmatmul.msk.f32.gmra.mxu2 %vm1462_vm5, %v6746_v18  ;;  %v2477_v18 = vpop.f32.mrf.mxu1 }
 0x398   : > { %v7407_v62 = vadd.f32 %v2687_v51, %v2500_v13  ;;  %3873 = vmatmul.msk.f32.gmra.mxu1 %vm1462_vm5, %v7402_v22  ;;  %v2826_v51 = vsel %vm1203_vm10, %v2824_v48, %v2751_v33  ;;  %v3394_v33 = vrot.slane %v7417_v47, 4 }
 0x399   : > { %v2051_v63 = vpop.f32.mrf.mxu3  ;;  %v2828_v61 = vsel %vm1220_vm9, %v2826_v51, %v7310_v8 }
 0x39a   : > { %v2075_v50 = vadd.f32 %v2051_v63, %v6821_v34  ;;  %3226 = vrot.lane.b32.xlu1 %v7295_v5, %s4038_s5  ;;  %3235 = vrot.lane.b32.xlu2 %v3232_v21, %s4039_s6  ;;  %v3371_v34 = vrot.slane %v7414_v49, 2  ;;  %v3393_v5 = vrot.slane %v7414_v49, 4  ;;  %v3383_v63 = vrot.slane %v7417_v47, 3 }
 0x39b   : > { %3220 = vrot.lane.b32.xlu0 %v3217_v57, %s4037_s4  ;;  %v2267_v57 = vpop.f32.mrf.mxu0 }
 0x39c   : > { %v2288_v52 = vadd.f32 %v2264_v2, %v2075_v50  ;;  %v2784_v42 = vpop.permute.xlu1 %2783  ;;  %v7439_v13 = vpop.permute.xlu2 %2994  ;;  %v3362_v2 = vsel %vm362_vm0, %v3360_v37, %v3361_v55  ;;  %v3373_v38 = vsel %vm8225_vm1, %v3371_v34, %v3372_v4  ;;  %v3405_v37 = vrot.slane %v7417_v47, 5 }
 0x39d   : > { %v2773_v10 = vpop.permute.xlu0 %2772  ;;  %vm8228_vm1 = vcmask 1040384  }
 0x39e   : > { %3842 = vmatmul.msk.f32.gmra.mxu3 %vm1462_vm5, %v7281_v46  ;;  %v7437_v28 = vadd.f32 %v2477_v18, %v2288_v52  ;;  %v2830_v50 = vsel %vm1237_vm11, %v2828_v61, %v2773_v10  ;;  %v3395_v10 = vsel %vm629_vm3, %v3393_v5, %v3394_v33  ;;  %v3416_v5 = vrot.slane %v7417_v47, 6 }
 0x39f   : > { %3884 = vmatmul.msk.f32.gmra.mxu2 %vm1462_vm5, %v6942_v32  ;;  %v3382_v32 = vrot.slane %v7414_v49, 3  ;;  %v2480_v39 = vpop.f32.mrf.mxu1  ;;  %v2832_v34 = vsel %vm1254_vm13, %v2830_v50, %v2784_v42 }
 0x3a0   : > { %v2834_v42 = vsel %vm1271_vm12, %v2832_v34, %v7336_v59 }
 0x3a1   : > { %v2054_v21 = vpop.f32.mrf.mxu3  ;;  %v3384_v48 = vsel %vm8226_vm4, %v3382_v32, %v3383_v63  ;;  %vm8229_vm4 = vcmask 1041408  }
 0x3a2   : > { %v2076_v26 = vadd.f32 %v2054_v21, %v6861_v41  ;;  %3243 = vrot.lane.b32.xlu1 %v3240_v30, %s4040_s7  ;;  %3376 = vrot.lane.b32.xlu2 %v3373_v38, %s4032_s26  ;;  %v3406_v30 = vsel %vm8227_vm2, %v3404_v25, %v3405_v37  ;;  %vm8230_vm2 = vcmask 1045504  }
 0x3a3   : > { %3365 = vrot.lane.b32.xlu0 %v3362_v2, %s4031_s25  ;;  %v2270_v2 = vpop.f32.mrf.mxu0 }
 0x3a4   : > { %v2289_v41 = vadd.f32 %v2267_v57, %v2076_v26  ;;  %v2810_v18 = vpop.permute.xlu1 %2809  ;;  %v7470_v8 = vpop.permute.xlu2 %2941  ;;  %v3426_v57 = vrot.slane %v7414_v49, 7  ;;  %v3415_v26 = vrot.slane %v7414_v49, 6 }
 0x3a5   : > { %v2801_v40 = vpop.permute.xlu0 %2800 }
 0x3a6   : > { %3843 = vmatmul.msk.f32.gmra.mxu3 %vm1462_vm5, %v7402_v22  ;;  %v7472_v52 = vadd.f32 %v2480_v39, %v2289_v41  ;;  %v2836_v21 = vsel %vm1288_vm14, %v2834_v42, %v2801_v40  ;;  %v3417_v40 = vsel %vm8229_vm4, %v3415_v26, %v3416_v5 }
 0x3a7   : > { %3885 = vmatmul.msk.f32.gmra.mxu2 %vm1462_vm5, %v7021_v9  ;;  %v3427_v9 = vrot.slane %v7417_v47, 7 }
 0x3a9   : > { %v2057_v51 = vpop.f32.mrf.mxu3  ;;  %v3428_v39 = vsel %vm8228_vm1, %v3426_v57, %v3427_v9  ;;  %vm8231_vm1 = vcmask 1044480  }
 0x3aa   : > { %v2077_v38 = vadd.f32 %v2057_v51, %v6908_v44  ;;  %3398 = vrot.lane.b32.xlu1 %v3395_v10, %s4034_s28  ;;  %3409 = vrot.lane.b32.xlu2 %v3406_v30, %s4035_s29  ;;  %v2838_v44 = vsel %vm1305_vm6, %v2836_v21, %v2810_v18  ;;  %v7514_v18 = vld [vmem:[%s4100_s24 + $0x230] sm:$0xff] }
 0x3ab   : > { %3387 = vrot.lane.b32.xlu0 %v3384_v48, %s4033_s27  ;;  %v2273_v30 = vpop.f32.mrf.mxu0  ;;  %v3374_v21 = vrot.slane %v7514_v18, 2 }
 0x3ac   : > { %v2951_v59 = vpop.permute.xlu1 %2950  ;;  %v2290_v61 = vadd.f32 %v2270_v2, %v2077_v38  ;;  %v3029_v34 = vpop.permute.xlu2 %3028  ;;  %v3363_v2 = vrot.slane %v7514_v18, 1 }
 0x3ad   : > { %v2818_v32 = vpop.permute.xlu0 %2817 }
 0x3ae   : > { %v2483_v50 = vpop.f32.mrf.mxu1  ;;  %v7499_v41 = vsel %vm1322_vm15, %v2838_v44, %v2818_v32  ;;  %v3364_v26 = vsel %vm362_vm0, %v3361_v55, %v3363_v2  ;;  %v3385_v55 = vrot.slane %v7514_v18, 3 }
 0x3af   : > { %v7501_v25 = vadd.f32 %v2483_v50, %v2290_v61  ;;  %3844 = vmatmul.msk.f32.gmra.mxu3 %vm1462_vm5, %v7499_v41  ;;  %3859 = vmatmul.msk.f32.gmra.mxu0 %vm1462_vm5, %v7499_v41 }
 0x3b0   : > { %3874 = vmatmul.msk.f32.gmra.mxu1 %vm1462_vm5, %v7499_v41  ;;  %3886 = vmatmul.msk.f32.gmra.mxu2 %vm1462_vm5, %v7159_v35 }
 0x3b1   : > { %v2060_v10 = vpop.f32.mrf.mxu3 }
 0x3b2   : > { %v2078_v48 = vadd.f32 %v2060_v10, %v6959_v6  ;;  %3431 = vrot.lane.b32.xlu1 %v3428_v39, %s4037_s4  ;;  %3437 = vrot.lane.b32.xlu2 %v7417_v47, %s4038_s5  ;;  %v3034_v6 = vsel %vm1169_vm7, %v6913_v7, %v7369_v0  ;;  %v3375_v7 = vsel %vm8230_vm2, %v3372_v4, %v3374_v21  ;;  %vm8233_vm2 = vcmask 1040384  }
 0x3b3   : > { %3420 = vrot.lane.b32.xlu0 %v3417_v40, %s4036_s30  ;;  %v3036_v44 = vsel %vm1186_vm8, %v3034_v6, %v2951_v59  ;;  %v3386_v4 = vsel %vm8231_vm1, %v3383_v63, %v3385_v55  ;;  %v3407_v63 = vrot.slane %v7514_v18, 5  ;;  %v270_v55 = vld [vmem:[%s4100_s24 + $0x238] sm:$0x3]  ;;  %vm8234_vm1 = vcmask 1045504   ;;  %s3703_s24 = sshll.u32 %s4013_s12, 3 }
 0x3b4   : > { %v2690_v51 = vpop.f32.mrf.mxu2  ;;  %v2984_v42 = vpop.permute.xlu1 %2983  ;;  %v2291_v38 = vadd.f32 %v2273_v30, %v2078_v48  ;;  %v3038_v0 = vsel %vm1203_vm10, %v3036_v44, %v7399_v43  ;;  %p188_p6 = scmp.lt.s32.totalorder %s3703_s24, 15 }
 0x3b5   : > { %v7527_v57 = vadd.f32 %v2690_v51, %v7437_v28  ;;  %v2973_v35 = vpop.permute.xlu0 %2972  ;;  %v7538_v61 = vpop.permute.xlu2 %2985 }
 0x3b6   : > { %v3040_v28 = vsel %vm1220_vm9, %v3038_v0, %v2973_v35  ;;  %s8288_s24 = smov (!%p188_p6, %s3703_s24), 15 }
 0x3b7   : > { %v3042_v40 = vsel %vm1237_vm11, %v3040_v28, %v2984_v42  ;;  %s3704_s12 = sshll.u32 %s8288_s24, 1 }
 0x3b8   : > { %3887 = vmatmul.msk.f32.gmra.mxu2 %vm1462_vm5, %v7281_v46  ;;  %v3396_v46 = vrot.slane %v7514_v18, 4  ;;  %v3044_v48 = vsel %vm1254_vm13, %v3042_v40, %v7439_v13  ;;  %v3429_v13 = vrot.slane %v7514_v18, 7 }
 0x3ba   : > { %3446 = vrot.lane.b32.xlu1 %v3364_v26, %s4039_s6  ;;  %3378 = vrot.lane.b32.xlu2 %v3375_v7, %s4032_s26  ;;  %v3397_v10 = vsel %vm629_vm3, %v3394_v33, %v3396_v46  ;;  %vm8232_vm3 = vcmask 1042432   ;;  %v3430_v0 = vsel %vm8233_vm2, %v3427_v9, %v3429_v13  ;;  %v3035_v9 = vsel %vm1169_vm7, %v6916_v11, %v7470_v8 }
 0x3bb   : > { %3367 = vrot.lane.b32.xlu0 %v3364_v26, %s4031_s25  ;;  %v3408_v26 = vsel %vm8232_vm3, %v3405_v37, %v3407_v63  ;;  %s3705_s25 = sshll.u32 %s8286_s13, 5 }
 0x3bc   : > { %v3012_v59 = vpop.permute.xlu1 %3011  ;;  %s192_s26 = sadd.s32 %s3705_s25, %s3704_s12 }
 0x3bd   : > { %v2486_v32 = vpop.f32.mrf.mxu1  ;;  %v3006_v39 = vpop.permute.xlu0 %3005  ;;  %s3706_s13 = sshll.u32 %s192_s26, 3 }
 0x3be   : > { %v7554_v50 = vadd.f32 %v2486_v32, %v2291_v38  ;;  %v3014_v43 = vpop.permute.xlu2 %3013  ;;  %v3046_v30 = vsel %vm1271_vm12, %v3044_v48, %v3006_v39 }
 0x3bf   : > { %v3048_v38 = vsel %vm1288_vm14, %v3046_v30, %v3012_v59 }
 0x3c0   : > { %3888 = vmatmul.msk.f32.gmra.mxu2 %vm1462_vm5, %v7402_v22  ;;  %v3418_v22 = vrot.slane %v7514_v18, 6 }
 0x3c2   : > { %3389 = vrot.lane.b32.xlu1 %v3386_v4, %s4033_s27  ;;  %3400 = vrot.lane.b32.xlu2 %v3397_v10, %s4034_s28 }
 0x3c3   : > { %3454 = vrot.lane.b32.xlu0 %v3375_v7, %s4040_s7  ;;  %v2693_v51 = vpop.f32.mrf.mxu2 }
 0x3c4   : > { %v7573_v33 = vadd.f32 %v2693_v51, %v7472_v52  ;;  %v2953_v42 = vpop.permute.xlu1 %2952  ;;  %v3419_v52 = vsel %vm8229_vm4, %v3416_v5, %v3418_v22  ;;  %v3444_v5 = vrot.slane %v270_v55, 1 }
 0x3c5   : > { %v3021_v35 = vpop.permute.xlu0 %3020  ;;  %v3037_v59 = vsel %vm1186_vm8, %v3035_v9, %v2953_v42 }
 0x3c6   : > { %v3050_v6 = vsel %vm1305_vm6, %v3048_v38, %v3021_v35  ;;  %v3031_v44 = vpop.permute.xlu2 %3030  ;;  %v3445_v46 = vsel %vm362_vm0, %v3363_v2, %v3444_v5  ;;  %v2867_v38 = vpop.f32.mrf.mxu3  ;;  %v1606_v35 = vadd.f32 %v6317_v1, %v6294_v27  ;;  %v1609_v1 = vadd.f32 %v6345_v15, %v6330_v12 }
 0x3c7   : > { %v3052_v7 = vsel %vm1322_vm15, %v3050_v6, %v3029_v34  ;;  %v3452_v34 = vrot.slane %v270_v55, 2  ;;  %v3080_v6 = vpop.f32.mrf.mxu0 }
 0x3c8   : > { %3889 = vmatmul.msk.f32.gmra.mxu2 %vm1462_vm5, %v7499_v41  ;;  %3860 = vmatmul.msk.f32.gmra.mxu0 %vm1462_vm5, %v3052_v7 }
 0x3c9   : > { %3875 = vmatmul.msk.f32.gmra.mxu1 %vm1462_vm5, %v3052_v7  ;;  %v3453_v32 = vsel %vm8234_vm1, %v3374_v21, %v3452_v34 }
 0x3ca   : > { %3422 = vrot.lane.b32.xlu1 %v3419_v52, %s4036_s30  ;;  %3433 = vrot.lane.b32.xlu2 %v3430_v0, %s4037_s4  ;;  %v1850_v52 = vadd.f32 %v6335_v45, %v1606_v35  ;;  %v1851_v45 = vadd.f32 %v6360_v56, %v1609_v1  ;;  %v8236_v56 = vld [vmem:[#allocation17_spill] sm:$0xff]  ;;  %v8239_v35 = vld [vmem:[#allocation8_spill] sm:$0xff]  ;;  %s7680_s4 = scalar_lea.vmem %s7813_s3, %s3706_s13 }
 0x3cb   : > { %3411 = vrot.lane.b32.xlu0 %v3408_v26, %s4035_s29 }
 0x3cc   : > { %v2975_v37 = vpop.permute.xlu1 %2974  ;;  %v2063_v55 = vadd.f32 %v6994_v60, %v1850_v52 }
 0x3cd   : > { %v2964_v28 = vpop.permute.xlu0 %2963 }
 0x3ce   : > { %v3186_v41 = vpop.permute.xlu2 %3185  ;;  %v3039_v39 = vsel %vm1203_vm10, %v3037_v59, %v2964_v28  ;;  %v2870_v34 = vpop.f32.mrf.mxu3 }
 0x3cf   : > { %v3041_v11 = vsel %vm1220_vm9, %v3039_v39, %v2975_v37  ;;  %v3083_v9 = vpop.f32.mrf.mxu0  ;;  %v8235_v39 = vld [vmem:[#allocation18_spill] sm:$0xff] }
 0x3d0   : > { %3890 = vmatmul.msk.f32.gmra.mxu2 %vm1462_vm5, %v3052_v7  ;;  %v3043_v2 = vsel %vm1237_vm11, %v3041_v11, %v7538_v61 }
 0x3d2   : > { %3448 = vrot.lane.b32.xlu1 %v3445_v46, %s4039_s6  ;;  %3456 = vrot.lane.b32.xlu2 %v3453_v32, %s4040_s7  ;;  %v2064_v32 = vadd.f32 %v7038_v17, %v1851_v45 }
 0x3d3   : > { %3439 = vrot.lane.b32.xlu0 %v7514_v18, %s4038_s5 }
 0x3d4   : > { %v3008_v8 = vpop.permute.xlu1 %3007 }
 0x3d5   : > { %v2997_v40 = vpop.permute.xlu0 %2996 }
 0x3d6   : > { %v3045_v21 = vsel %vm1254_vm13, %v3043_v2, %v2997_v40  ;;  %v3219_v4 = vpop.permute.xlu2 %3218  ;;  %v2277_v2 = vadd.f32 %v6900_v36, %v2064_v32  ;;  %v8244_v32 = vld [vmem:[#allocation47_spill] sm:$0xff] }
 0x3d7   : > { %v3047_v10 = vsel %vm1271_vm12, %v3045_v21, %v3008_v8  ;;  %v3086_v36 = vpop.f32.mrf.mxu0 }
 0x3d8   : > { %v3049_v30 = vsel %vm1288_vm14, %v3047_v10, %v3014_v43  ;;  %v2873_v10 = vpop.f32.mrf.mxu3 }
 0x3dc   : > { %v3153_v48 = vpop.permute.xlu1 %3152 }
 0x3dd   : > { %v3023_v18 = vpop.permute.xlu0 %3022  ;;  %v3247_v26 = vsel %vm1169_vm7, %v7183_v14, %v3153_v48  ;;  %v2276_v14 = vadd.f32 %v6836_v31, %v2063_v55  ;;  %v8237_v31 = vld [vmem:[#allocation5_spill] sm:$0xff]  ;;  %v8238_v48 = vld [vmem:[#allocation20_spill] sm:$0xff] }
 0x3de   : > { %v3051_v51 = vsel %vm1305_vm6, %v3049_v30, %v3023_v18  ;;  %v3234_v22 = vpop.permute.xlu2 %3233  ;;  %v1612_v40 = vadd.f32 %v8237_v31, %v8236_v56  ;;  %v8245_v56 = vld [vmem:[#allocation30_spill] sm:$0xff]  ;;  %v8246_v31 = vld [vmem:[#allocation40_spill] sm:$0xff] }
 0x3df   : > { %v3053_v63 = vsel %vm1322_vm15, %v3051_v51, %v3031_v44  ;;  %v3293_v44 = vpop.f32.mrf.mxu1 }
 0x3e0   : > { %3861 = vmatmul.msk.f32.gmra.mxu0 %vm1462_vm5, %v3053_v63  ;;  %3876 = vmatmul.msk.f32.gmra.mxu1 %vm1462_vm5, %v3053_v63  ;;  %v1852_v30 = vadd.f32 %v8238_v48, %v1612_v40  ;;  %v1618_v40 = vadd.f32 %v8246_v31, %v8245_v56  ;;  %v8257_v56 = vld [vmem:[#allocation3_spill] sm:$0xff] }
 0x3e1   : > { %v2696_v42 = vpop.f32.mrf.mxu2  ;;  %3891 = vmatmul.msk.f32.gmra.mxu2 %vm1462_vm5, %v3053_v63 }
 0x3e2   : > { %v7623_v61 = vadd.f32 %v2696_v42, %v7501_v25 }
 0x3e4   : > { %v3175_v13 = vpop.permute.xlu1 %3174 }
 0x3e5   : > { %v3164_v43 = vpop.permute.xlu0 %3163 }
 0x3e6   : > { %v3249_v7 = vsel %vm1186_vm8, %v3247_v26, %v3164_v43  ;;  %v7631_v25 = vpop.permute.xlu2 %3176  ;;  %v8240_v26 = vld [vmem:[#allocation28_spill] sm:$0xff] }
 0x3e7   : > { %v3251_v37 = vsel %vm1203_vm10, %v3249_v7, %v3175_v13  ;;  %v3296_v60 = vpop.f32.mrf.mxu1  ;;  %v2065_v13 = vadd.f32 %v7064_v3, %v1852_v30  ;;  %v1615_v7 = vadd.f32 %v8240_v26, %v8239_v35  ;;  %v8251_v35 = vld [vmem:[#allocation84_spill] sm:$0xff] }
 0x3e8   : > { %v3253_v27 = vsel %vm1220_vm9, %v3251_v37, %v3186_v41  ;;  %v2489_v41 = vadd.f32 %v8235_v39, %v2276_v14  ;;  %v2876_v14 = vpop.f32.mrf.mxu3 }
 0x3e9   : > { %v2278_v52 = vadd.f32 %v6956_v23, %v2065_v13 }
 0x3ea   : > { %v2702_v21 = vadd.f32 %v6918_v53, %v2489_v41  ;;  %v2490_v53 = vadd.f32 %v6935_v29, %v2277_v2  ;;  %v7671_v29 = vld [vmem:[%s7812_s2] ss:$0 sm:$0xff]  ;;  %v3089_v41 = vpop.f32.mrf.mxu0  ;;  %v8247_v2 = vld [vmem:[#allocation56_spill] sm:$0xff] }
 0x3eb   : > { %v2491_v39 = vadd.f32 %v8244_v32, %v2278_v52  ;;  %v8256_v32 = vld [vmem:[#allocation19_spill] sm:$0xff] }
 0x3ec   : > { %v3208_v0 = vpop.permute.xlu1 %3207  ;;  %v2915_v18 = vadd.f32 %v2867_v38, %v2702_v21 }
 0x3ed   : > { %v3197_v5 = vpop.permute.xlu0 %3196 }
 0x3ee   : > { %v3255_v28 = vsel %vm1237_vm11, %v3253_v27, %v3197_v5  ;;  %v7645_v8 = vpop.permute.xlu2 %3209 }
 0x3ef   : > { %v3257_v46 = vsel %vm1254_vm13, %v3255_v28, %v3208_v0  ;;  %v3299_v38 = vpop.f32.mrf.mxu1  ;;  %v8241_v0 = vld [vmem:[#allocation23_spill] sm:$0xff] }
 0x3f0   : > { %v3259_v12 = vsel %vm1271_vm12, %v3257_v46, %v3219_v4  ;;  %v2703_v55 = vadd.f32 %v8241_v0, %v2490_v53 }
 0x3f2   : > { %v2916_v1 = vadd.f32 %v2870_v34, %v2703_v55 }
 0x3f4   : > { %v3155_v59 = vpop.permute.xlu1 %3154 }
 0x3f5   : > { %v3225_v11 = vpop.permute.xlu0 %3224  ;;  %v3248_v37 = vsel %vm1169_vm7, %v7186_v54, %v3155_v59 }
 0x3f6   : > { %v3261_v15 = vsel %vm1288_vm14, %v3259_v12, %v3225_v11  ;;  %v3129_v11 = vadd.f32 %v3083_v9, %v2916_v1 }
 0x3f7   : > { %v3263_v51 = vsel %vm1305_vm6, %v3261_v15, %v3234_v22  ;;  %v3128_v22 = vadd.f32 %v3080_v6, %v2915_v18  ;;  %v8242_v6 = vld [vmem:[#allocation33_spill] sm:$0xff]  ;;  %v3302_v15 = vpop.f32.mrf.mxu1 }
 0x3f8   : > { %v1853_v27 = vadd.f32 %v8242_v6, %v1615_v7  ;;  %v3342_v30 = vadd.f32 %v3296_v60, %v3129_v11  ;;  %v2879_v7 = vpop.f32.mrf.mxu3 }
 0x3f9   : > { %v3341_v3 = vadd.f32 %v3293_v44, %v3128_v22  ;;  %v8243_v44 = vld [vmem:[#allocation46_spill] sm:$0xff] }
 0x3fa   : > { %v2699_v17 = vpop.f32.mrf.mxu2  ;;  %v2066_v46 = vadd.f32 %v8243_v44, %v1853_v27  ;;  %v8254_v27 = vld [vmem:[#allocation6_spill] sm:$0xff] }
 0x3fb   : > { %v7656_v63 = vadd.f32 %v2699_v17, %v7554_v50  ;;  %v3236_v50 = vpop.permute.xlu2 %3235  ;;  %v8248_v17 = vld [vmem:[#allocation59_spill] sm:$0xff] }
 0x3fc   : > { %v3242_v4 = vpop.permute.xlu1 %3241  ;;  %v2279_v21 = vadd.f32 %v8247_v2, %v2066_v46  ;;  %v2704_v48 = vadd.f32 %v8248_v17, %v2491_v39 }
 0x3fd   : > { %v3265_v42 = vsel %vm1322_vm15, %v3263_v51, %v3242_v4  ;;  %v3166_v43 = vpop.permute.xlu0 %3165  ;;  %v8249_v4 = vld [vmem:[#allocation44_spill] sm:$0xff] }
 0x3fe   : > { %3877 = vmatmul.msk.f32.gmra.mxu1 %vm1462_vm5, %v3265_v42  ;;  %3892 = vmatmul.msk.f32.gmra.mxu2 %vm1462_vm5, %v3265_v42  ;;  %v3250_v28 = vsel %vm1186_vm8, %v3248_v37, %v3166_v43  ;;  %v1854_v9 = vadd.f32 %v8249_v4, %v1618_v40  ;;  %v2917_v42 = vadd.f32 %v2873_v10, %v2704_v48  ;;  %v8250_v43 = vld [vmem:[#allocation68_spill] sm:$0xff]  ;;  %v8252_v10 = vld [vmem:[#allocation43_spill] sm:$0xff]  ;;  %v8261_v4 = vld [vmem:[#allocation2_spill] sm:$0xff] }
 0x3ff   : > { %v3252_v34 = vsel %vm1203_vm10, %v3250_v28, %v7631_v25  ;;  %v2492_v26 = vadd.f32 %v8251_v35, %v2279_v21  ;;  %v3092_v28 = vpop.f32.mrf.mxu0  ;;  %v3305_v46 = vpop.f32.mrf.mxu1  ;;  %v8258_v40 = vld [vmem:[#allocation11_spill] sm:$0xff] }
 0x400   : > { %v2067_v22 = vadd.f32 %v8250_v43, %v1854_v9  ;;  %v8262_v9 = vld [vmem:[#allocation32_spill] sm:$0xff] }
 0x402   : > { %v3506_v5 = vpop.f32.mrf.mxu2  ;;  %v2280_v1 = vadd.f32 %v8254_v27, %v2067_v22 }
 0x403   : > { %v3554_v23 = vadd.f32 %v3506_v5, %v3341_v3  ;;  %v7693_v18 = vpop.permute.xlu2 %3376  ;;  %v3130_v3 = vadd.f32 %v3086_v36, %v2917_v42  ;;  %v8253_v5 = vld [vmem:[#allocation45_spill] sm:$0xff]  ;;  %v1624_v42 = vadd.f32 %v8262_v9, %v8261_v4 }
 0x404   : > { %v3199_v45 = vpop.permute.xlu1 %3198  ;;  %v1621_v6 = vadd.f32 %v8253_v5, %v8252_v10  ;;  %v2493_v2 = vadd.f32 %v8258_v40, %v2280_v1  ;;  %v8265_v5 = vld [vmem:[#allocation75_spill] sm:$0xff] }
 0x405   : > { %v3573_v54 = vadd.f32 %v7671_v29, %v3554_v23  ;;  %v3188_v59 = vpop.permute.xlu0 %3187  ;;  %v8255_v23 = vld [vmem:[#allocation87_spill] sm:$0xff]  ;;  %v3343_v44 = vadd.f32 %v3299_v38, %v3130_v3 }
 0x406   : > { %v3254_v12 = vsel %vm1220_vm9, %v3252_v34, %v3188_v59  ;;  %v1855_v39 = vadd.f32 %v8256_v32, %v1621_v6 }
 0x407   : > { %3589 = vst [vmem:[%s7680_s4] sm:$0xff] %v3573_v54  ;;  %v3256_v51 = vsel %vm1237_vm11, %v3254_v12, %v3199_v45  ;;  %v2705_v45 = vadd.f32 %v8255_v23, %v2492_v26  ;;  %v8263_v26 = vld [vmem:[#allocation66_spill] sm:$0xff]  ;;  %v8267_v23 = vld [vmem:[#allocation69_spill] sm:$0xff] }
 0x408   : > { %v3258_v52 = vsel %vm1254_vm13, %v3256_v51, %v7645_v8  ;;  %v2068_v31 = vadd.f32 %v8257_v56, %v1855_v39 }
 0x409   : > { %v2918_v54 = vadd.f32 %v2876_v14, %v2705_v45  ;;  %v2882_v14 = vpop.f32.mrf.mxu3 }
 0x40a   : > { %v3509_v25 = vpop.f32.mrf.mxu2 }
 0x40b   : > { %v3555_v13 = vadd.f32 %v3509_v25, %v3342_v30  ;;  %v3410_v11 = vpop.permute.xlu2 %3409  ;;  %v3131_v17 = vadd.f32 %v3089_v41, %v2918_v54  ;;  %v8260_v30 = vld [vmem:[#allocation50_spill] sm:$0xff]  ;;  %v8264_v41 = vld [vmem:[#allocation15_spill] sm:$0xff] }
 0x40c   : > { %v3227_v53 = vpop.permute.xlu1 %3226  ;;  %v2706_v51 = vadd.f32 %v8260_v30, %v2493_v2  ;;  %v8272_v30 = vld [vmem:[#allocation22_spill] sm:$0xff] }
 0x40d   : > { %v3574_v60 = vadd.f32 %v7671_v29, %v3555_v13  ;;  %v3221_v0 = vpop.permute.xlu0 %3220  ;;  %v3344_v25 = vadd.f32 %v3302_v15, %v3131_v17 }
 0x40e   : > { %v3260_v55 = vsel %vm1271_vm12, %v3258_v52, %v3221_v0  ;;  %v2919_v43 = vadd.f32 %v2879_v7, %v2706_v51  ;;  %v1856_v52 = vadd.f32 %v8263_v26, %v1624_v42  ;;  %v8266_v7 = vld [vmem:[#allocation36_spill] sm:$0xff] }
 0x40f   : > { %3590 = vst [vmem:[%s7680_s4 + $0x8] sm:$0xff] %v3574_v60  ;;  %v3262_v37 = vsel %vm1288_vm14, %v3260_v55, %v3227_v53  ;;  %v3095_v53 = vpop.f32.mrf.mxu0  ;;  %v3308_v60 = vpop.f32.mrf.mxu1  ;;  %v1627_v45 = vadd.f32 %v8267_v23, %v8266_v7 }
 0x410   : > { %v3264_v36 = vsel %vm1305_vm6, %v3262_v37, %v3236_v50  ;;  %v8259_v50 = vld [vmem:[#allocation35_spill] sm:$0xff]  ;;  %v2069_v10 = vadd.f32 %v7226_v20, %v1856_v52  ;;  %v3132_v15 = vadd.f32 %v3092_v28, %v2919_v43 }
 0x411   : > { %v2281_v48 = vadd.f32 %v8259_v50, %v2068_v31  ;;  %v2885_v1 = vpop.f32.mrf.mxu3  ;;  %v8269_v20 = vld [vmem:[#allocation7_spill] sm:$0xff]  ;;  %v8271_v50 = vld [vmem:[#allocation78_spill] sm:$0xff] }
 0x412   : > { %v3512_v8 = vpop.f32.mrf.mxu2  ;;  %v3345_v27 = vadd.f32 %v3305_v46, %v3132_v15  ;;  %v1857_v28 = vadd.f32 %v8269_v20, %v1627_v45  ;;  %v8270_v31 = vld [vmem:[#allocation27_spill] sm:$0xff] }
 0x413   : > { %v3556_v59 = vadd.f32 %v3512_v8, %v3343_v44  ;;  %v2494_v0 = vadd.f32 %v8264_v41, %v2281_v48  ;;  %v3438_v37 = vpop.permute.xlu2 %3437  ;;  %v8268_v44 = vld [vmem:[#allocation98_spill] sm:$0xff] }
 0x414   : > { %v3244_v34 = vpop.permute.xlu1 %3243  ;;  %v2282_v8 = vadd.f32 %v8268_v44, %v2069_v10  ;;  %v2070_v56 = vadd.f32 %v7258_v24, %v1857_v28 }
 0x415   : > { %v3266_v12 = vsel %vm1322_vm15, %v3264_v36, %v3244_v34  ;;  %v3575_v21 = vadd.f32 %v7671_v29, %v3556_v59  ;;  %v3366_v38 = vpop.permute.xlu0 %3365  ;;  %v2707_v6 = vadd.f32 %v8265_v5, %v2494_v0 }
 0x416   : > { %3878 = vmatmul.msk.f32.gmra.mxu1 %vm1462_vm5, %v3266_v12  ;;  %3893 = vmatmul.msk.f32.gmra.mxu2 %vm1462_vm5, %v3266_v12  ;;  %v3460_v54 = vsel %vm1169_vm7, %v7414_v49, %v3366_v38  ;;  %v2495_v40 = vadd.f32 %v8270_v31, %v2282_v8  ;;  %v2283_v48 = vadd.f32 %v8271_v50, %v2070_v56 }
 0x417   : > { %3591 = vst [vmem:[%s7680_s4 + $0x10] sm:$0xff] %v3575_v21  ;;  %v2920_v39 = vadd.f32 %v2882_v14, %v2707_v6  ;;  %v3098_v34 = vpop.f32.mrf.mxu0  ;;  %v3311_v2 = vpop.f32.mrf.mxu1  ;;  %v3462_v21 = vsel %vm1186_vm8, %v3460_v54, %v7693_v18 }
 0x418   : > { %v2708_v51 = vadd.f32 %v8272_v30, %v2495_v40 }
 0x419   : > { %v3133_v17 = vadd.f32 %v3095_v53, %v2920_v39  ;;  %v2888_v4 = vpop.f32.mrf.mxu3 }
 0x41a   : > { %v3515_v13 = vpop.f32.mrf.mxu2 }
 0x41b   : > { %v3557_v22 = vadd.f32 %v3515_v13, %v3344_v25  ;;  %v3379_v49 = vpop.permute.xlu2 %3378  ;;  %v3346_v38 = vadd.f32 %v3308_v60, %v3133_v17  ;;  %v2921_v13 = vadd.f32 %v2885_v1, %v2708_v51 }
 0x41c   : > { %v3399_v35 = vpop.permute.xlu1 %3398 }
 0x41d   : > { %v3576_v55 = vadd.f32 %v7671_v29, %v3557_v22  ;;  %v3388_v3 = vpop.permute.xlu0 %3387  ;;  %v8273_v22 = vld [vmem:[#allocation31_spill] sm:$0xff]  ;;  %v3134_v41 = vadd.f32 %v3098_v34, %v2921_v13 }
 0x41e   : > { %v3464_v14 = vsel %vm1203_vm10, %v3462_v21, %v3388_v3  ;;  %v2496_v26 = vadd.f32 %v8273_v22, %v2283_v48  ;;  %v8274_v3 = vld [vmem:[#allocation95_spill] sm:$0xff] }
 0x41f   : > { %3592 = vst [vmem:[%s7680_s4 + $0x18] sm:$0xff] %v3576_v55  ;;  %v3466_v25 = vsel %vm1220_vm9, %v3464_v14, %v3399_v35  ;;  %v3101_v60 = vpop.f32.mrf.mxu0  ;;  %v3314_v0 = vpop.f32.mrf.mxu1  ;;  %v3347_v15 = vadd.f32 %v3311_v2, %v3134_v41 }
 0x420   : > { %v3468_v18 = vsel %vm1237_vm11, %v3466_v25, %v3410_v11  ;;  %v2709_v10 = vadd.f32 %v8274_v3, %v2496_v26 }
 0x421   : > { %v2891_v7 = vpop.f32.mrf.mxu3 }
 0x422   : > { %v3518_v32 = vpop.f32.mrf.mxu2  ;;  %v2922_v6 = vadd.f32 %v2888_v4, %v2709_v10 }
 0x423   : > { %v3558_v36 = vadd.f32 %v3518_v32, %v3345_v27  ;;  %v3401_v55 = vpop.permute.xlu2 %3400 }
 0x424   : > { %v3432_v59 = vpop.permute.xlu1 %3431  ;;  %v3135_v39 = vadd.f32 %v3101_v60, %v2922_v6 }
 0x425   : > { %v3577_v12 = vadd.f32 %v7671_v29, %v3558_v36  ;;  %v3421_v46 = vpop.permute.xlu0 %3420 }
 0x426   : > { %v3470_v52 = vsel %vm1254_vm13, %v3468_v18, %v3421_v46  ;;  %v3348_v36 = vadd.f32 %v3314_v0, %v3135_v39 }
 0x427   : > { %3593 = vst [vmem:[%s7680_s4 + $0x20] sm:$0xff] %v3577_v12  ;;  %v3472_v35 = vsel %vm1271_vm12, %v3470_v52, %v3432_v59  ;;  %v3104_v54 = vpop.f32.mrf.mxu0  ;;  %v2923_v12 = vadd.f32 %v2891_v7, %v7320_v19 }
 0x428   : > { %v3474_v27 = vsel %vm1288_vm14, %v3472_v35, %v3438_v37  ;;  %v3317_v37 = vpop.f32.mrf.mxu1 }
 0x429   : > { %v2894_v2 = vpop.f32.mrf.mxu3  ;;  %v3136_v17 = vadd.f32 %v3104_v54, %v2923_v12 }
 0x42a   : > { %v3521_v24 = vpop.f32.mrf.mxu2  ;;  %v2924_v19 = vadd.f32 %v2894_v2, %v7352_v16 }
 0x42b   : > { %v3559_v9 = vadd.f32 %v3521_v24, %v3346_v38  ;;  %v3434_v34 = vpop.permute.xlu2 %3433  ;;  %v3349_v14 = vadd.f32 %v3317_v37, %v3136_v17 }
 0x42c   : > { %v3447_v42 = vpop.permute.xlu1 %3446 }
 0x42d   : > { %v3578_v53 = vadd.f32 %v7671_v29, %v3559_v9  ;;  %v3368_v43 = vpop.permute.xlu0 %3367  ;;  %v3476_v23 = vsel %vm1305_vm6, %v3474_v27, %v3447_v42 }
 0x42e   : > { %v3461_v32 = vsel %vm1169_vm7, %v7417_v47, %v3368_v43 }
 0x42f   : > { %3594 = vst [vmem:[%s7680_s4 + $0x28] sm:$0xff] %v3578_v53  ;;  %v3463_v59 = vsel %vm1186_vm8, %v3461_v32, %v3379_v49  ;;  %v3107_v38 = vpop.f32.mrf.mxu0 }
 0x430   : > { %v3320_v48 = vpop.f32.mrf.mxu1  ;;  %v3137_v18 = vadd.f32 %v3107_v38, %v2924_v19 }
 0x431   : > { %v2897_v16 = vpop.f32.mrf.mxu3 }
 0x432   : > { %v3350_v43 = vadd.f32 %v3320_v48, %v3137_v18  ;;  %v2925_v26 = vadd.f32 %v2897_v16, %v7379_v58 }
 0x433   : > { %v3524_v5 = vpop.f32.mrf.mxu2  ;;  %v3457_v4 = vpop.permute.xlu2 %3456 }
 0x434   : > { %v3390_v11 = vpop.permute.xlu1 %3389  ;;  %v3560_v1 = vadd.f32 %v3524_v5, %v3347_v15 }
 0x435   : > { %v3455_v45 = vpop.permute.xlu0 %3454  ;;  %v3465_v20 = vsel %vm1203_vm10, %v3463_v59, %v3390_v11 }
 0x436   : > { %v3579_v44 = vadd.f32 %v7671_v29, %v3560_v1  ;;  %v3478_v8 = vsel %vm1322_vm15, %v3476_v23, %v3455_v45  ;;  %v3467_v47 = vsel %vm1220_vm9, %v3465_v20, %v3401_v55 }
 0x437   : > { %3894 = vmatmul.msk.f32.gmra.mxu2 %vm1462_vm5, %v3478_v8  ;;  %v3110_v41 = vpop.f32.mrf.mxu0 }
 0x438   : > { %3595 = vst [vmem:[%s7680_s4 + $0x30] sm:$0xff] %v3579_v44  ;;  %v3323_v0 = vpop.f32.mrf.mxu1  ;;  %v3138_v35 = vadd.f32 %v3110_v41, %v2925_v26 }
 0x439   : > { %v2900_v5 = vpop.f32.mrf.mxu3 }
 0x43a   : > { %v3351_v55 = vadd.f32 %v3323_v0, %v3138_v35  ;;  %v2926_v11 = vadd.f32 %v2900_v5, %v7407_v62 }
 0x43b   : > { %v3527_v28 = vpop.f32.mrf.mxu2 }
 0x43c   : > { %v3561_v46 = vadd.f32 %v3527_v28, %v3348_v36  ;;  %v3423_v56 = vpop.permute.xlu1 %3422 }
 0x43d   : > { %v3412_v31 = vpop.permute.xlu0 %3411 }
 0x43e   : > { %v3580_v40 = vadd.f32 %v7671_v29, %v3561_v46  ;;  %v3469_v21 = vsel %vm1237_vm11, %v3467_v47, %v3412_v31 }
 0x43f   : > { %v3471_v49 = vsel %vm1254_vm13, %v3469_v21, %v3423_v56  ;;  %v3113_v6 = vpop.f32.mrf.mxu0 }
 0x440   : > { %3596 = vst [vmem:[%s7680_s4 + $0x38] sm:$0xff] %v3580_v40  ;;  %v3473_v25 = vsel %vm1271_vm12, %v3471_v49, %v3434_v34  ;;  %v3326_v27 = vpop.f32.mrf.mxu1  ;;  %v3139_v58 = vadd.f32 %v3113_v6, %v2926_v11 }
 0x441   : > { %v2903_v44 = vpop.f32.mrf.mxu3 }
 0x442   : > { %v3352_v1 = vadd.f32 %v3326_v27, %v3139_v58  ;;  %v2927_v8 = vadd.f32 %v2903_v44, %v7527_v57 }
 0x443   : > { %v3530_v50 = vpop.f32.mrf.mxu2 }
 0x444   : > { %v3562_v30 = vadd.f32 %v3530_v50, %v3349_v14  ;;  %v3449_v51 = vpop.permute.xlu1 %3448 }
 0x445   : > { %v3440_v24 = vpop.permute.xlu0 %3439 }
 0x446   : > { %v3581_v9 = vadd.f32 %v7671_v29, %v3562_v30  ;;  %v3475_v42 = vsel %vm1288_vm14, %v3473_v25, %v3440_v24 }
 0x447   : > { %v3477_v13 = vsel %vm1305_vm6, %v3475_v42, %v3449_v51  ;;  %v3116_v32 = vpop.f32.mrf.mxu0 }
 0x448   : > { %3597 = vst [vmem:[%s7680_s4 + $0x40] sm:$0xff] %v3581_v9  ;;  %v3479_v53 = vsel %vm1322_vm15, %v3477_v13, %v3457_v4  ;;  %v3329_v39 = vpop.f32.mrf.mxu1  ;;  %v3140_v54 = vadd.f32 %v3116_v32, %v2927_v8 }
 0x449   : > { %3895 = vmatmul.msk.f32.gmra.mxu2 %vm1462_vm5, %v3479_v53  ;;  %v2906_v20 = vpop.f32.mrf.mxu3 }
 0x44a   : > { %v3353_v36 = vadd.f32 %v3329_v39, %v3140_v54  ;;  %v2928_v34 = vadd.f32 %v2906_v20, %v7573_v33 }
 0x44b   : > { %v3533_v22 = vpop.f32.mrf.mxu2 }
 0x44c   : > { %v3563_v52 = vadd.f32 %v3533_v22, %v3350_v43 }
 0x44e   : > { %v3582_v60 = vadd.f32 %v7671_v29, %v3563_v52 }
 0x44f   : > { %v3119_v28 = vpop.f32.mrf.mxu0 }
 0x450   : > { %3598 = vst [vmem:[%s7680_s4 + $0x48] sm:$0xff] %v3582_v60  ;;  %v3141_v46 = vadd.f32 %v3119_v28, %v2928_v34 }
 0x451   : > { %v2909_v40 = vpop.f32.mrf.mxu3 }
 0x452   : > { %v2929_v21 = vadd.f32 %v2909_v40, %v7623_v61 }
 0x453   : > { %v3536_v3 = vpop.f32.mrf.mxu2 }
 0x454   : > { %v3564_v10 = vadd.f32 %v3536_v3, %v3351_v55 }
 0x456   : > { %v3583_v15 = vadd.f32 %v7671_v29, %v3564_v10 }
 0x457   : > { %v3122_v2 = vpop.f32.mrf.mxu0 }
 0x458   : > { %3599 = vst [vmem:[%s7680_s4 + $0x50] sm:$0xff] %v3583_v15  ;;  %v3142_v14 = vadd.f32 %v3122_v2, %v2929_v21 }
 0x459   : > { %v2912_v19 = vpop.f32.mrf.mxu3 }
 0x45a   : > { %v2930_v30 = vadd.f32 %v2912_v19, %v7656_v63 }
 0x45d   : > { %v3332_v12 = vpop.f32.mrf.mxu1 }
 0x45e   : > { %v3354_v56 = vadd.f32 %v3332_v12, %v3141_v46 }
 0x45f   : > { %v3125_v48 = vpop.f32.mrf.mxu0 }
 0x460   : > { %v3143_v25 = vadd.f32 %v3125_v48, %v2930_v30 }
 0x464   : > { %v3539_v7 = vpop.f32.mrf.mxu2 }
 0x465   : > { %v3565_v23 = vadd.f32 %v3539_v7, %v3352_v1 }
 0x467   : > { %v3584_v45 = vadd.f32 %v7671_v29, %v3565_v23 }
 0x469   : > { %3600 = vst [vmem:[%s7680_s4 + $0x58] sm:$0xff] %v3584_v45 }
 0x47b   : > { %v3335_v17 = vpop.f32.mrf.mxu1 }
 0x47c   : > { %v3355_v49 = vadd.f32 %v3335_v17, %v3142_v14 }
 0x481   : > { %v3542_v37 = vpop.f32.mrf.mxu2 }
 0x482   : > { %v3566_v62 = vadd.f32 %v3542_v37, %v3353_v36 }
 0x484   : > { %v3585_v59 = vadd.f32 %v7671_v29, %v3566_v62 }
 0x486   : > { %3601 = vst [vmem:[%s7680_s4 + $0x60] sm:$0xff] %v3585_v59 }
 0x493   : > { %v3338_v51 = vpop.f32.mrf.mxu1 }
 0x494   : > { %v3356_v24 = vadd.f32 %v3338_v51, %v3143_v25 }
 0x499   : > { %v3545_v31 = vpop.f32.mrf.mxu2 }
 0x49a   : > { %v3567_v57 = vadd.f32 %v3545_v31, %v3354_v56 }
 0x49c   : > { %v3586_v47 = vadd.f32 %v7671_v29, %v3567_v57 }
 0x49e   : > { %3602 = vst [vmem:[%s7680_s4 + $0x68] sm:$0xff] %v3586_v47 }
 0x4ba   : > { %v3548_v38 = vpop.f32.mrf.mxu2 }
 0x4bb   : > { %v3568_v50 = vadd.f32 %v3548_v38, %v3355_v49 }
 0x4bd   : > { %v3587_v33 = vadd.f32 %v7671_v29, %v3568_v50 }
 0x4bf   : > { %3603 = vst [vmem:[%s7680_s4 + $0x70] sm:$0xff] %v3587_v33 }
 0x4cc   : > { %v3551_v4 = vpop.f32.mrf.mxu2 }
 0x4cd   : > { %v3569_v9 = vadd.f32 %v3551_v4, %v3356_v24 }
 0x4cf   : > { %v3588_v61 = vadd.f32 %v7671_v29, %v3569_v9 }
 0x4d1   : > { %3604 = vst [vmem:[%s7680_s4 + $0x78] sm:$0xff] %v3588_v61 }
 0x4d2 PF: > { %s13_s16 = sadd.s32 1, %s4029_s16   ;;  %s8275_s12 = smov %s4021_s14 }
 0x4d3   : > { %p10_p7 = scmp.ge.s32.totalorder %s13_s16, 6   ;;  %s8276_s13 = smov %s4025_s15 }
 0x4d4   : > { %s8277_s14 = smov %s8280_s17  ;;  %s8278_s15 = smov %s8284_s18 }
 0x4d5   :  { %12 = sbr.rel (!%p10_p7) target bundleno = 3 (0x3), region = 63 }

</bundles_post_ra>
